<compile_context>
chip_gen: v7x
topology: tpu7x:2x2x1
jax: 0.10.0
libtpu: 0.0.40
codegen_flags: <defaults>
</compile_context>

<pallas_src>
import math
from functools import partial

import jax
import jax.numpy as jnp
from jax.experimental import pallas as pl
from jax.experimental.pallas import tpu as pltpu

F32 = jnp.float32
BF16 = jnp.bfloat16
_NEG = jnp.float32(-1e9)

_COMPILER_1D = pltpu.CompilerParams(
    dimension_semantics=("parallel",),
    vmem_limit_bytes=32 * 1024 * 1024,
)


# ----------------------------- in-kernel helpers ------------------------------

def _add_layernorm(x, y, g, b, eps=1e-5):
    # LayerNorm(x + y) over last dim, eps = 1e-5 (PyTorch default), biased variance.
    z = x + y
    mu = jnp.mean(z, axis=-1, keepdims=True)
    var = jnp.mean((z - mu) * (z - mu), axis=-1, keepdims=True)
    return (z - mu) * jax.lax.rsqrt(var + eps) * g + b


def _attend(q, k, v, bias, n_head):
    # q: (Sq, D) f32, k/v: (Sk, D) f32, bias: (Sq or 1, Sk) additive f32 (0 / -1e9).
    # Heads are sliced from the D axis in-kernel (no HBM relayout).
    D = q.shape[-1]
    dk = D // n_head
    scale = jnp.float32(1.0 / math.sqrt(dk))
    heads = []
    for h in range(n_head):
        sl = slice(h * dk, (h + 1) * dk)
        qh = q[:, sl].astype(BF16)
        kh = k[:, sl].astype(BF16)
        vh = v[:, sl].astype(BF16)
        s = jnp.dot(qh, kh.T, preferred_element_type=F32) * scale + bias
        s = s - jnp.max(s, axis=-1, keepdims=True)
        p = jnp.exp(s)
        p = p * pl.reciprocal(jnp.sum(p, axis=-1, keepdims=True), approx=True)
        heads.append(jnp.dot(p.astype(BF16), vh, preferred_element_type=F32))
    return jnp.concatenate(heads, axis=-1)          # (Sq, D)


# ----------------------------- Pallas kernels ------------------------------

def _self_attn_layer_kernel(x_ref, bias_ref, wqkv_ref, bqkv_ref, wo_ref, bo_ref,
                            g_ref, b_ref, o_ref, *, n_head):
    # One batch element per grid step: fused QKV proj + MHA + out proj + add&LN.
    x = x_ref[0]                                                   # (S, D) f32
    D = x.shape[-1]
    qkv = jnp.dot(x.astype(BF16), wqkv_ref[...],
                  preferred_element_type=F32) + bqkv_ref[...]      # (S, 3D)
    ctx = _attend(qkv[:, :D], qkv[:, D:2 * D], qkv[:, 2 * D:],
                  bias_ref[0], n_head)                             # (S, D)
    attn = jnp.dot(ctx.astype(BF16), wo_ref[...],
                   preferred_element_type=F32) + bo_ref[...]
    o_ref[0] = _add_layernorm(x, attn, g_ref[...], b_ref[...])


def _cross_attn_layer_kernel(y_ref, enc_ref, bias_ref, wq_ref, bq_ref,
                             wkv_ref, bkv_ref, wo_ref, bo_ref,
                             g_ref, b_ref, o_ref, *, n_head):
    # One batch element per grid step: Q proj (query stream) + fused KV proj (memory
    # stream) + MHA + out proj + add&LN.
    y = y_ref[0]                                                   # (St, D)
    e = enc_ref[0]                                                 # (Ss, D)
    D = y.shape[-1]
    q = jnp.dot(y.astype(BF16), wq_ref[...],
                preferred_element_type=F32) + bq_ref[...]          # (St, D)
    kv = jnp.dot(e.astype(BF16), wkv_ref[...],
                 preferred_element_type=F32) + bkv_ref[...]        # (Ss, 2D)
    ctx = _attend(q, kv[:, :D], kv[:, D:], bias_ref[0], n_head)
    attn = jnp.dot(ctx.astype(BF16), wo_ref[...],
                   preferred_element_type=F32) + bo_ref[...]
    o_ref[0] = _add_layernorm(y, attn, g_ref[...], b_ref[...])


def _ffn_layer_kernel(x_ref, w1_ref, b1_ref, w2_ref, b2_ref, g_ref, b_ref, o_ref):
    # Fused FFN + residual + LayerNorm; the (tm, d_ff) hidden never leaves VMEM.
    x = x_ref[...]                                                 # (tm, D)
    h = jnp.maximum(jnp.dot(x.astype(BF16), w1_ref[...],
                            preferred_element_type=F32) + b1_ref[...], 0.0)
    y = jnp.dot(h.astype(BF16), w2_ref[...],
                preferred_element_type=F32) + b2_ref[...]
    o_ref[...] = _add_layernorm(x, y, g_ref[...], b_ref[...])


def _linear_kernel(x_ref, w_ref, b_ref, o_ref):
    o_ref[...] = jnp.dot(x_ref[...].astype(BF16), w_ref[...],
                         preferred_element_type=F32) + b_ref[...]


# ----------------------------- kernel wrappers ------------------------------

def _full_spec(shape):
    # Whole-array block, resident across all grid steps.
    return pl.BlockSpec(shape, lambda *_: (0,) * len(shape))


def _row_tile(m):
    # Row-tile for the B*S dimension: multiple of 8 (sublane), >=2 grid steps when possible
    # so v7x's second TensorCore gets work.
    if m <= 8:
        return m
    for t in (512, 256, 128, 64, 32, 16, 8):
        if m % t == 0 and m // t >= 2:
            return t
    return m


def self_attention_layer(x, bias, p, ln, n_head):
    # x: (B, S, D); bias: (B, Sq_or_1, S) additive f32.
    B, S, D = x.shape
    return pl.pallas_call(
        partial(_self_attn_layer_kernel, n_head=n_head),
        grid=(B,),
        in_specs=[
            pl.BlockSpec((1, S, D), lambda b: (b, 0, 0)),
            pl.BlockSpec((1,) + bias.shape[1:], lambda b: (b, 0, 0)),
            _full_spec((D, 3 * D)),
            _full_spec((1, 3 * D)),
            _full_spec((D, D)),
            _full_spec((1, D)),
            _full_spec((1, D)),
            _full_spec((1, D)),
        ],
        out_specs=pl.BlockSpec((1, S, D), lambda b: (b, 0, 0)),
        out_shape=jax.ShapeDtypeStruct((B, S, D), F32),
        compiler_params=_COMPILER_1D,
    )(x, bias, p["wqkv"], p["bqkv"].reshape(1, 3 * D), p["wo"],
      p["bo"].reshape(1, D), ln["g"].reshape(1, D), ln["b"].reshape(1, D))


def cross_attention_layer(y, enc_out, bias, p, ln, n_head):
    # y: (B, St, D) query stream / residual; enc_out: (B, Ss, D) memory stream.
    B, St, D = y.shape
    Ss = enc_out.shape[1]
    return pl.pallas_call(
        partial(_cross_attn_layer_kernel, n_head=n_head),
        grid=(B,),
        in_specs=[
            pl.BlockSpec((1, St, D), lambda b: (b, 0, 0)),
            pl.BlockSpec((1, Ss, D), lambda b: (b, 0, 0)),
            pl.BlockSpec((1,) + bias.shape[1:], lambda b: (b, 0, 0)),
            _full_spec((D, D)),
            _full_spec((1, D)),
            _full_spec((D, 2 * D)),
            _full_spec((1, 2 * D)),
            _full_spec((D, D)),
            _full_spec((1, D)),
            _full_spec((1, D)),
            _full_spec((1, D)),
        ],
        out_specs=pl.BlockSpec((1, St, D), lambda b: (b, 0, 0)),
        out_shape=jax.ShapeDtypeStruct((B, St, D), F32),
        compiler_params=_COMPILER_1D,
    )(y, enc_out, bias, p["wq"], p["bq"].reshape(1, D),
      p["wkv"], p["bkv"].reshape(1, 2 * D), p["wo"], p["bo"].reshape(1, D),
      ln["g"].reshape(1, D), ln["b"].reshape(1, D))


def ffn_layer(x, p, ln):
    B, S, D = x.shape
    M = B * S
    tm = _row_tile(M)
    d_ff = p["w1"].shape[1]
    out = pl.pallas_call(
        _ffn_layer_kernel,
        grid=(M // tm,),
        in_specs=[
            pl.BlockSpec((tm, D), lambda i: (i, 0)),
            _full_spec((D, d_ff)),
            _full_spec((1, d_ff)),
            _full_spec((d_ff, D)),
            _full_spec((1, D)),
            _full_spec((1, D)),
            _full_spec((1, D)),
        ],
        out_specs=pl.BlockSpec((tm, D), lambda i: (i, 0)),
        out_shape=jax.ShapeDtypeStruct((M, D), F32),
        compiler_params=_COMPILER_1D,
    )(x.reshape(M, D), p["w1"], p["b1"].reshape(1, d_ff), p["w2"],
      p["b2"].reshape(1, D), ln["g"].reshape(1, D), ln["b"].reshape(1, D))
    return out.reshape(B, S, D)


def linear(x2, w, b):
    # x2: (M, K), w: (K, N) bf16, b: (N,).
    # TODO(synk): add K/N tiling (f32 accumulator scratch + pl.when init/writeback) for
    # large d_model / vocab sizes; at this toy config only the M axis needs a grid.
    M, K = x2.shape
    N = w.shape[1]
    tm = _row_tile(M)
    return pl.pallas_call(
        _linear_kernel,
        grid=(M // tm,),
        in_specs=[
            pl.BlockSpec((tm, K), lambda i: (i, 0)),
            _full_spec((K, N)),
            _full_spec((1, N)),
        ],
        out_specs=pl.BlockSpec((tm, N), lambda i: (i, 0)),
        out_shape=jax.ShapeDtypeStruct((M, N), F32),
        compiler_params=_COMPILER_1D,
    )(x2, w, b.reshape(1, N))


# ----------------------------- model pieces ------------------------------

def encoder_layer(x, src_bias, p, n_head):
    x = self_attention_layer(x, src_bias, p["attn"], p["ln1"], n_head)
    x = ffn_layer(x, p["ffn"], p["ln2"])
    return x


def decoder_layer(y, enc_out, src_bias, tgt_bias, p, n_head):
    y = self_attention_layer(y, tgt_bias, p["self_attn"], p["ln1"], n_head)
    y = cross_attention_layer(y, enc_out, src_bias, p["cross_attn"], p["ln2"], n_head)
    y = ffn_layer(y, p["ffn"], p["ln3"])
    return y


def positional_encoding_table(max_seq_len, d_emb):
    position = jnp.arange(max_seq_len, dtype=F32)[:, None]
    div_term = jnp.exp(jnp.arange(0, d_emb, 2, dtype=F32)
                       * (-math.log(10000.0) / d_emb))
    pe = jnp.zeros((max_seq_len, d_emb), F32)
    pe = pe.at[:, 0::2].set(jnp.sin(position * div_term))
    pe = pe.at[:, 1::2].set(jnp.cos(position * div_term))
    return pe


@partial(jax.jit, static_argnames=("n_head",))
def transformer_forward(params, src, tgt, n_head):
    B, Ss = src.shape
    _, St = tgt.shape
    D = params["enc_emb"].shape[1]

    # Additive attention biases (0 = attend, -1e9 = masked): same semantics as
    # generate_mask() in the reference module, never materialized per head.
    src_bias = jnp.where(src != 0, 0.0, _NEG).astype(F32)[:, None, :]        # (B,1,Ss)
    causal = jnp.tril(jnp.ones((St, St), dtype=bool))[None, :, :]            # (1,St,St)
    tgt_keep = (tgt != 0)[:, None, :] & causal                               # (B,St,St)
    tgt_bias = jnp.where(tgt_keep, 0.0, _NEG).astype(F32)

    pe = params["pe"]
    x = params["enc_emb"][src] + pe[:Ss][None, :, :]
    y = params["dec_emb"][tgt] + pe[:St][None, :, :]
    # dropout -> identity (eval mode)

    for lp in params["enc_layers"]:
        x = encoder_layer(x, src_bias, lp, n_head)
    for lp in params["dec_layers"]:
        y = decoder_layer(y, x, src_bias, tgt_bias, lp, n_head)

    out = linear(y.reshape(B * St, D), params["fc_w"], params["fc_b"])
    return out.reshape(B, St, -1)


# ----------------------------- parameter init ------------------------------

def init_params(key, src_vocab, tgt_vocab, d, n_head, d_ff, n_layer, max_seq_len):
    keys = iter(jax.random.split(key, 256))

    def w(shape, dtype=BF16):
        # Matmul weights are stored in bf16 (MXU-native inputs, half the HBM bytes);
        # f32 accumulation happens in-kernel.
        return (jax.random.normal(next(keys), shape, F32) * 0.02).astype(dtype)

    def zeros(n):
        return jnp.zeros((n,), F32)

    def ones(n):
        return jnp.ones((n,), F32)

    def self_mha():
        # Fused Q|K|V projection: one (d, 3d) weight -> single MXU pass per sub-layer.
        return dict(wqkv=w((d, 3 * d)), bqkv=zeros(3 * d),
                    wo=w((d, d)), bo=zeros(d))

    def cross_mha():
        # Q projection on the query stream, fused K|V projection on the memory stream.
        return dict(wq=w((d, d)), bq=zeros(d),
                    wkv=w((d, 2 * d)), bkv=zeros(2 * d),
                    wo=w((d, d)), bo=zeros(d))

    def ffn():
        return dict(w1=w((d, d_ff)), b1=zeros(d_ff), w2=w((d_ff, d)), b2=zeros(d))

    def ln():
        return dict(g=ones(d), b=zeros(d))

    return dict(
        enc_emb=w((src_vocab, d), F32),
        dec_emb=w((tgt_vocab, d), F32),
        pe=positional_encoding_table(max_seq_len, d),
        enc_layers=[dict(attn=self_mha(), ffn=ffn(), ln1=ln(), ln2=ln())
                    for _ in range(n_layer)],
        dec_layers=[dict(self_attn=self_mha(), cross_attn=cross_mha(), ffn=ffn(),
                         ln1=ln(), ln2=ln(), ln3=ln())
                    for _ in range(n_layer)],
        fc_w=w((d, tgt_vocab)),
        fc_b=zeros(tgt_vocab),
    )


# ----------------------------- main ------------------------------

if __name__ == "__main__":
    src_vocab_size, tgt_vocab_size = 16, 16
    d_embedding, n_head, d_ff, n_layer = 32, 4, 64, 2
    max_seq_len = 16
    B, Ss, St = 2, 8, 8

    key = jax.random.PRNGKey(0)
    kp, ks, kt = jax.random.split(key, 3)

    params = init_params(kp, src_vocab_size, tgt_vocab_size, d_embedding,
                         n_head, d_ff, n_layer, max_seq_len)

    # token 0 acts as padding and exercises the masks
    src = jax.random.randint(ks, (B, Ss), 0, src_vocab_size, dtype=jnp.int32)
    tgt = jax.random.randint(kt, (B, St), 0, tgt_vocab_size, dtype=jnp.int32)

    out = transformer_forward(params, src, tgt, n_head)
    out = jax.block_until_ready(out)

    assert out.shape == (B, St, tgt_vocab_size), out.shape
    assert bool(jnp.all(jnp.isfinite(out)))
    print("KERNEL_OK")
</pallas_src>

<mosaic_0001>
module attributes {stable_mosaic.version = 11 : i64} {
  func.func @_ffn_layer_kernel(%arg0: i32, %arg1: memref<8x32xf32, #tpu.memory_space<vmem>>, %arg2: memref<32x64xbf16, #tpu.memory_space<vmem>>, %arg3: memref<1x64xf32, #tpu.memory_space<vmem>>, %arg4: memref<64x32xbf16, #tpu.memory_space<vmem>>, %arg5: memref<1x32xf32, #tpu.memory_space<vmem>>, %arg6: memref<1x32xf32, #tpu.memory_space<vmem>>, %arg7: memref<1x32xf32, #tpu.memory_space<vmem>>, %arg8: memref<8x32xf32, #tpu.memory_space<vmem>>) attributes {dimension_semantics = [#tpu.dimension_semantics<parallel>], iteration_bounds = array<i64: 2>, scalar_prefetch = 0 : i64, scratch_operands = 0 : i64, tpu.core_type = #tpu.core_type<tc>, window_params = [{transform_indices = @transform_0, window_bounds = array<i64: 8, 32>}, {pipeline_mode = #tpu.pipeline_mode<synchronous>, transform_indices = @transform_1, window_bounds = array<i64: 32, 64>}, {pipeline_mode = #tpu.pipeline_mode<synchronous>, transform_indices = @transform_2, window_bounds = array<i64: 1, 64>}, {pipeline_mode = #tpu.pipeline_mode<synchronous>, transform_indices = @transform_3, window_bounds = array<i64: 64, 32>}, {pipeline_mode = #tpu.pipeline_mode<synchronous>, transform_indices = @transform_4, window_bounds = array<i64: 1, 32>}, {pipeline_mode = #tpu.pipeline_mode<synchronous>, transform_indices = @transform_5, window_bounds = array<i64: 1, 32>}, {pipeline_mode = #tpu.pipeline_mode<synchronous>, transform_indices = @transform_6, window_bounds = array<i64: 1, 32>}, {transform_indices = @transform_7, window_bounds = array<i64: 8, 32>}]} {
    %c0 = arith.constant 0 : index
    %c0_0 = arith.constant 0 : index
    %0 = vector.load %arg1[%c0, %c0_0] : memref<8x32xf32, #tpu.memory_space<vmem>>, vector<8x32xf32>
    %1 = arith.truncf %0 : vector<8x32xf32> to vector<8x32xbf16>
    %c0_1 = arith.constant 0 : index
    %c0_2 = arith.constant 0 : index
    %2 = vector.load %arg2[%c0_1, %c0_2] : memref<32x64xbf16, #tpu.memory_space<vmem>>, vector<32x64xbf16>
    %cst = arith.constant dense<0.000000e+00> : vector<8x64xf32>
    %3 = tpu.matmul %1, %2, %cst {dimension_numbers = #tpu.dot_dimension_numbers<[1], [0], [0], [1], [0, 0, 1, 1], [], []>} : vector<8x32xbf16>, vector<32x64xbf16>, vector<8x64xf32> -> vector<8x64xf32>
    %c0_3 = arith.constant 0 : index
    %c0_4 = arith.constant 0 : index
    %4 = vector.load %arg3[%c0_3, %c0_4] : memref<1x64xf32, #tpu.memory_space<vmem>>, vector<1x64xf32>
    %5 = vector.broadcast %4 : vector<1x64xf32> to vector<8x64xf32>
    %6 = arith.addf %3, %5 : vector<8x64xf32>
    %cst_5 = arith.constant 0.000000e+00 : f32
    %7 = vector.broadcast %cst_5 : f32 to vector<8x64xf32>
    %8 = arith.maximumf %6, %7 : vector<8x64xf32>
    %9 = arith.truncf %8 : vector<8x64xf32> to vector<8x64xbf16>
    %c0_6 = arith.constant 0 : index
    %c0_7 = arith.constant 0 : index
    %10 = vector.load %arg4[%c0_6, %c0_7] : memref<64x32xbf16, #tpu.memory_space<vmem>>, vector<64x32xbf16>
    %cst_8 = arith.constant dense<0.000000e+00> : vector<8x32xf32>
    %11 = tpu.matmul %9, %10, %cst_8 {dimension_numbers = #tpu.dot_dimension_numbers<[1], [0], [0], [1], [0, 0, 1, 1], [], []>} : vector<8x64xbf16>, vector<64x32xbf16>, vector<8x32xf32> -> vector<8x32xf32>
    %c0_9 = arith.constant 0 : index
    %c0_10 = arith.constant 0 : index
    %12 = vector.load %arg5[%c0_9, %c0_10] : memref<1x32xf32, #tpu.memory_space<vmem>>, vector<1x32xf32>
    %13 = vector.broadcast %12 : vector<1x32xf32> to vector<8x32xf32>
    %14 = arith.addf %11, %13 : vector<8x32xf32>
    %c0_11 = arith.constant 0 : index
    %c0_12 = arith.constant 0 : index
    %15 = vector.load %arg6[%c0_11, %c0_12] : memref<1x32xf32, #tpu.memory_space<vmem>>, vector<1x32xf32>
    %c0_13 = arith.constant 0 : index
    %c0_14 = arith.constant 0 : index
    %16 = vector.load %arg7[%c0_13, %c0_14] : memref<1x32xf32, #tpu.memory_space<vmem>>, vector<1x32xf32>
    %17 = arith.addf %0, %14 : vector<8x32xf32>
    %cst_15 = arith.constant dense<0.000000e+00> : vector<8xf32>
    %18 = vector.multi_reduction <add>, %17, %cst_15 [1] : vector<8x32xf32> to vector<8xf32>
    %19 = vector.shape_cast %18 : vector<8xf32> to vector<8x1xf32>
    %cst_16 = arith.constant 3.200000e+01 : f32
    %20 = vector.broadcast %cst_16 : f32 to vector<8x1xf32>
    %21 = arith.divf %19, %20 : vector<8x1xf32>
    %22 = vector.broadcast %21 : vector<8x1xf32> to vector<8x32xf32>
    %23 = arith.subf %17, %22 : vector<8x32xf32>
    %24 = vector.broadcast %21 : vector<8x1xf32> to vector<8x32xf32>
    %25 = arith.subf %17, %24 : vector<8x32xf32>
    %26 = arith.mulf %23, %25 : vector<8x32xf32>
    %cst_17 = arith.constant dense<0.000000e+00> : vector<8xf32>
    %27 = vector.multi_reduction <add>, %26, %cst_17 [1] : vector<8x32xf32> to vector<8xf32>
    %28 = vector.shape_cast %27 : vector<8xf32> to vector<8x1xf32>
    %cst_18 = arith.constant 3.200000e+01 : f32
    %29 = vector.broadcast %cst_18 : f32 to vector<8x1xf32>
    %30 = arith.divf %28, %29 : vector<8x1xf32>
    %31 = vector.broadcast %21 : vector<8x1xf32> to vector<8x32xf32>
    %32 = arith.subf %17, %31 : vector<8x32xf32>
    %cst_19 = arith.constant 9.99999974E-6 : f32
    %33 = vector.broadcast %cst_19 : f32 to vector<8x1xf32>
    %34 = arith.addf %30, %33 : vector<8x1xf32>
    %35 = math.rsqrt %34 : vector<8x1xf32>
    %36 = vector.broadcast %35 : vector<8x1xf32> to vector<8x32xf32>
    %37 = arith.mulf %32, %36 : vector<8x32xf32>
    %38 = vector.broadcast %15 : vector<1x32xf32> to vector<8x32xf32>
    %39 = arith.mulf %37, %38 : vector<8x32xf32>
    %40 = vector.broadcast %16 : vector<1x32xf32> to vector<8x32xf32>
    %41 = arith.addf %39, %40 : vector<8x32xf32>
    %c0_20 = arith.constant 0 : index
    %c0_21 = arith.constant 0 : index
    %42 = vector.load %arg8[%c0_20, %c0_21] : memref<8x32xf32, #tpu.memory_space<vmem>>, vector<8x32xf32>
    tpu.vector_store %arg8[%c0_20, %c0_21], %41 {strides = array<i32>} : memref<8x32xf32, #tpu.memory_space<vmem>>, vector<8x32xf32>,
    return
  }
  func.func @transform_0(%arg0: i32) -> (i32, i32) {
    %c0_i32 = arith.constant 0 : i32
    %c0_i32_0 = arith.constant 0 : i32
    return %arg0, %c0_i32 : i32, i32
  }
  func.func @transform_1(%arg0: i32) -> (i32, i32) {
    %c0_i32 = arith.constant 0 : i32
    %c0_i32_0 = arith.constant 0 : i32
    %c0_i32_1 = arith.constant 0 : i32
    return %c0_i32, %c0_i32_0 : i32, i32
  }
  func.func @transform_2(%arg0: i32) -> (i32, i32) {
    %c0_i32 = arith.constant 0 : i32
    %c0_i32_0 = arith.constant 0 : i32
    %c0_i32_1 = arith.constant 0 : i32
    return %c0_i32, %c0_i32_0 : i32, i32
  }
  func.func @transform_3(%arg0: i32) -> (i32, i32) {
    %c0_i32 = arith.constant 0 : i32
    %c0_i32_0 = arith.constant 0 : i32
    %c0_i32_1 = arith.constant 0 : i32
    return %c0_i32, %c0_i32_0 : i32, i32
  }
  func.func @transform_4(%arg0: i32) -> (i32, i32) {
    %c0_i32 = arith.constant 0 : i32
    %c0_i32_0 = arith.constant 0 : i32
    %c0_i32_1 = arith.constant 0 : i32
    return %c0_i32, %c0_i32_0 : i32, i32
  }
  func.func @transform_5(%arg0: i32) -> (i32, i32) {
    %c0_i32 = arith.constant 0 : i32
    %c0_i32_0 = arith.constant 0 : i32
    %c0_i32_1 = arith.constant 0 : i32
    return %c0_i32, %c0_i32_0 : i32, i32
  }
  func.func @transform_6(%arg0: i32) -> (i32, i32) {
    %c0_i32 = arith.constant 0 : i32
    %c0_i32_0 = arith.constant 0 : i32
    %c0_i32_1 = arith.constant 0 : i32
    return %c0_i32, %c0_i32_0 : i32, i32
  }
  func.func @transform_7(%arg0: i32) -> (i32, i32) {
    %c0_i32 = arith.constant 0 : i32
    %c0_i32_0 = arith.constant 0 : i32
    return %arg0, %c0_i32 : i32, i32
  }
}

module attributes {stable_mosaic.version = 11 : i64} {
  func.func @_self_attn_layer_kernel(%arg0: i32, %arg1: memref<1x8x32xf32, #tpu.memory_space<vmem>>, %arg2: memref<1x1x8xf32, #tpu.memory_space<vmem>>, %arg3: memref<32x96xbf16, #tpu.memory_space<vmem>>, %arg4: memref<1x96xf32, #tpu.memory_space<vmem>>, %arg5: memref<32x32xbf16, #tpu.memory_space<vmem>>, %arg6: memref<1x32xf32, #tpu.memory_space<vmem>>, %arg7: memref<1x32xf32, #tpu.memory_space<vmem>>, %arg8: memref<1x32xf32, #tpu.memory_space<vmem>>, %arg9: memref<1x8x32xf32, #tpu.memory_space<vmem>>) attributes {dimension_semantics = [#tpu.dimension_semantics<parallel>], iteration_bounds = array<i64: 2>, scalar_prefetch = 0 : i64, scratch_operands = 0 : i64, tpu.core_type = #tpu.core_type<tc>, window_params = [{transform_indices = @transform_0, window_bounds = array<i64: 1, 8, 32>}, {transform_indices = @transform_1, window_bounds = array<i64: 1, 1, 8>}, {pipeline_mode = #tpu.pipeline_mode<synchronous>, transform_indices = @transform_2, window_bounds = array<i64: 32, 96>}, {pipeline_mode = #tpu.pipeline_mode<synchronous>, transform_indices = @transform_3, window_bounds = array<i64: 1, 96>}, {pipeline_mode = #tpu.pipeline_mode<synchronous>, transform_indices = @transform_4, window_bounds = array<i64: 32, 32>}, {pipeline_mode = #tpu.pipeline_mode<synchronous>, transform_indices = @transform_5, window_bounds = array<i64: 1, 32>}, {pipeline_mode = #tpu.pipeline_mode<synchronous>, transform_indices = @transform_6, window_bounds = array<i64: 1, 32>}, {pipeline_mode = #tpu.pipeline_mode<synchronous>, transform_indices = @transform_7, window_bounds = array<i64: 1, 32>}, {transform_indices = @transform_8, window_bounds = array<i64: 1, 8, 32>}]} {
    %c0 = arith.constant 0 : index
    %c0_0 = arith.constant 0 : index
    %c0_1 = arith.constant 0 : index
    %0 = vector.load %arg1[%c0, %c0_0, %c0_1] : memref<1x8x32xf32, #tpu.memory_space<vmem>>, vector<1x8x32xf32>
    %1 = vector.shape_cast %0 : vector<1x8x32xf32> to vector<8x32xf32>
    %2 = arith.truncf %1 : vector<8x32xf32> to vector<8x32xbf16>
    %c0_2 = arith.constant 0 : index
    %c0_3 = arith.constant 0 : index
    %3 = vector.load %arg3[%c0_2, %c0_3] : memref<32x96xbf16, #tpu.memory_space<vmem>>, vector<32x96xbf16>
    %cst = arith.constant dense<0.000000e+00> : vector<8x96xf32>
    %4 = tpu.matmul %2, %3, %cst {dimension_numbers = #tpu.dot_dimension_numbers<[1], [0], [0], [1], [0, 0, 1, 1], [], []>} : vector<8x32xbf16>, vector<32x96xbf16>, vector<8x96xf32> -> vector<8x96xf32>
    %c0_4 = arith.constant 0 : index
    %c0_5 = arith.constant 0 : index
    %5 = vector.load %arg4[%c0_4, %c0_5] : memref<1x96xf32, #tpu.memory_space<vmem>>, vector<1x96xf32>
    %6 = vector.broadcast %5 : vector<1x96xf32> to vector<8x96xf32>
    %7 = arith.addf %4, %6 : vector<8x96xf32>
    %8 = vector.extract_strided_slice %7 {offsets = [0, 0], sizes = [8, 32], strides = [1, 1]} : vector<8x96xf32> to vector<8x32xf32>
    %9 = vector.extract_strided_slice %7 {offsets = [0, 32], sizes = [8, 32], strides = [1, 1]} : vector<8x96xf32> to vector<8x32xf32>
    %10 = vector.extract_strided_slice %7 {offsets = [0, 64], sizes = [8, 32], strides = [1, 1]} : vector<8x96xf32> to vector<8x32xf32>
    %c0_6 = arith.constant 0 : index
    %c0_7 = arith.constant 0 : index
    %c0_8 = arith.constant 0 : index
    %11 = vector.load %arg2[%c0_6, %c0_7, %c0_8] : memref<1x1x8xf32, #tpu.memory_space<vmem>>, vector<1x1x8xf32>
    %12 = vector.shape_cast %11 : vector<1x1x8xf32> to vector<1x8xf32>
    %13 = vector.extract_strided_slice %8 {offsets = [0, 0], sizes = [8, 8], strides = [1, 1]} : vector<8x32xf32> to vector<8x8xf32>
    %14 = arith.truncf %13 : vector<8x8xf32> to vector<8x8xbf16>
    %15 = vector.extract_strided_slice %9 {offsets = [0, 0], sizes = [8, 8], strides = [1, 1]} : vector<8x32xf32> to vector<8x8xf32>
    %16 = arith.truncf %15 : vector<8x8xf32> to vector<8x8xbf16>
    %17 = vector.extract_strided_slice %10 {offsets = [0, 0], sizes = [8, 8], strides = [1, 1]} : vector<8x32xf32> to vector<8x8xf32>
    %18 = arith.truncf %17 : vector<8x8xf32> to vector<8x8xbf16>
    %19 = tpu.transpose %16, [1, 0] : vector<8x8xbf16> -> vector<8x8xbf16>
    %cst_9 = arith.constant dense<0.000000e+00> : vector<8x8xf32>
    %20 = tpu.matmul %14, %19, %cst_9 {dimension_numbers = #tpu.dot_dimension_numbers<[1], [0], [0], [1], [0, 0, 1, 1], [], []>} : vector<8x8xbf16>, vector<8x8xbf16>, vector<8x8xf32> -> vector<8x8xf32>
    %cst_10 = arith.constant 0.353553385 : f32
    %21 = vector.broadcast %cst_10 : f32 to vector<8x8xf32>
    %22 = arith.mulf %20, %21 : vector<8x8xf32>
    %23 = vector.broadcast %12 : vector<1x8xf32> to vector<8x8xf32>
    %24 = arith.addf %22, %23 : vector<8x8xf32>
    %cst_11 = arith.constant dense<0xFF800000> : vector<8xf32>
    %25 = vector.multi_reduction <maximumf>, %24, %cst_11 [1] : vector<8x8xf32> to vector<8xf32>
    %26 = vector.shape_cast %25 : vector<8xf32> to vector<8x1xf32>
    %27 = vector.broadcast %26 : vector<8x1xf32> to vector<8x8xf32>
    %28 = arith.subf %24, %27 : vector<8x8xf32>
    %29 = math.exp %28 : vector<8x8xf32>
    %cst_12 = arith.constant dense<0.000000e+00> : vector<8xf32>
    %30 = vector.multi_reduction <add>, %29, %cst_12 [1] : vector<8x8xf32> to vector<8xf32>
    %31 = vector.shape_cast %30 : vector<8xf32> to vector<8x1xf32>
    %32 = tpu.reciprocal %31 {approx = true} : vector<8x1xf32> -> vector<8x1xf32>
    %33 = vector.broadcast %32 : vector<8x1xf32> to vector<8x8xf32>
    %34 = arith.mulf %29, %33 : vector<8x8xf32>
    %35 = arith.truncf %34 : vector<8x8xf32> to vector<8x8xbf16>
    %cst_13 = arith.constant dense<0.000000e+00> : vector<8x8xf32>
    %36 = tpu.matmul %35, %18, %cst_13 {dimension_numbers = #tpu.dot_dimension_numbers<[1], [0], [0], [1], [0, 0, 1, 1], [], []>} : vector<8x8xbf16>, vector<8x8xbf16>, vector<8x8xf32> -> vector<8x8xf32>
    %37 = vector.extract_strided_slice %8 {offsets = [0, 8], sizes = [8, 8], strides = [1, 1]} : vector<8x32xf32> to vector<8x8xf32>
    %38 = arith.truncf %37 : vector<8x8xf32> to vector<8x8xbf16>
    %39 = vector.extract_strided_slice %9 {offsets = [0, 8], sizes = [8, 8], strides = [1, 1]} : vector<8x32xf32> to vector<8x8xf32>
    %40 = arith.truncf %39 : vector<8x8xf32> to vector<8x8xbf16>
    %41 = vector.extract_strided_slice %10 {offsets = [0, 8], sizes = [8, 8], strides = [1, 1]} : vector<8x32xf32> to vector<8x8xf32>
    %42 = arith.truncf %41 : vector<8x8xf32> to vector<8x8xbf16>
    %43 = tpu.transpose %40, [1, 0] : vector<8x8xbf16> -> vector<8x8xbf16>
    %cst_14 = arith.constant dense<0.000000e+00> : vector<8x8xf32>
    %44 = tpu.matmul %38, %43, %cst_14 {dimension_numbers = #tpu.dot_dimension_numbers<[1], [0], [0], [1], [0, 0, 1, 1], [], []>} : vector<8x8xbf16>, vector<8x8xbf16>, vector<8x8xf32> -> vector<8x8xf32>
    %cst_15 = arith.constant 0.353553385 : f32
    %45 = vector.broadcast %cst_15 : f32 to vector<8x8xf32>
    %46 = arith.mulf %44, %45 : vector<8x8xf32>
    %47 = vector.broadcast %12 : vector<1x8xf32> to vector<8x8xf32>
    %48 = arith.addf %46, %47 : vector<8x8xf32>
    %cst_16 = arith.constant dense<0xFF800000> : vector<8xf32>
    %49 = vector.multi_reduction <maximumf>, %48, %cst_16 [1] : vector<8x8xf32> to vector<8xf32>
    %50 = vector.shape_cast %49 : vector<8xf32> to vector<8x1xf32>
    %51 = vector.broadcast %50 : vector<8x1xf32> to vector<8x8xf32>
    %52 = arith.subf %48, %51 : vector<8x8xf32>
    %53 = math.exp %52 : vector<8x8xf32>
    %cst_17 = arith.constant dense<0.000000e+00> : vector<8xf32>
    %54 = vector.multi_reduction <add>, %53, %cst_17 [1] : vector<8x8xf32> to vector<8xf32>
    %55 = vector.shape_cast %54 : vector<8xf32> to vector<8x1xf32>
    %56 = tpu.reciprocal %55 {approx = true} : vector<8x1xf32> -> vector<8x1xf32>
    %57 = vector.broadcast %56 : vector<8x1xf32> to vector<8x8xf32>
    %58 = arith.mulf %53, %57 : vector<8x8xf32>
    %59 = arith.truncf %58 : vector<8x8xf32> to vector<8x8xbf16>
    %cst_18 = arith.constant dense<0.000000e+00> : vector<8x8xf32>
    %60 = tpu.matmul %59, %42, %cst_18 {dimension_numbers = #tpu.dot_dimension_numbers<[1], [0], [0], [1], [0, 0, 1, 1], [], []>} : vector<8x8xbf16>, vector<8x8xbf16>, vector<8x8xf32> -> vector<8x8xf32>
    %61 = vector.extract_strided_slice %8 {offsets = [0, 16], sizes = [8, 8], strides = [1, 1]} : vector<8x32xf32> to vector<8x8xf32>
    %62 = arith.truncf %61 : vector<8x8xf32> to vector<8x8xbf16>
    %63 = vector.extract_strided_slice %9 {offsets = [0, 16], sizes = [8, 8], strides = [1, 1]} : vector<8x32xf32> to vector<8x8xf32>
    %64 = arith.truncf %63 : vector<8x8xf32> to vector<8x8xbf16>
    %65 = vector.extract_strided_slice %10 {offsets = [0, 16], sizes = [8, 8], strides = [1, 1]} : vector<8x32xf32> to vector<8x8xf32>
    %66 = arith.truncf %65 : vector<8x8xf32> to vector<8x8xbf16>
    %67 = tpu.transpose %64, [1, 0] : vector<8x8xbf16> -> vector<8x8xbf16>
    %cst_19 = arith.constant dense<0.000000e+00> : vector<8x8xf32>
    %68 = tpu.matmul %62, %67, %cst_19 {dimension_numbers = #tpu.dot_dimension_numbers<[1], [0], [0], [1], [0, 0, 1, 1], [], []>} : vector<8x8xbf16>, vector<8x8xbf16>, vector<8x8xf32> -> vector<8x8xf32>
    %cst_20 = arith.constant 0.353553385 : f32
    %69 = vector.broadcast %cst_20 : f32 to vector<8x8xf32>
    %70 = arith.mulf %68, %69 : vector<8x8xf32>
    %71 = vector.broadcast %12 : vector<1x8xf32> to vector<8x8xf32>
    %72 = arith.addf %70, %71 : vector<8x8xf32>
    %cst_21 = arith.constant dense<0xFF800000> : vector<8xf32>
    %73 = vector.multi_reduction <maximumf>, %72, %cst_21 [1] : vector<8x8xf32> to vector<8xf32>
    %74 = vector.shape_cast %73 : vector<8xf32> to vector<8x1xf32>
    %75 = vector.broadcast %74 : vector<8x1xf32> to vector<8x8xf32>
    %76 = arith.subf %72, %75 : vector<8x8xf32>
    %77 = math.exp %76 : vector<8x8xf32>
    %cst_22 = arith.constant dense<0.000000e+00> : vector<8xf32>
    %78 = vector.multi_reduction <add>, %77, %cst_22 [1] : vector<8x8xf32> to vector<8xf32>
    %79 = vector.shape_cast %78 : vector<8xf32> to vector<8x1xf32>
    %80 = tpu.reciprocal %79 {approx = true} : vector<8x1xf32> -> vector<8x1xf32>
    %81 = vector.broadcast %80 : vector<8x1xf32> to vector<8x8xf32>
    %82 = arith.mulf %77, %81 : vector<8x8xf32>
    %83 = arith.truncf %82 : vector<8x8xf32> to vector<8x8xbf16>
    %cst_23 = arith.constant dense<0.000000e+00> : vector<8x8xf32>
    %84 = tpu.matmul %83, %66, %cst_23 {dimension_numbers = #tpu.dot_dimension_numbers<[1], [0], [0], [1], [0, 0, 1, 1], [], []>} : vector<8x8xbf16>, vector<8x8xbf16>, vector<8x8xf32> -> vector<8x8xf32>
    %85 = vector.extract_strided_slice %8 {offsets = [0, 24], sizes = [8, 8], strides = [1, 1]} : vector<8x32xf32> to vector<8x8xf32>
    %86 = arith.truncf %85 : vector<8x8xf32> to vector<8x8xbf16>
    %87 = vector.extract_strided_slice %9 {offsets = [0, 24], sizes = [8, 8], strides = [1, 1]} : vector<8x32xf32> to vector<8x8xf32>
    %88 = arith.truncf %87 : vector<8x8xf32> to vector<8x8xbf16>
    %89 = vector.extract_strided_slice %10 {offsets = [0, 24], sizes = [8, 8], strides = [1, 1]} : vector<8x32xf32> to vector<8x8xf32>
    %90 = arith.truncf %89 : vector<8x8xf32> to vector<8x8xbf16>
    %91 = tpu.transpose %88, [1, 0] : vector<8x8xbf16> -> vector<8x8xbf16>
    %cst_24 = arith.constant dense<0.000000e+00> : vector<8x8xf32>
    %92 = tpu.matmul %86, %91, %cst_24 {dimension_numbers = #tpu.dot_dimension_numbers<[1], [0], [0], [1], [0, 0, 1, 1], [], []>} : vector<8x8xbf16>, vector<8x8xbf16>, vector<8x8xf32> -> vector<8x8xf32>
    %cst_25 = arith.constant 0.353553385 : f32
    %93 = vector.broadcast %cst_25 : f32 to vector<8x8xf32>
    %94 = arith.mulf %92, %93 : vector<8x8xf32>
    %95 = vector.broadcast %12 : vector<1x8xf32> to vector<8x8xf32>
    %96 = arith.addf %94, %95 : vector<8x8xf32>
    %cst_26 = arith.constant dense<0xFF800000> : vector<8xf32>
    %97 = vector.multi_reduction <maximumf>, %96, %cst_26 [1] : vector<8x8xf32> to vector<8xf32>
    %98 = vector.shape_cast %97 : vector<8xf32> to vector<8x1xf32>
    %99 = vector.broadcast %98 : vector<8x1xf32> to vector<8x8xf32>
    %100 = arith.subf %96, %99 : vector<8x8xf32>
    %101 = math.exp %100 : vector<8x8xf32>
    %cst_27 = arith.constant dense<0.000000e+00> : vector<8xf32>
    %102 = vector.multi_reduction <add>, %101, %cst_27 [1] : vector<8x8xf32> to vector<8xf32>
    %103 = vector.shape_cast %102 : vector<8xf32> to vector<8x1xf32>
    %104 = tpu.reciprocal %103 {approx = true} : vector<8x1xf32> -> vector<8x1xf32>
    %105 = vector.broadcast %104 : vector<8x1xf32> to vector<8x8xf32>
    %106 = arith.mulf %101, %105 : vector<8x8xf32>
    %107 = arith.truncf %106 : vector<8x8xf32> to vector<8x8xbf16>
    %cst_28 = arith.constant dense<0.000000e+00> : vector<8x8xf32>
    %108 = tpu.matmul %107, %90, %cst_28 {dimension_numbers = #tpu.dot_dimension_numbers<[1], [0], [0], [1], [0, 0, 1, 1], [], []>} : vector<8x8xbf16>, vector<8x8xbf16>, vector<8x8xf32> -> vector<8x8xf32>
    %109 = tpu.concatenate %36, %60, %84, %108 in 1 : vector<8x8xf32>, vector<8x8xf32>, vector<8x8xf32>, vector<8x8xf32> -> vector<8x32xf32>
    %110 = arith.truncf %109 : vector<8x32xf32> to vector<8x32xbf16>
    %c0_29 = arith.constant 0 : index
    %c0_30 = arith.constant 0 : index
    %111 = vector.load %arg5[%c0_29, %c0_30] : memref<32x32xbf16, #tpu.memory_space<vmem>>, vector<32x32xbf16>
    %cst_31 = arith.constant dense<0.000000e+00> : vector<8x32xf32>
    %112 = tpu.matmul %110, %111, %cst_31 {dimension_numbers = #tpu.dot_dimension_numbers<[1], [0], [0], [1], [0, 0, 1, 1], [], []>} : vector<8x32xbf16>, vector<32x32xbf16>, vector<8x32xf32> -> vector<8x32xf32>
    %c0_32 = arith.constant 0 : index
    %c0_33 = arith.constant 0 : index
    %113 = vector.load %arg6[%c0_32, %c0_33] : memref<1x32xf32, #tpu.memory_space<vmem>>, vector<1x32xf32>
    %114 = vector.broadcast %113 : vector<1x32xf32> to vector<8x32xf32>
    %115 = arith.addf %112, %114 : vector<8x32xf32>
    %c0_34 = arith.constant 0 : index
    %c0_35 = arith.constant 0 : index
    %116 = vector.load %arg7[%c0_34, %c0_35] : memref<1x32xf32, #tpu.memory_space<vmem>>, vector<1x32xf32>
    %c0_36 = arith.constant 0 : index
    %c0_37 = arith.constant 0 : index
    %117 = vector.load %arg8[%c0_36, %c0_37] : memref<1x32xf32, #tpu.memory_space<vmem>>, vector<1x32xf32>
    %118 = arith.addf %1, %115 : vector<8x32xf32>
    %cst_38 = arith.constant dense<0.000000e+00> : vector<8xf32>
    %119 = vector.multi_reduction <add>, %118, %cst_38 [1] : vector<8x32xf32> to vector<8xf32>
    %120 = vector.shape_cast %119 : vector<8xf32> to vector<8x1xf32>
    %cst_39 = arith.constant 3.200000e+01 : f32
    %121 = vector.broadcast %cst_39 : f32 to vector<8x1xf32>
    %122 = arith.divf %120, %121 : vector<8x1xf32>
    %123 = vector.broadcast %122 : vector<8x1xf32> to vector<8x32xf32>
    %124 = arith.subf %118, %123 : vector<8x32xf32>
    %125 = vector.broadcast %122 : vector<8x1xf32> to vector<8x32xf32>
    %126 = arith.subf %118, %125 : vector<8x32xf32>
    %127 = arith.mulf %124, %126 : vector<8x32xf32>
    %cst_40 = arith.constant dense<0.000000e+00> : vector<8xf32>
    %128 = vector.multi_reduction <add>, %127, %cst_40 [1] : vector<8x32xf32> to vector<8xf32>
    %129 = vector.shape_cast %128 : vector<8xf32> to vector<8x1xf32>
    %cst_41 = arith.constant 3.200000e+01 : f32
    %130 = vector.broadcast %cst_41 : f32 to vector<8x1xf32>
    %131 = arith.divf %129, %130 : vector<8x1xf32>
    %132 = vector.broadcast %122 : vector<8x1xf32> to vector<8x32xf32>
    %133 = arith.subf %118, %132 : vector<8x32xf32>
    %cst_42 = arith.constant 9.99999974E-6 : f32
    %134 = vector.broadcast %cst_42 : f32 to vector<8x1xf32>
    %135 = arith.addf %131, %134 : vector<8x1xf32>
    %136 = math.rsqrt %135 : vector<8x1xf32>
    %137 = vector.broadcast %136 : vector<8x1xf32> to vector<8x32xf32>
    %138 = arith.mulf %133, %137 : vector<8x32xf32>
    %139 = vector.broadcast %116 : vector<1x32xf32> to vector<8x32xf32>
    %140 = arith.mulf %138, %139 : vector<8x32xf32>
    %141 = vector.broadcast %117 : vector<1x32xf32> to vector<8x32xf32>
    %142 = arith.addf %140, %141 : vector<8x32xf32>
    %c0_43 = arith.constant 0 : index
    %c0_44 = arith.constant 0 : index
    %c0_45 = arith.constant 0 : index
    %143 = vector.load %arg9[%c0_43, %c0_44, %c0_45] : memref<1x8x32xf32, #tpu.memory_space<vmem>>, vector<1x8x32xf32>
    %144 = vector.shape_cast %143 : vector<1x8x32xf32> to vector<8x32xf32>
    %145 = vector.shape_cast %142 : vector<8x32xf32> to vector<1x8x32xf32>
    tpu.vector_store %arg9[%c0_43, %c0_44, %c0_45], %145 {strides = array<i32>} : memref<1x8x32xf32, #tpu.memory_space<vmem>>, vector<1x8x32xf32>,
    return
  }
  func.func @transform_0(%arg0: i32) -> (i32, i32, i32) {
    %c0_i32 = arith.constant 0 : i32
    %c0_i32_0 = arith.constant 0 : i32
    %c0_i32_1 = arith.constant 0 : i32
    return %arg0, %c0_i32, %c0_i32_0 : i32, i32, i32
  }
  func.func @transform_1(%arg0: i32) -> (i32, i32, i32) {
    %c0_i32 = arith.constant 0 : i32
    %c0_i32_0 = arith.constant 0 : i32
    %c0_i32_1 = arith.constant 0 : i32
    return %arg0, %c0_i32, %c0_i32_0 : i32, i32, i32
  }
  func.func @transform_2(%arg0: i32) -> (i32, i32) {
    %c0_i32 = arith.constant 0 : i32
    %c0_i32_0 = arith.constant 0 : i32
    %c0_i32_1 = arith.constant 0 : i32
    return %c0_i32, %c0_i32_0 : i32, i32
  }
  func.func @transform_3(%arg0: i32) -> (i32, i32) {
    %c0_i32 = arith.constant 0 : i32
    %c0_i32_0 = arith.constant 0 : i32
    %c0_i32_1 = arith.constant 0 : i32
    return %c0_i32, %c0_i32_0 : i32, i32
  }
  func.func @transform_4(%arg0: i32) -> (i32, i32) {
    %c0_i32 = arith.constant 0 : i32
    %c0_i32_0 = arith.constant 0 : i32
    %c0_i32_1 = arith.constant 0 : i32
    return %c0_i32, %c0_i32_0 : i32, i32
  }
  func.func @transform_5(%arg0: i32) -> (i32, i32) {
    %c0_i32 = arith.constant 0 : i32
    %c0_i32_0 = arith.constant 0 : i32
    %c0_i32_1 = arith.constant 0 : i32
    return %c0_i32, %c0_i32_0 : i32, i32
  }
  func.func @transform_6(%arg0: i32) -> (i32, i32) {
    %c0_i32 = arith.constant 0 : i32
    %c0_i32_0 = arith.constant 0 : i32
    %c0_i32_1 = arith.constant 0 : i32
    return %c0_i32, %c0_i32_0 : i32, i32
  }
  func.func @transform_7(%arg0: i32) -> (i32, i32) {
    %c0_i32 = arith.constant 0 : i32
    %c0_i32_0 = arith.constant 0 : i32
    %c0_i32_1 = arith.constant 0 : i32
    return %c0_i32, %c0_i32_0 : i32, i32
  }
  func.func @transform_8(%arg0: i32) -> (i32, i32, i32) {
    %c0_i32 = arith.constant 0 : i32
    %c0_i32_0 = arith.constant 0 : i32
    %c0_i32_1 = arith.constant 0 : i32
    return %arg0, %c0_i32, %c0_i32_0 : i32, i32, i32
  }
}

module attributes {stable_mosaic.version = 11 : i64} {
  func.func @_self_attn_layer_kernel(%arg0: i32, %arg1: memref<1x8x32xf32, #tpu.memory_space<vmem>>, %arg2: memref<1x8x8xf32, #tpu.memory_space<vmem>>, %arg3: memref<32x96xbf16, #tpu.memory_space<vmem>>, %arg4: memref<1x96xf32, #tpu.memory_space<vmem>>, %arg5: memref<32x32xbf16, #tpu.memory_space<vmem>>, %arg6: memref<1x32xf32, #tpu.memory_space<vmem>>, %arg7: memref<1x32xf32, #tpu.memory_space<vmem>>, %arg8: memref<1x32xf32, #tpu.memory_space<vmem>>, %arg9: memref<1x8x32xf32, #tpu.memory_space<vmem>>) attributes {dimension_semantics = [#tpu.dimension_semantics<parallel>], iteration_bounds = array<i64: 2>, scalar_prefetch = 0 : i64, scratch_operands = 0 : i64, tpu.core_type = #tpu.core_type<tc>, window_params = [{transform_indices = @transform_0, window_bounds = array<i64: 1, 8, 32>}, {transform_indices = @transform_1, window_bounds = array<i64: 1, 8, 8>}, {pipeline_mode = #tpu.pipeline_mode<synchronous>, transform_indices = @transform_2, window_bounds = array<i64: 32, 96>}, {pipeline_mode = #tpu.pipeline_mode<synchronous>, transform_indices = @transform_3, window_bounds = array<i64: 1, 96>}, {pipeline_mode = #tpu.pipeline_mode<synchronous>, transform_indices = @transform_4, window_bounds = array<i64: 32, 32>}, {pipeline_mode = #tpu.pipeline_mode<synchronous>, transform_indices = @transform_5, window_bounds = array<i64: 1, 32>}, {pipeline_mode = #tpu.pipeline_mode<synchronous>, transform_indices = @transform_6, window_bounds = array<i64: 1, 32>}, {pipeline_mode = #tpu.pipeline_mode<synchronous>, transform_indices = @transform_7, window_bounds = array<i64: 1, 32>}, {transform_indices = @transform_8, window_bounds = array<i64: 1, 8, 32>}]} {
    %c0 = arith.constant 0 : index
    %c0_0 = arith.constant 0 : index
    %c0_1 = arith.constant 0 : index
    %0 = vector.load %arg1[%c0, %c0_0, %c0_1] : memref<1x8x32xf32, #tpu.memory_space<vmem>>, vector<1x8x32xf32>
    %1 = vector.shape_cast %0 : vector<1x8x32xf32> to vector<8x32xf32>
    %2 = arith.truncf %1 : vector<8x32xf32> to vector<8x32xbf16>
    %c0_2 = arith.constant 0 : index
    %c0_3 = arith.constant 0 : index
    %3 = vector.load %arg3[%c0_2, %c0_3] : memref<32x96xbf16, #tpu.memory_space<vmem>>, vector<32x96xbf16>
    %cst = arith.constant dense<0.000000e+00> : vector<8x96xf32>
    %4 = tpu.matmul %2, %3, %cst {dimension_numbers = #tpu.dot_dimension_numbers<[1], [0], [0], [1], [0, 0, 1, 1], [], []>} : vector<8x32xbf16>, vector<32x96xbf16>, vector<8x96xf32> -> vector<8x96xf32>
    %c0_4 = arith.constant 0 : index
    %c0_5 = arith.constant 0 : index
    %5 = vector.load %arg4[%c0_4, %c0_5] : memref<1x96xf32, #tpu.memory_space<vmem>>, vector<1x96xf32>
    %6 = vector.broadcast %5 : vector<1x96xf32> to vector<8x96xf32>
    %7 = arith.addf %4, %6 : vector<8x96xf32>
    %8 = vector.extract_strided_slice %7 {offsets = [0, 0], sizes = [8, 32], strides = [1, 1]} : vector<8x96xf32> to vector<8x32xf32>
    %9 = vector.extract_strided_slice %7 {offsets = [0, 32], sizes = [8, 32], strides = [1, 1]} : vector<8x96xf32> to vector<8x32xf32>
    %10 = vector.extract_strided_slice %7 {offsets = [0, 64], sizes = [8, 32], strides = [1, 1]} : vector<8x96xf32> to vector<8x32xf32>
    %c0_6 = arith.constant 0 : index
    %c0_7 = arith.constant 0 : index
    %c0_8 = arith.constant 0 : index
    %11 = vector.load %arg2[%c0_6, %c0_7, %c0_8] : memref<1x8x8xf32, #tpu.memory_space<vmem>>, vector<1x8x8xf32>
    %12 = vector.shape_cast %11 : vector<1x8x8xf32> to vector<8x8xf32>
    %13 = vector.extract_strided_slice %8 {offsets = [0, 0], sizes = [8, 8], strides = [1, 1]} : vector<8x32xf32> to vector<8x8xf32>
    %14 = arith.truncf %13 : vector<8x8xf32> to vector<8x8xbf16>
    %15 = vector.extract_strided_slice %9 {offsets = [0, 0], sizes = [8, 8], strides = [1, 1]} : vector<8x32xf32> to vector<8x8xf32>
    %16 = arith.truncf %15 : vector<8x8xf32> to vector<8x8xbf16>
    %17 = vector.extract_strided_slice %10 {offsets = [0, 0], sizes = [8, 8], strides = [1, 1]} : vector<8x32xf32> to vector<8x8xf32>
    %18 = arith.truncf %17 : vector<8x8xf32> to vector<8x8xbf16>
    %19 = tpu.transpose %16, [1, 0] : vector<8x8xbf16> -> vector<8x8xbf16>
    %cst_9 = arith.constant dense<0.000000e+00> : vector<8x8xf32>
    %20 = tpu.matmul %14, %19, %cst_9 {dimension_numbers = #tpu.dot_dimension_numbers<[1], [0], [0], [1], [0, 0, 1, 1], [], []>} : vector<8x8xbf16>, vector<8x8xbf16>, vector<8x8xf32> -> vector<8x8xf32>
    %cst_10 = arith.constant 0.353553385 : f32
    %21 = vector.broadcast %cst_10 : f32 to vector<8x8xf32>
    %22 = arith.mulf %20, %21 : vector<8x8xf32>
    %23 = arith.addf %22, %12 : vector<8x8xf32>
    %cst_11 = arith.constant dense<0xFF800000> : vector<8xf32>
    %24 = vector.multi_reduction <maximumf>, %23, %cst_11 [1] : vector<8x8xf32> to vector<8xf32>
    %25 = vector.shape_cast %24 : vector<8xf32> to vector<8x1xf32>
    %26 = vector.broadcast %25 : vector<8x1xf32> to vector<8x8xf32>
    %27 = arith.subf %23, %26 : vector<8x8xf32>
    %28 = math.exp %27 : vector<8x8xf32>
    %cst_12 = arith.constant dense<0.000000e+00> : vector<8xf32>
    %29 = vector.multi_reduction <add>, %28, %cst_12 [1] : vector<8x8xf32> to vector<8xf32>
    %30 = vector.shape_cast %29 : vector<8xf32> to vector<8x1xf32>
    %31 = tpu.reciprocal %30 {approx = true} : vector<8x1xf32> -> vector<8x1xf32>
    %32 = vector.broadcast %31 : vector<8x1xf32> to vector<8x8xf32>
    %33 = arith.mulf %28, %32 : vector<8x8xf32>
    %34 = arith.truncf %33 : vector<8x8xf32> to vector<8x8xbf16>
    %cst_13 = arith.constant dense<0.000000e+00> : vector<8x8xf32>
    %35 = tpu.matmul %34, %18, %cst_13 {dimension_numbers = #tpu.dot_dimension_numbers<[1], [0], [0], [1], [0, 0, 1, 1], [], []>} : vector<8x8xbf16>, vector<8x8xbf16>, vector<8x8xf32> -> vector<8x8xf32>
    %36 = vector.extract_strided_slice %8 {offsets = [0, 8], sizes = [8, 8], strides = [1, 1]} : vector<8x32xf32> to vector<8x8xf32>
    %37 = arith.truncf %36 : vector<8x8xf32> to vector<8x8xbf16>
    %38 = vector.extract_strided_slice %9 {offsets = [0, 8], sizes = [8, 8], strides = [1, 1]} : vector<8x32xf32> to vector<8x8xf32>
    %39 = arith.truncf %38 : vector<8x8xf32> to vector<8x8xbf16>
    %40 = vector.extract_strided_slice %10 {offsets = [0, 8], sizes = [8, 8], strides = [1, 1]} : vector<8x32xf32> to vector<8x8xf32>
    %41 = arith.truncf %40 : vector<8x8xf32> to vector<8x8xbf16>
    %42 = tpu.transpose %39, [1, 0] : vector<8x8xbf16> -> vector<8x8xbf16>
    %cst_14 = arith.constant dense<0.000000e+00> : vector<8x8xf32>
    %43 = tpu.matmul %37, %42, %cst_14 {dimension_numbers = #tpu.dot_dimension_numbers<[1], [0], [0], [1], [0, 0, 1, 1], [], []>} : vector<8x8xbf16>, vector<8x8xbf16>, vector<8x8xf32> -> vector<8x8xf32>
    %cst_15 = arith.constant 0.353553385 : f32
    %44 = vector.broadcast %cst_15 : f32 to vector<8x8xf32>
    %45 = arith.mulf %43, %44 : vector<8x8xf32>
    %46 = arith.addf %45, %12 : vector<8x8xf32>
    %cst_16 = arith.constant dense<0xFF800000> : vector<8xf32>
    %47 = vector.multi_reduction <maximumf>, %46, %cst_16 [1] : vector<8x8xf32> to vector<8xf32>
    %48 = vector.shape_cast %47 : vector<8xf32> to vector<8x1xf32>
    %49 = vector.broadcast %48 : vector<8x1xf32> to vector<8x8xf32>
    %50 = arith.subf %46, %49 : vector<8x8xf32>
    %51 = math.exp %50 : vector<8x8xf32>
    %cst_17 = arith.constant dense<0.000000e+00> : vector<8xf32>
    %52 = vector.multi_reduction <add>, %51, %cst_17 [1] : vector<8x8xf32> to vector<8xf32>
    %53 = vector.shape_cast %52 : vector<8xf32> to vector<8x1xf32>
    %54 = tpu.reciprocal %53 {approx = true} : vector<8x1xf32> -> vector<8x1xf32>
    %55 = vector.broadcast %54 : vector<8x1xf32> to vector<8x8xf32>
    %56 = arith.mulf %51, %55 : vector<8x8xf32>
    %57 = arith.truncf %56 : vector<8x8xf32> to vector<8x8xbf16>
    %cst_18 = arith.constant dense<0.000000e+00> : vector<8x8xf32>
    %58 = tpu.matmul %57, %41, %cst_18 {dimension_numbers = #tpu.dot_dimension_numbers<[1], [0], [0], [1], [0, 0, 1, 1], [], []>} : vector<8x8xbf16>, vector<8x8xbf16>, vector<8x8xf32> -> vector<8x8xf32>
    %59 = vector.extract_strided_slice %8 {offsets = [0, 16], sizes = [8, 8], strides = [1, 1]} : vector<8x32xf32> to vector<8x8xf32>
    %60 = arith.truncf %59 : vector<8x8xf32> to vector<8x8xbf16>
    %61 = vector.extract_strided_slice %9 {offsets = [0, 16], sizes = [8, 8], strides = [1, 1]} : vector<8x32xf32> to vector<8x8xf32>
    %62 = arith.truncf %61 : vector<8x8xf32> to vector<8x8xbf16>
    %63 = vector.extract_strided_slice %10 {offsets = [0, 16], sizes = [8, 8], strides = [1, 1]} : vector<8x32xf32> to vector<8x8xf32>
    %64 = arith.truncf %63 : vector<8x8xf32> to vector<8x8xbf16>
    %65 = tpu.transpose %62, [1, 0] : vector<8x8xbf16> -> vector<8x8xbf16>
    %cst_19 = arith.constant dense<0.000000e+00> : vector<8x8xf32>
    %66 = tpu.matmul %60, %65, %cst_19 {dimension_numbers = #tpu.dot_dimension_numbers<[1], [0], [0], [1], [0, 0, 1, 1], [], []>} : vector<8x8xbf16>, vector<8x8xbf16>, vector<8x8xf32> -> vector<8x8xf32>
    %cst_20 = arith.constant 0.353553385 : f32
    %67 = vector.broadcast %cst_20 : f32 to vector<8x8xf32>
    %68 = arith.mulf %66, %67 : vector<8x8xf32>
    %69 = arith.addf %68, %12 : vector<8x8xf32>
    %cst_21 = arith.constant dense<0xFF800000> : vector<8xf32>
    %70 = vector.multi_reduction <maximumf>, %69, %cst_21 [1] : vector<8x8xf32> to vector<8xf32>
    %71 = vector.shape_cast %70 : vector<8xf32> to vector<8x1xf32>
    %72 = vector.broadcast %71 : vector<8x1xf32> to vector<8x8xf32>
    %73 = arith.subf %69, %72 : vector<8x8xf32>
    %74 = math.exp %73 : vector<8x8xf32>
    %cst_22 = arith.constant dense<0.000000e+00> : vector<8xf32>
    %75 = vector.multi_reduction <add>, %74, %cst_22 [1] : vector<8x8xf32> to vector<8xf32>
    %76 = vector.shape_cast %75 : vector<8xf32> to vector<8x1xf32>
    %77 = tpu.reciprocal %76 {approx = true} : vector<8x1xf32> -> vector<8x1xf32>
    %78 = vector.broadcast %77 : vector<8x1xf32> to vector<8x8xf32>
    %79 = arith.mulf %74, %78 : vector<8x8xf32>
    %80 = arith.truncf %79 : vector<8x8xf32> to vector<8x8xbf16>
    %cst_23 = arith.constant dense<0.000000e+00> : vector<8x8xf32>
    %81 = tpu.matmul %80, %64, %cst_23 {dimension_numbers = #tpu.dot_dimension_numbers<[1], [0], [0], [1], [0, 0, 1, 1], [], []>} : vector<8x8xbf16>, vector<8x8xbf16>, vector<8x8xf32> -> vector<8x8xf32>
    %82 = vector.extract_strided_slice %8 {offsets = [0, 24], sizes = [8, 8], strides = [1, 1]} : vector<8x32xf32> to vector<8x8xf32>
    %83 = arith.truncf %82 : vector<8x8xf32> to vector<8x8xbf16>
    %84 = vector.extract_strided_slice %9 {offsets = [0, 24], sizes = [8, 8], strides = [1, 1]} : vector<8x32xf32> to vector<8x8xf32>
    %85 = arith.truncf %84 : vector<8x8xf32> to vector<8x8xbf16>
    %86 = vector.extract_strided_slice %10 {offsets = [0, 24], sizes = [8, 8], strides = [1, 1]} : vector<8x32xf32> to vector<8x8xf32>
    %87 = arith.truncf %86 : vector<8x8xf32> to vector<8x8xbf16>
    %88 = tpu.transpose %85, [1, 0] : vector<8x8xbf16> -> vector<8x8xbf16>
    %cst_24 = arith.constant dense<0.000000e+00> : vector<8x8xf32>
    %89 = tpu.matmul %83, %88, %cst_24 {dimension_numbers = #tpu.dot_dimension_numbers<[1], [0], [0], [1], [0, 0, 1, 1], [], []>} : vector<8x8xbf16>, vector<8x8xbf16>, vector<8x8xf32> -> vector<8x8xf32>
    %cst_25 = arith.constant 0.353553385 : f32
    %90 = vector.broadcast %cst_25 : f32 to vector<8x8xf32>
    %91 = arith.mulf %89, %90 : vector<8x8xf32>
    %92 = arith.addf %91, %12 : vector<8x8xf32>
    %cst_26 = arith.constant dense<0xFF800000> : vector<8xf32>
    %93 = vector.multi_reduction <maximumf>, %92, %cst_26 [1] : vector<8x8xf32> to vector<8xf32>
    %94 = vector.shape_cast %93 : vector<8xf32> to vector<8x1xf32>
    %95 = vector.broadcast %94 : vector<8x1xf32> to vector<8x8xf32>
    %96 = arith.subf %92, %95 : vector<8x8xf32>
    %97 = math.exp %96 : vector<8x8xf32>
    %cst_27 = arith.constant dense<0.000000e+00> : vector<8xf32>
    %98 = vector.multi_reduction <add>, %97, %cst_27 [1] : vector<8x8xf32> to vector<8xf32>
    %99 = vector.shape_cast %98 : vector<8xf32> to vector<8x1xf32>
    %100 = tpu.reciprocal %99 {approx = true} : vector<8x1xf32> -> vector<8x1xf32>
    %101 = vector.broadcast %100 : vector<8x1xf32> to vector<8x8xf32>
    %102 = arith.mulf %97, %101 : vector<8x8xf32>
    %103 = arith.truncf %102 : vector<8x8xf32> to vector<8x8xbf16>
    %cst_28 = arith.constant dense<0.000000e+00> : vector<8x8xf32>
    %104 = tpu.matmul %103, %87, %cst_28 {dimension_numbers = #tpu.dot_dimension_numbers<[1], [0], [0], [1], [0, 0, 1, 1], [], []>} : vector<8x8xbf16>, vector<8x8xbf16>, vector<8x8xf32> -> vector<8x8xf32>
    %105 = tpu.concatenate %35, %58, %81, %104 in 1 : vector<8x8xf32>, vector<8x8xf32>, vector<8x8xf32>, vector<8x8xf32> -> vector<8x32xf32>
    %106 = arith.truncf %105 : vector<8x32xf32> to vector<8x32xbf16>
    %c0_29 = arith.constant 0 : index
    %c0_30 = arith.constant 0 : index
    %107 = vector.load %arg5[%c0_29, %c0_30] : memref<32x32xbf16, #tpu.memory_space<vmem>>, vector<32x32xbf16>
    %cst_31 = arith.constant dense<0.000000e+00> : vector<8x32xf32>
    %108 = tpu.matmul %106, %107, %cst_31 {dimension_numbers = #tpu.dot_dimension_numbers<[1], [0], [0], [1], [0, 0, 1, 1], [], []>} : vector<8x32xbf16>, vector<32x32xbf16>, vector<8x32xf32> -> vector<8x32xf32>
    %c0_32 = arith.constant 0 : index
    %c0_33 = arith.constant 0 : index
    %109 = vector.load %arg6[%c0_32, %c0_33] : memref<1x32xf32, #tpu.memory_space<vmem>>, vector<1x32xf32>
    %110 = vector.broadcast %109 : vector<1x32xf32> to vector<8x32xf32>
    %111 = arith.addf %108, %110 : vector<8x32xf32>
    %c0_34 = arith.constant 0 : index
    %c0_35 = arith.constant 0 : index
    %112 = vector.load %arg7[%c0_34, %c0_35] : memref<1x32xf32, #tpu.memory_space<vmem>>, vector<1x32xf32>
    %c0_36 = arith.constant 0 : index
    %c0_37 = arith.constant 0 : index
    %113 = vector.load %arg8[%c0_36, %c0_37] : memref<1x32xf32, #tpu.memory_space<vmem>>, vector<1x32xf32>
    %114 = arith.addf %1, %111 : vector<8x32xf32>
    %cst_38 = arith.constant dense<0.000000e+00> : vector<8xf32>
    %115 = vector.multi_reduction <add>, %114, %cst_38 [1] : vector<8x32xf32> to vector<8xf32>
    %116 = vector.shape_cast %115 : vector<8xf32> to vector<8x1xf32>
    %cst_39 = arith.constant 3.200000e+01 : f32
    %117 = vector.broadcast %cst_39 : f32 to vector<8x1xf32>
    %118 = arith.divf %116, %117 : vector<8x1xf32>
    %119 = vector.broadcast %118 : vector<8x1xf32> to vector<8x32xf32>
    %120 = arith.subf %114, %119 : vector<8x32xf32>
    %121 = vector.broadcast %118 : vector<8x1xf32> to vector<8x32xf32>
    %122 = arith.subf %114, %121 : vector<8x32xf32>
    %123 = arith.mulf %120, %122 : vector<8x32xf32>
    %cst_40 = arith.constant dense<0.000000e+00> : vector<8xf32>
    %124 = vector.multi_reduction <add>, %123, %cst_40 [1] : vector<8x32xf32> to vector<8xf32>
    %125 = vector.shape_cast %124 : vector<8xf32> to vector<8x1xf32>
    %cst_41 = arith.constant 3.200000e+01 : f32
    %126 = vector.broadcast %cst_41 : f32 to vector<8x1xf32>
    %127 = arith.divf %125, %126 : vector<8x1xf32>
    %128 = vector.broadcast %118 : vector<8x1xf32> to vector<8x32xf32>
    %129 = arith.subf %114, %128 : vector<8x32xf32>
    %cst_42 = arith.constant 9.99999974E-6 : f32
    %130 = vector.broadcast %cst_42 : f32 to vector<8x1xf32>
    %131 = arith.addf %127, %130 : vector<8x1xf32>
    %132 = math.rsqrt %131 : vector<8x1xf32>
    %133 = vector.broadcast %132 : vector<8x1xf32> to vector<8x32xf32>
    %134 = arith.mulf %129, %133 : vector<8x32xf32>
    %135 = vector.broadcast %112 : vector<1x32xf32> to vector<8x32xf32>
    %136 = arith.mulf %134, %135 : vector<8x32xf32>
    %137 = vector.broadcast %113 : vector<1x32xf32> to vector<8x32xf32>
    %138 = arith.addf %136, %137 : vector<8x32xf32>
    %c0_43 = arith.constant 0 : index
    %c0_44 = arith.constant 0 : index
    %c0_45 = arith.constant 0 : index
    %139 = vector.load %arg9[%c0_43, %c0_44, %c0_45] : memref<1x8x32xf32, #tpu.memory_space<vmem>>, vector<1x8x32xf32>
    %140 = vector.shape_cast %139 : vector<1x8x32xf32> to vector<8x32xf32>
    %141 = vector.shape_cast %138 : vector<8x32xf32> to vector<1x8x32xf32>
    tpu.vector_store %arg9[%c0_43, %c0_44, %c0_45], %141 {strides = array<i32>} : memref<1x8x32xf32, #tpu.memory_space<vmem>>, vector<1x8x32xf32>,
    return
  }
  func.func @transform_0(%arg0: i32) -> (i32, i32, i32) {
    %c0_i32 = arith.constant 0 : i32
    %c0_i32_0 = arith.constant 0 : i32
    %c0_i32_1 = arith.constant 0 : i32
    return %arg0, %c0_i32, %c0_i32_0 : i32, i32, i32
  }
  func.func @transform_1(%arg0: i32) -> (i32, i32, i32) {
    %c0_i32 = arith.constant 0 : i32
    %c0_i32_0 = arith.constant 0 : i32
    %c0_i32_1 = arith.constant 0 : i32
    return %arg0, %c0_i32, %c0_i32_0 : i32, i32, i32
  }
  func.func @transform_2(%arg0: i32) -> (i32, i32) {
    %c0_i32 = arith.constant 0 : i32
    %c0_i32_0 = arith.constant 0 : i32
    %c0_i32_1 = arith.constant 0 : i32
    return %c0_i32, %c0_i32_0 : i32, i32
  }
  func.func @transform_3(%arg0: i32) -> (i32, i32) {
    %c0_i32 = arith.constant 0 : i32
    %c0_i32_0 = arith.constant 0 : i32
    %c0_i32_1 = arith.constant 0 : i32
    return %c0_i32, %c0_i32_0 : i32, i32
  }
  func.func @transform_4(%arg0: i32) -> (i32, i32) {
    %c0_i32 = arith.constant 0 : i32
    %c0_i32_0 = arith.constant 0 : i32
    %c0_i32_1 = arith.constant 0 : i32
    return %c0_i32, %c0_i32_0 : i32, i32
  }
  func.func @transform_5(%arg0: i32) -> (i32, i32) {
    %c0_i32 = arith.constant 0 : i32
    %c0_i32_0 = arith.constant 0 : i32
    %c0_i32_1 = arith.constant 0 : i32
    return %c0_i32, %c0_i32_0 : i32, i32
  }
  func.func @transform_6(%arg0: i32) -> (i32, i32) {
    %c0_i32 = arith.constant 0 : i32
    %c0_i32_0 = arith.constant 0 : i32
    %c0_i32_1 = arith.constant 0 : i32
    return %c0_i32, %c0_i32_0 : i32, i32
  }
  func.func @transform_7(%arg0: i32) -> (i32, i32) {
    %c0_i32 = arith.constant 0 : i32
    %c0_i32_0 = arith.constant 0 : i32
    %c0_i32_1 = arith.constant 0 : i32
    return %c0_i32, %c0_i32_0 : i32, i32
  }
  func.func @transform_8(%arg0: i32) -> (i32, i32, i32) {
    %c0_i32 = arith.constant 0 : i32
    %c0_i32_0 = arith.constant 0 : i32
    %c0_i32_1 = arith.constant 0 : i32
    return %arg0, %c0_i32, %c0_i32_0 : i32, i32, i32
  }
}

module attributes {stable_mosaic.version = 11 : i64} {
  func.func @_cross_attn_layer_kernel(%arg0: i32, %arg1: memref<1x8x32xf32, #tpu.memory_space<vmem>>, %arg2: memref<1x8x32xf32, #tpu.memory_space<vmem>>, %arg3: memref<1x1x8xf32, #tpu.memory_space<vmem>>, %arg4: memref<32x32xbf16, #tpu.memory_space<vmem>>, %arg5: memref<1x32xf32, #tpu.memory_space<vmem>>, %arg6: memref<32x64xbf16, #tpu.memory_space<vmem>>, %arg7: memref<1x64xf32, #tpu.memory_space<vmem>>, %arg8: memref<32x32xbf16, #tpu.memory_space<vmem>>, %arg9: memref<1x32xf32, #tpu.memory_space<vmem>>, %arg10: memref<1x32xf32, #tpu.memory_space<vmem>>, %arg11: memref<1x32xf32, #tpu.memory_space<vmem>>, %arg12: memref<1x8x32xf32, #tpu.memory_space<vmem>>) attributes {dimension_semantics = [#tpu.dimension_semantics<parallel>], iteration_bounds = array<i64: 2>, scalar_prefetch = 0 : i64, scratch_operands = 0 : i64, tpu.core_type = #tpu.core_type<tc>, window_params = [{transform_indices = @transform_0, window_bounds = array<i64: 1, 8, 32>}, {transform_indices = @transform_1, window_bounds = array<i64: 1, 8, 32>}, {transform_indices = @transform_2, window_bounds = array<i64: 1, 1, 8>}, {pipeline_mode = #tpu.pipeline_mode<synchronous>, transform_indices = @transform_3, window_bounds = array<i64: 32, 32>}, {pipeline_mode = #tpu.pipeline_mode<synchronous>, transform_indices = @transform_4, window_bounds = array<i64: 1, 32>}, {pipeline_mode = #tpu.pipeline_mode<synchronous>, transform_indices = @transform_5, window_bounds = array<i64: 32, 64>}, {pipeline_mode = #tpu.pipeline_mode<synchronous>, transform_indices = @transform_6, window_bounds = array<i64: 1, 64>}, {pipeline_mode = #tpu.pipeline_mode<synchronous>, transform_indices = @transform_7, window_bounds = array<i64: 32, 32>}, {pipeline_mode = #tpu.pipeline_mode<synchronous>, transform_indices = @transform_8, window_bounds = array<i64: 1, 32>}, {pipeline_mode = #tpu.pipeline_mode<synchronous>, transform_indices = @transform_9, window_bounds = array<i64: 1, 32>}, {pipeline_mode = #tpu.pipeline_mode<synchronous>, transform_indices = @transform_10, window_bounds = array<i64: 1, 32>}, {transform_indices = @transform_11, window_bounds = array<i64: 1, 8, 32>}]} {
    %c0 = arith.constant 0 : index
    %c0_0 = arith.constant 0 : index
    %c0_1 = arith.constant 0 : index
    %0 = vector.load %arg1[%c0, %c0_0, %c0_1] : memref<1x8x32xf32, #tpu.memory_space<vmem>>, vector<1x8x32xf32>
    %1 = vector.shape_cast %0 : vector<1x8x32xf32> to vector<8x32xf32>
    %c0_2 = arith.constant 0 : index
    %c0_3 = arith.constant 0 : index
    %c0_4 = arith.constant 0 : index
    %2 = vector.load %arg2[%c0_2, %c0_3, %c0_4] : memref<1x8x32xf32, #tpu.memory_space<vmem>>, vector<1x8x32xf32>
    %3 = vector.shape_cast %2 : vector<1x8x32xf32> to vector<8x32xf32>
    %4 = arith.truncf %1 : vector<8x32xf32> to vector<8x32xbf16>
    %c0_5 = arith.constant 0 : index
    %c0_6 = arith.constant 0 : index
    %5 = vector.load %arg4[%c0_5, %c0_6] : memref<32x32xbf16, #tpu.memory_space<vmem>>, vector<32x32xbf16>
    %cst = arith.constant dense<0.000000e+00> : vector<8x32xf32>
    %6 = tpu.matmul %4, %5, %cst {dimension_numbers = #tpu.dot_dimension_numbers<[1], [0], [0], [1], [0, 0, 1, 1], [], []>} : vector<8x32xbf16>, vector<32x32xbf16>, vector<8x32xf32> -> vector<8x32xf32>
    %c0_7 = arith.constant 0 : index
    %c0_8 = arith.constant 0 : index
    %7 = vector.load %arg5[%c0_7, %c0_8] : memref<1x32xf32, #tpu.memory_space<vmem>>, vector<1x32xf32>
    %8 = vector.broadcast %7 : vector<1x32xf32> to vector<8x32xf32>
    %9 = arith.addf %6, %8 : vector<8x32xf32>
    %10 = arith.truncf %3 : vector<8x32xf32> to vector<8x32xbf16>
    %c0_9 = arith.constant 0 : index
    %c0_10 = arith.constant 0 : index
    %11 = vector.load %arg6[%c0_9, %c0_10] : memref<32x64xbf16, #tpu.memory_space<vmem>>, vector<32x64xbf16>
    %cst_11 = arith.constant dense<0.000000e+00> : vector<8x64xf32>
    %12 = tpu.matmul %10, %11, %cst_11 {dimension_numbers = #tpu.dot_dimension_numbers<[1], [0], [0], [1], [0, 0, 1, 1], [], []>} : vector<8x32xbf16>, vector<32x64xbf16>, vector<8x64xf32> -> vector<8x64xf32>
    %c0_12 = arith.constant 0 : index
    %c0_13 = arith.constant 0 : index
    %13 = vector.load %arg7[%c0_12, %c0_13] : memref<1x64xf32, #tpu.memory_space<vmem>>, vector<1x64xf32>
    %14 = vector.broadcast %13 : vector<1x64xf32> to vector<8x64xf32>
    %15 = arith.addf %12, %14 : vector<8x64xf32>
    %16 = vector.extract_strided_slice %15 {offsets = [0, 0], sizes = [8, 32], strides = [1, 1]} : vector<8x64xf32> to vector<8x32xf32>
    %17 = vector.extract_strided_slice %15 {offsets = [0, 32], sizes = [8, 32], strides = [1, 1]} : vector<8x64xf32> to vector<8x32xf32>
    %c0_14 = arith.constant 0 : index
    %c0_15 = arith.constant 0 : index
    %c0_16 = arith.constant 0 : index
    %18 = vector.load %arg3[%c0_14, %c0_15, %c0_16] : memref<1x1x8xf32, #tpu.memory_space<vmem>>, vector<1x1x8xf32>
    %19 = vector.shape_cast %18 : vector<1x1x8xf32> to vector<1x8xf32>
    %20 = vector.extract_strided_slice %9 {offsets = [0, 0], sizes = [8, 8], strides = [1, 1]} : vector<8x32xf32> to vector<8x8xf32>
    %21 = arith.truncf %20 : vector<8x8xf32> to vector<8x8xbf16>
    %22 = vector.extract_strided_slice %16 {offsets = [0, 0], sizes = [8, 8], strides = [1, 1]} : vector<8x32xf32> to vector<8x8xf32>
    %23 = arith.truncf %22 : vector<8x8xf32> to vector<8x8xbf16>
    %24 = vector.extract_strided_slice %17 {offsets = [0, 0], sizes = [8, 8], strides = [1, 1]} : vector<8x32xf32> to vector<8x8xf32>
    %25 = arith.truncf %24 : vector<8x8xf32> to vector<8x8xbf16>
    %26 = tpu.transpose %23, [1, 0] : vector<8x8xbf16> -> vector<8x8xbf16>
    %cst_17 = arith.constant dense<0.000000e+00> : vector<8x8xf32>
    %27 = tpu.matmul %21, %26, %cst_17 {dimension_numbers = #tpu.dot_dimension_numbers<[1], [0], [0], [1], [0, 0, 1, 1], [], []>} : vector<8x8xbf16>, vector<8x8xbf16>, vector<8x8xf32> -> vector<8x8xf32>
    %cst_18 = arith.constant 0.353553385 : f32
    %28 = vector.broadcast %cst_18 : f32 to vector<8x8xf32>
    %29 = arith.mulf %27, %28 : vector<8x8xf32>
    %30 = vector.broadcast %19 : vector<1x8xf32> to vector<8x8xf32>
    %31 = arith.addf %29, %30 : vector<8x8xf32>
    %cst_19 = arith.constant dense<0xFF800000> : vector<8xf32>
    %32 = vector.multi_reduction <maximumf>, %31, %cst_19 [1] : vector<8x8xf32> to vector<8xf32>
    %33 = vector.shape_cast %32 : vector<8xf32> to vector<8x1xf32>
    %34 = vector.broadcast %33 : vector<8x1xf32> to vector<8x8xf32>
    %35 = arith.subf %31, %34 : vector<8x8xf32>
    %36 = math.exp %35 : vector<8x8xf32>
    %cst_20 = arith.constant dense<0.000000e+00> : vector<8xf32>
    %37 = vector.multi_reduction <add>, %36, %cst_20 [1] : vector<8x8xf32> to vector<8xf32>
    %38 = vector.shape_cast %37 : vector<8xf32> to vector<8x1xf32>
    %39 = tpu.reciprocal %38 {approx = true} : vector<8x1xf32> -> vector<8x1xf32>
    %40 = vector.broadcast %39 : vector<8x1xf32> to vector<8x8xf32>
    %41 = arith.mulf %36, %40 : vector<8x8xf32>
    %42 = arith.truncf %41 : vector<8x8xf32> to vector<8x8xbf16>
    %cst_21 = arith.constant dense<0.000000e+00> : vector<8x8xf32>
    %43 = tpu.matmul %42, %25, %cst_21 {dimension_numbers = #tpu.dot_dimension_numbers<[1], [0], [0], [1], [0, 0, 1, 1], [], []>} : vector<8x8xbf16>, vector<8x8xbf16>, vector<8x8xf32> -> vector<8x8xf32>
    %44 = vector.extract_strided_slice %9 {offsets = [0, 8], sizes = [8, 8], strides = [1, 1]} : vector<8x32xf32> to vector<8x8xf32>
    %45 = arith.truncf %44 : vector<8x8xf32> to vector<8x8xbf16>
    %46 = vector.extract_strided_slice %16 {offsets = [0, 8], sizes = [8, 8], strides = [1, 1]} : vector<8x32xf32> to vector<8x8xf32>
    %47 = arith.truncf %46 : vector<8x8xf32> to vector<8x8xbf16>
    %48 = vector.extract_strided_slice %17 {offsets = [0, 8], sizes = [8, 8], strides = [1, 1]} : vector<8x32xf32> to vector<8x8xf32>
    %49 = arith.truncf %48 : vector<8x8xf32> to vector<8x8xbf16>
    %50 = tpu.transpose %47, [1, 0] : vector<8x8xbf16> -> vector<8x8xbf16>
    %cst_22 = arith.constant dense<0.000000e+00> : vector<8x8xf32>
    %51 = tpu.matmul %45, %50, %cst_22 {dimension_numbers = #tpu.dot_dimension_numbers<[1], [0], [0], [1], [0, 0, 1, 1], [], []>} : vector<8x8xbf16>, vector<8x8xbf16>, vector<8x8xf32> -> vector<8x8xf32>
    %cst_23 = arith.constant 0.353553385 : f32
    %52 = vector.broadcast %cst_23 : f32 to vector<8x8xf32>
    %53 = arith.mulf %51, %52 : vector<8x8xf32>
    %54 = vector.broadcast %19 : vector<1x8xf32> to vector<8x8xf32>
    %55 = arith.addf %53, %54 : vector<8x8xf32>
    %cst_24 = arith.constant dense<0xFF800000> : vector<8xf32>
    %56 = vector.multi_reduction <maximumf>, %55, %cst_24 [1] : vector<8x8xf32> to vector<8xf32>
    %57 = vector.shape_cast %56 : vector<8xf32> to vector<8x1xf32>
    %58 = vector.broadcast %57 : vector<8x1xf32> to vector<8x8xf32>
    %59 = arith.subf %55, %58 : vector<8x8xf32>
    %60 = math.exp %59 : vector<8x8xf32>
    %cst_25 = arith.constant dense<0.000000e+00> : vector<8xf32>
    %61 = vector.multi_reduction <add>, %60, %cst_25 [1] : vector<8x8xf32> to vector<8xf32>
    %62 = vector.shape_cast %61 : vector<8xf32> to vector<8x1xf32>
    %63 = tpu.reciprocal %62 {approx = true} : vector<8x1xf32> -> vector<8x1xf32>
    %64 = vector.broadcast %63 : vector<8x1xf32> to vector<8x8xf32>
    %65 = arith.mulf %60, %64 : vector<8x8xf32>
    %66 = arith.truncf %65 : vector<8x8xf32> to vector<8x8xbf16>
    %cst_26 = arith.constant dense<0.000000e+00> : vector<8x8xf32>
    %67 = tpu.matmul %66, %49, %cst_26 {dimension_numbers = #tpu.dot_dimension_numbers<[1], [0], [0], [1], [0, 0, 1, 1], [], []>} : vector<8x8xbf16>, vector<8x8xbf16>, vector<8x8xf32> -> vector<8x8xf32>
    %68 = vector.extract_strided_slice %9 {offsets = [0, 16], sizes = [8, 8], strides = [1, 1]} : vector<8x32xf32> to vector<8x8xf32>
    %69 = arith.truncf %68 : vector<8x8xf32> to vector<8x8xbf16>
    %70 = vector.extract_strided_slice %16 {offsets = [0, 16], sizes = [8, 8], strides = [1, 1]} : vector<8x32xf32> to vector<8x8xf32>
    %71 = arith.truncf %70 : vector<8x8xf32> to vector<8x8xbf16>
    %72 = vector.extract_strided_slice %17 {offsets = [0, 16], sizes = [8, 8], strides = [1, 1]} : vector<8x32xf32> to vector<8x8xf32>
    %73 = arith.truncf %72 : vector<8x8xf32> to vector<8x8xbf16>
    %74 = tpu.transpose %71, [1, 0] : vector<8x8xbf16> -> vector<8x8xbf16>
    %cst_27 = arith.constant dense<0.000000e+00> : vector<8x8xf32>
    %75 = tpu.matmul %69, %74, %cst_27 {dimension_numbers = #tpu.dot_dimension_numbers<[1], [0], [0], [1], [0, 0, 1, 1], [], []>} : vector<8x8xbf16>, vector<8x8xbf16>, vector<8x8xf32> -> vector<8x8xf32>
    %cst_28 = arith.constant 0.353553385 : f32
    %76 = vector.broadcast %cst_28 : f32 to vector<8x8xf32>
    %77 = arith.mulf %75, %76 : vector<8x8xf32>
    %78 = vector.broadcast %19 : vector<1x8xf32> to vector<8x8xf32>
    %79 = arith.addf %77, %78 : vector<8x8xf32>
    %cst_29 = arith.constant dense<0xFF800000> : vector<8xf32>
    %80 = vector.multi_reduction <maximumf>, %79, %cst_29 [1] : vector<8x8xf32> to vector<8xf32>
    %81 = vector.shape_cast %80 : vector<8xf32> to vector<8x1xf32>
    %82 = vector.broadcast %81 : vector<8x1xf32> to vector<8x8xf32>
    %83 = arith.subf %79, %82 : vector<8x8xf32>
    %84 = math.exp %83 : vector<8x8xf32>
    %cst_30 = arith.constant dense<0.000000e+00> : vector<8xf32>
    %85 = vector.multi_reduction <add>, %84, %cst_30 [1] : vector<8x8xf32> to vector<8xf32>
    %86 = vector.shape_cast %85 : vector<8xf32> to vector<8x1xf32>
    %87 = tpu.reciprocal %86 {approx = true} : vector<8x1xf32> -> vector<8x1xf32>
    %88 = vector.broadcast %87 : vector<8x1xf32> to vector<8x8xf32>
    %89 = arith.mulf %84, %88 : vector<8x8xf32>
    %90 = arith.truncf %89 : vector<8x8xf32> to vector<8x8xbf16>
    %cst_31 = arith.constant dense<0.000000e+00> : vector<8x8xf32>
    %91 = tpu.matmul %90, %73, %cst_31 {dimension_numbers = #tpu.dot_dimension_numbers<[1], [0], [0], [1], [0, 0, 1, 1], [], []>} : vector<8x8xbf16>, vector<8x8xbf16>, vector<8x8xf32> -> vector<8x8xf32>
    %92 = vector.extract_strided_slice %9 {offsets = [0, 24], sizes = [8, 8], strides = [1, 1]} : vector<8x32xf32> to vector<8x8xf32>
    %93 = arith.truncf %92 : vector<8x8xf32> to vector<8x8xbf16>
    %94 = vector.extract_strided_slice %16 {offsets = [0, 24], sizes = [8, 8], strides = [1, 1]} : vector<8x32xf32> to vector<8x8xf32>
    %95 = arith.truncf %94 : vector<8x8xf32> to vector<8x8xbf16>
    %96 = vector.extract_strided_slice %17 {offsets = [0, 24], sizes = [8, 8], strides = [1, 1]} : vector<8x32xf32> to vector<8x8xf32>
    %97 = arith.truncf %96 : vector<8x8xf32> to vector<8x8xbf16>
    %98 = tpu.transpose %95, [1, 0] : vector<8x8xbf16> -> vector<8x8xbf16>
    %cst_32 = arith.constant dense<0.000000e+00> : vector<8x8xf32>
    %99 = tpu.matmul %93, %98, %cst_32 {dimension_numbers = #tpu.dot_dimension_numbers<[1], [0], [0], [1], [0, 0, 1, 1], [], []>} : vector<8x8xbf16>, vector<8x8xbf16>, vector<8x8xf32> -> vector<8x8xf32>
    %cst_33 = arith.constant 0.353553385 : f32
    %100 = vector.broadcast %cst_33 : f32 to vector<8x8xf32>
    %101 = arith.mulf %99, %100 : vector<8x8xf32>
    %102 = vector.broadcast %19 : vector<1x8xf32> to vector<8x8xf32>
    %103 = arith.addf %101, %102 : vector<8x8xf32>
    %cst_34 = arith.constant dense<0xFF800000> : vector<8xf32>
    %104 = vector.multi_reduction <maximumf>, %103, %cst_34 [1] : vector<8x8xf32> to vector<8xf32>
    %105 = vector.shape_cast %104 : vector<8xf32> to vector<8x1xf32>
    %106 = vector.broadcast %105 : vector<8x1xf32> to vector<8x8xf32>
    %107 = arith.subf %103, %106 : vector<8x8xf32>
    %108 = math.exp %107 : vector<8x8xf32>
    %cst_35 = arith.constant dense<0.000000e+00> : vector<8xf32>
    %109 = vector.multi_reduction <add>, %108, %cst_35 [1] : vector<8x8xf32> to vector<8xf32>
    %110 = vector.shape_cast %109 : vector<8xf32> to vector<8x1xf32>
    %111 = tpu.reciprocal %110 {approx = true} : vector<8x1xf32> -> vector<8x1xf32>
    %112 = vector.broadcast %111 : vector<8x1xf32> to vector<8x8xf32>
    %113 = arith.mulf %108, %112 : vector<8x8xf32>
    %114 = arith.truncf %113 : vector<8x8xf32> to vector<8x8xbf16>
    %cst_36 = arith.constant dense<0.000000e+00> : vector<8x8xf32>
    %115 = tpu.matmul %114, %97, %cst_36 {dimension_numbers = #tpu.dot_dimension_numbers<[1], [0], [0], [1], [0, 0, 1, 1], [], []>} : vector<8x8xbf16>, vector<8x8xbf16>, vector<8x8xf32> -> vector<8x8xf32>
    %116 = tpu.concatenate %43, %67, %91, %115 in 1 : vector<8x8xf32>, vector<8x8xf32>, vector<8x8xf32>, vector<8x8xf32> -> vector<8x32xf32>
    %117 = arith.truncf %116 : vector<8x32xf32> to vector<8x32xbf16>
    %c0_37 = arith.constant 0 : index
    %c0_38 = arith.constant 0 : index
    %118 = vector.load %arg8[%c0_37, %c0_38] : memref<32x32xbf16, #tpu.memory_space<vmem>>, vector<32x32xbf16>
    %cst_39 = arith.constant dense<0.000000e+00> : vector<8x32xf32>
    %119 = tpu.matmul %117, %118, %cst_39 {dimension_numbers = #tpu.dot_dimension_numbers<[1], [0], [0], [1], [0, 0, 1, 1], [], []>} : vector<8x32xbf16>, vector<32x32xbf16>, vector<8x32xf32> -> vector<8x32xf32>
    %c0_40 = arith.constant 0 : index
    %c0_41 = arith.constant 0 : index
    %120 = vector.load %arg9[%c0_40, %c0_41] : memref<1x32xf32, #tpu.memory_space<vmem>>, vector<1x32xf32>
    %121 = vector.broadcast %120 : vector<1x32xf32> to vector<8x32xf32>
    %122 = arith.addf %119, %121 : vector<8x32xf32>
    %c0_42 = arith.constant 0 : index
    %c0_43 = arith.constant 0 : index
    %123 = vector.load %arg10[%c0_42, %c0_43] : memref<1x32xf32, #tpu.memory_space<vmem>>, vector<1x32xf32>
    %c0_44 = arith.constant 0 : index
    %c0_45 = arith.constant 0 : index
    %124 = vector.load %arg11[%c0_44, %c0_45] : memref<1x32xf32, #tpu.memory_space<vmem>>, vector<1x32xf32>
    %125 = arith.addf %1, %122 : vector<8x32xf32>
    %cst_46 = arith.constant dense<0.000000e+00> : vector<8xf32>
    %126 = vector.multi_reduction <add>, %125, %cst_46 [1] : vector<8x32xf32> to vector<8xf32>
    %127 = vector.shape_cast %126 : vector<8xf32> to vector<8x1xf32>
    %cst_47 = arith.constant 3.200000e+01 : f32
    %128 = vector.broadcast %cst_47 : f32 to vector<8x1xf32>
    %129 = arith.divf %127, %128 : vector<8x1xf32>
    %130 = vector.broadcast %129 : vector<8x1xf32> to vector<8x32xf32>
    %131 = arith.subf %125, %130 : vector<8x32xf32>
    %132 = vector.broadcast %129 : vector<8x1xf32> to vector<8x32xf32>
    %133 = arith.subf %125, %132 : vector<8x32xf32>
    %134 = arith.mulf %131, %133 : vector<8x32xf32>
    %cst_48 = arith.constant dense<0.000000e+00> : vector<8xf32>
    %135 = vector.multi_reduction <add>, %134, %cst_48 [1] : vector<8x32xf32> to vector<8xf32>
    %136 = vector.shape_cast %135 : vector<8xf32> to vector<8x1xf32>
    %cst_49 = arith.constant 3.200000e+01 : f32
    %137 = vector.broadcast %cst_49 : f32 to vector<8x1xf32>
    %138 = arith.divf %136, %137 : vector<8x1xf32>
    %139 = vector.broadcast %129 : vector<8x1xf32> to vector<8x32xf32>
    %140 = arith.subf %125, %139 : vector<8x32xf32>
    %cst_50 = arith.constant 9.99999974E-6 : f32
    %141 = vector.broadcast %cst_50 : f32 to vector<8x1xf32>
    %142 = arith.addf %138, %141 : vector<8x1xf32>
    %143 = math.rsqrt %142 : vector<8x1xf32>
    %144 = vector.broadcast %143 : vector<8x1xf32> to vector<8x32xf32>
    %145 = arith.mulf %140, %144 : vector<8x32xf32>
    %146 = vector.broadcast %123 : vector<1x32xf32> to vector<8x32xf32>
    %147 = arith.mulf %145, %146 : vector<8x32xf32>
    %148 = vector.broadcast %124 : vector<1x32xf32> to vector<8x32xf32>
    %149 = arith.addf %147, %148 : vector<8x32xf32>
    %c0_51 = arith.constant 0 : index
    %c0_52 = arith.constant 0 : index
    %c0_53 = arith.constant 0 : index
    %150 = vector.load %arg12[%c0_51, %c0_52, %c0_53] : memref<1x8x32xf32, #tpu.memory_space<vmem>>, vector<1x8x32xf32>
    %151 = vector.shape_cast %150 : vector<1x8x32xf32> to vector<8x32xf32>
    %152 = vector.shape_cast %149 : vector<8x32xf32> to vector<1x8x32xf32>
    tpu.vector_store %arg12[%c0_51, %c0_52, %c0_53], %152 {strides = array<i32>} : memref<1x8x32xf32, #tpu.memory_space<vmem>>, vector<1x8x32xf32>,
    return
  }
  func.func @transform_0(%arg0: i32) -> (i32, i32, i32) {
    %c0_i32 = arith.constant 0 : i32
    %c0_i32_0 = arith.constant 0 : i32
    %c0_i32_1 = arith.constant 0 : i32
    return %arg0, %c0_i32, %c0_i32_0 : i32, i32, i32
  }
  func.func @transform_1(%arg0: i32) -> (i32, i32, i32) {
    %c0_i32 = arith.constant 0 : i32
    %c0_i32_0 = arith.constant 0 : i32
    %c0_i32_1 = arith.constant 0 : i32
    return %arg0, %c0_i32, %c0_i32_0 : i32, i32, i32
  }
  func.func @transform_2(%arg0: i32) -> (i32, i32, i32) {
    %c0_i32 = arith.constant 0 : i32
    %c0_i32_0 = arith.constant 0 : i32
    %c0_i32_1 = arith.constant 0 : i32
    return %arg0, %c0_i32, %c0_i32_0 : i32, i32, i32
  }
  func.func @transform_3(%arg0: i32) -> (i32, i32) {
    %c0_i32 = arith.constant 0 : i32
    %c0_i32_0 = arith.constant 0 : i32
    %c0_i32_1 = arith.constant 0 : i32
    return %c0_i32, %c0_i32_0 : i32, i32
  }
  func.func @transform_4(%arg0: i32) -> (i32, i32) {
    %c0_i32 = arith.constant 0 : i32
    %c0_i32_0 = arith.constant 0 : i32
    %c0_i32_1 = arith.constant 0 : i32
    return %c0_i32, %c0_i32_0 : i32, i32
  }
  func.func @transform_5(%arg0: i32) -> (i32, i32) {
    %c0_i32 = arith.constant 0 : i32
    %c0_i32_0 = arith.constant 0 : i32
    %c0_i32_1 = arith.constant 0 : i32
    return %c0_i32, %c0_i32_0 : i32, i32
  }
  func.func @transform_6(%arg0: i32) -> (i32, i32) {
    %c0_i32 = arith.constant 0 : i32
    %c0_i32_0 = arith.constant 0 : i32
    %c0_i32_1 = arith.constant 0 : i32
    return %c0_i32, %c0_i32_0 : i32, i32
  }
  func.func @transform_7(%arg0: i32) -> (i32, i32) {
    %c0_i32 = arith.constant 0 : i32
    %c0_i32_0 = arith.constant 0 : i32
    %c0_i32_1 = arith.constant 0 : i32
    return %c0_i32, %c0_i32_0 : i32, i32
  }
  func.func @transform_8(%arg0: i32) -> (i32, i32) {
    %c0_i32 = arith.constant 0 : i32
    %c0_i32_0 = arith.constant 0 : i32
    %c0_i32_1 = arith.constant 0 : i32
    return %c0_i32, %c0_i32_0 : i32, i32
  }
  func.func @transform_9(%arg0: i32) -> (i32, i32) {
    %c0_i32 = arith.constant 0 : i32
    %c0_i32_0 = arith.constant 0 : i32
    %c0_i32_1 = arith.constant 0 : i32
    return %c0_i32, %c0_i32_0 : i32, i32
  }
  func.func @transform_10(%arg0: i32) -> (i32, i32) {
    %c0_i32 = arith.constant 0 : i32
    %c0_i32_0 = arith.constant 0 : i32
    %c0_i32_1 = arith.constant 0 : i32
    return %c0_i32, %c0_i32_0 : i32, i32
  }
  func.func @transform_11(%arg0: i32) -> (i32, i32, i32) {
    %c0_i32 = arith.constant 0 : i32
    %c0_i32_0 = arith.constant 0 : i32
    %c0_i32_1 = arith.constant 0 : i32
    return %arg0, %c0_i32, %c0_i32_0 : i32, i32, i32
  }
}

module attributes {stable_mosaic.version = 11 : i64} {
  func.func @_linear_kernel(%arg0: i32, %arg1: memref<8x32xf32, #tpu.memory_space<vmem>>, %arg2: memref<32x16xbf16, #tpu.memory_space<vmem>>, %arg3: memref<1x16xf32, #tpu.memory_space<vmem>>, %arg4: memref<8x16xf32, #tpu.memory_space<vmem>>) attributes {dimension_semantics = [#tpu.dimension_semantics<parallel>], iteration_bounds = array<i64: 2>, scalar_prefetch = 0 : i64, scratch_operands = 0 : i64, tpu.core_type = #tpu.core_type<tc>, window_params = [{transform_indices = @transform_0, window_bounds = array<i64: 8, 32>}, {pipeline_mode = #tpu.pipeline_mode<synchronous>, transform_indices = @transform_1, window_bounds = array<i64: 32, 16>}, {pipeline_mode = #tpu.pipeline_mode<synchronous>, transform_indices = @transform_2, window_bounds = array<i64: 1, 16>}, {transform_indices = @transform_3, window_bounds = array<i64: 8, 16>}]} {
    %c0 = arith.constant 0 : index
    %c0_0 = arith.constant 0 : index
    %0 = vector.load %arg1[%c0, %c0_0] : memref<8x32xf32, #tpu.memory_space<vmem>>, vector<8x32xf32>
    %1 = arith.truncf %0 : vector<8x32xf32> to vector<8x32xbf16>
    %c0_1 = arith.constant 0 : index
    %c0_2 = arith.constant 0 : index
    %2 = vector.load %arg2[%c0_1, %c0_2] : memref<32x16xbf16, #tpu.memory_space<vmem>>, vector<32x16xbf16>
    %cst = arith.constant dense<0.000000e+00> : vector<8x16xf32>
    %3 = tpu.matmul %1, %2, %cst {dimension_numbers = #tpu.dot_dimension_numbers<[1], [0], [0], [1], [0, 0, 1, 1], [], []>} : vector<8x32xbf16>, vector<32x16xbf16>, vector<8x16xf32> -> vector<8x16xf32>
    %c0_3 = arith.constant 0 : index
    %c0_4 = arith.constant 0 : index
    %4 = vector.load %arg3[%c0_3, %c0_4] : memref<1x16xf32, #tpu.memory_space<vmem>>, vector<1x16xf32>
    %5 = vector.broadcast %4 : vector<1x16xf32> to vector<8x16xf32>
    %6 = arith.addf %3, %5 : vector<8x16xf32>
    %c0_5 = arith.constant 0 : index
    %c0_6 = arith.constant 0 : index
    %7 = vector.load %arg4[%c0_5, %c0_6] : memref<8x16xf32, #tpu.memory_space<vmem>>, vector<8x16xf32>
    tpu.vector_store %arg4[%c0_5, %c0_6], %6 {strides = array<i32>} : memref<8x16xf32, #tpu.memory_space<vmem>>, vector<8x16xf32>,
    return
  }
  func.func @transform_0(%arg0: i32) -> (i32, i32) {
    %c0_i32 = arith.constant 0 : i32
    %c0_i32_0 = arith.constant 0 : i32
    return %arg0, %c0_i32 : i32, i32
  }
  func.func @transform_1(%arg0: i32) -> (i32, i32) {
    %c0_i32 = arith.constant 0 : i32
    %c0_i32_0 = arith.constant 0 : i32
    %c0_i32_1 = arith.constant 0 : i32
    return %c0_i32, %c0_i32_0 : i32, i32
  }
  func.func @transform_2(%arg0: i32) -> (i32, i32) {
    %c0_i32 = arith.constant 0 : i32
    %c0_i32_0 = arith.constant 0 : i32
    %c0_i32_1 = arith.constant 0 : i32
    return %c0_i32, %c0_i32_0 : i32, i32
  }
  func.func @transform_3(%arg0: i32) -> (i32, i32) {
    %c0_i32 = arith.constant 0 : i32
    %c0_i32_0 = arith.constant 0 : i32
    return %arg0, %c0_i32 : i32, i32
  }
}

</mosaic_0001>

<bundles_post_ra>
// kernel: transformer_forward.12
= control target key start
LH: loop header
LB: loop body
LE: loop exit
PB: predicated region body
PF: predicated region fallthrough
CT: control target
= control target key end

     0   :  { %s631_s24 = smov 0   ;;  %s689_s0 = inlined_call_operand.vmem [shape: f32[16,32], index: 0, kind: input, shape index: {}]   ;;  %s690_s1 = inlined_call_operand.vmem [shape: bf16[32,64], index: 1, kind: input, shape index: {}]   ;;  %s691_s2 = inlined_call_operand.vmem [shape: f32[1,64], index: 2, kind: input, shape index: {}]   ;;  %s692_s3 = inlined_call_operand.vmem [shape: bf16[64,32], index: 3, kind: input, shape index: {}]   ;;  %s693_s4 = inlined_call_operand.vmem [shape: f32[1,32], index: 4, kind: input, shape index: {}]   ;;  %s694_s5 = inlined_call_operand.vmem [shape: f32[1,32], index: 5, kind: input, shape index: {}]   ;;  %s695_s6 = inlined_call_operand.vmem [shape: f32[1,32], index: 6, kind: input, shape index: {}]   ;;  %s696_s7 = inlined_call_operand.vmem [shape: f32[16,32], index: 7, kind: output, shape index: {}]  }
   0x1 LB: > { %s514_s25 = sadd.s32 4294967295, %s587_s24   ;;  %p518_p0 = scmp.ge.s32.totalorder %s587_s24, 1  ;;  %s587_s24 = sphi %s631_s24, %s17_s24  }
   0x2   : > { %p236_p1 = scmp.lt.s32.totalorder %s587_s24, 3 }
   0x4   : > { %p237_p2 = pnand %p518_p0, %p236_p1 }
   0x5   : > { %v573_v0 = vld [vmem:[%s690_s1] sm:$0xff] (!%p237_p2)   ;;  %v589_v1 = vmov (!%p237_p2), 0.0   ;;  %v574_v2 = vld [vmem:[%s690_s1 + $0x8] sm:$0xff] (!%p237_p2)   ;;  %vm590_vm0 = vmmov (!%p237_p2), 0   ;;  %p266_p3 = scmp.lt.s32.totalorder (!%p237_p2), %s514_s25, 1  ;;  %vm300_vm1 = vcmask (!%p237_p2), 261120  }
   0x6   : > { %240 = sbr.rel (%p237_p2) target bundleno = 767 (0x2ff), region = 48  ;;  %543 = vmatprep.subr.bf16.mxu0 (!%p237_p2), %v589_v1  ;;  %551 = vmatprep.subr.bf16.mxu1 (!%p237_p2), %v589_v1  ;;  %v575_v3 = vld [vmem:[%s692_s3] sm:$0xff] (!%p237_p2)   ;;  %v576_v4 = vld [vmem:[%s692_s3 + $0x8] sm:$0xff] (!%p237_p2)   ;;  %v577_v7 = vld [vmem:[%s692_s3 + $0x10] sm:$0xff] (!%p237_p2)   ;;  %vm385_vm2 = vcmask (!%p237_p2), 523264  }
   0x7   : > { %544 = vmatpush3.bf16.msra.mxu0 (!%p237_p2), %v573_v0  ;;  %547 = vmatprep.mubr.msk.bf16.mxu0 (!%p237_p2), %vm590_vm0, %v589_v1  ;;  %v578_v8 = vld [vmem:[%s692_s3 + $0x18] sm:$0xff] (!%p237_p2)   ;;  %v521_v9 = vld [vmem:[%s691_s2] ss:$0 sm:$0xff] (!%p237_p2) }
   0x8   : > { %545 = vmatprep.subr.bf16.mxu0 (!%p237_p2), %v589_v1  ;;  %559 = vmatprep.mubr.msk.bf16.mxu1 (!%p237_p2), %vm590_vm0, %v589_v1  ;;  %v525_v17 = vld [vmem:[%s693_s4] ss:$0 sm:$0xff] (!%p237_p2) }
   0x9   : > { %552 = vmatpush3.bf16.msra.mxu1 (!%p237_p2), %v575_v3  ;;  %v531_v34 = vld [vmem:[%s694_s5] ss:$0 sm:$0xff] (!%p237_p2) }
   0xa   : > { %553 = vmatprep.subr.bf16.mxu1 (!%p237_p2), %v589_v1  ;;  %v532_v36 = vld [vmem:[%s695_s6] ss:$0 sm:$0xff] (!%p237_p2) }
   0xb   : > { %546 = vmatpush3.bf16.msra.mxu0 (!%p237_p2), %v574_v2 }
   0xd   : > { %s698_s25 = smov (!%p266_p3, %s514_s25), 1  ;;  %554 = vmatpush3.bf16.msra.mxu1 %v576_v4 }
   0xe   : > { %s519_s11 = sshll.u32 %s698_s25, 3  ;;  %555 = vmatprep.subr.bf16.mxu1 %v589_v1 }
   0xf   : > { %s269_s14 = scalar_lea.vmem %s689_s0, %s519_s11  ;;  %s273_s8 = scalar_lea.vmem %s696_s7, %s519_s11 }
  0x10   : > { %v275_v5 = vld [vmem:[%s269_s14] sm:$0xff] }
  0x11   : > { %v276_v6 = vpack.c.bf16 %v275_v5, %v275_v5  ;;  %556 = vmatpush3.bf16.msra.mxu1 %v577_v7 }
  0x12   : > { %557 = vmatprep.subr.bf16.mxu1 %v589_v1 }
  0x13   : > { %548 = vmatmul.mubr.msk.bf16.vlgmr.msra.gmra.mrb[0].mxu0 %vm300_vm1, %v276_v6 }
  0x15   : > { %558 = vmatpush3.bf16.msra.mxu1 %v578_v8 }
  0xe6   : > { %v338_v10 = vpop.f32.mrb[0].mxu0 }
  0xe7   : > { %v339_v11 = vadd.f32 %v521_v9, %v338_v10  ;;  %v549_v12 = vpop.f32.mrb[1].mxu0 }
  0xe8   : > { %v341_v13 = vpop.f32.mrb[2].mxu0 }
  0xe9   : > { %v344_v14 = vmax.f32 %v339_v11, 0.0  ;;  %v550_v15 = vpop.f32.mrb[3].mxu0 }
  0xeb   : > { %v345_v16 = vpack.c.bf16 %v344_v14, %v344_v14 }
  0xed   : > { %560 = vmatmul.mubr.msk.bf16.vlgmr.msra.gmra.mrb[0].mxu1 %vm385_vm2, %v345_v16 }
 0x1c0   : > { %v423_v18 = vpop.f32.mrb[0].mxu1 }
 0x1c1   : > { %v424_v19 = vadd.f32 %v525_v17, %v423_v18  ;;  %v561_v20 = vpop.f32.mrb[1].mxu1 }
 0x1c2   : > { %v426_v21 = vpop.f32.mrb[2].mxu1 }
 0x1c3   : > { %v562_v22 = vpop.f32.mrb[3].mxu1  ;;  %v431_v23 = vadd.f32 %v424_v19, %v275_v5 }
 0x1c5   : > { %v432_v24 = vsel %vm300_vm1, %v431_v23, 0.0 }
 0x1c6   : > { %433 = vadd.xlane.f32.xlu0 %v432_v24 }
 0x253   : > { %v434_v25 = vpop.xlane.xlu0 %433 }
 0x254   : > { %v436_v26 = vmul.f32 0.03125, %v434_v25 }
 0x256   : > { %v437_v27 = vsub.f32 %v431_v23, %v436_v26 }
 0x258   : > { %v438_v28 = vmul.f32 %v437_v27, %v437_v27 }
 0x25a   : > { %v439_v29 = vsel %vm300_vm1, %v438_v28, 0.0 }
 0x25b   : > { %440 = vadd.xlane.f32.xlu0 %v439_v29 }
 0x2e8   : > { %v441_v30 = vpop.xlane.xlu0 %440 }
 0x2e9   : > { %v442_v31 = vmul.f32 0.03125, %v441_v30 }
 0x2eb   : > { %v443_v32 = vadd.f32 1e-05, %v442_v31 }
 0x2ed   : > { %579 = vrsqrt.f32 %v443_v32 }
 0x2f7   : > { %v580_v33 = vpop.eup %579 }
 0x2f8   : > { %v445_v35 = vmul.f32 %v580_v33, %v437_v27 }
 0x2fa   : > { %v452_v37 = vmul.f32 %v531_v34, %v445_v35 }
 0x2fc   : > { %v459_v38 = vadd.f32 %v532_v36, %v452_v37 }
 0x2fe   : > { %460 = vst.msk [vmem:[%s273_s8] sm:$0xff] %vm300_vm1, %v459_v38 }
 0x2ff PF: > { %s17_s24 = sadd.s32 1, %s587_s24  }
 0x300   : > { %p14_p4 = scmp.ge.s32.totalorder %s17_s24, 4  }
 0x302   :  { %16 = sbr.rel (!%p14_p4) target bundleno = 1 (0x1), region = 78 }

// kernel: transformer_forward.11
= control target key start
LH: loop header
LB: loop body
LE: loop exit
PB: predicated region body
PF: predicated region fallthrough
CT: control target
= control target key end

     0   :  { %s1249_s27 = smov 0   ;;  %s1382_s0 = inlined_call_operand.vmem [shape: f32[2,8,32], index: 0, kind: input, shape index: {}]   ;;  %s1383_s1 = inlined_call_operand.vmem [shape: f32[2,1,8], index: 1, kind: input, shape index: {}]   ;;  %s1384_s2 = inlined_call_operand.vmem [shape: bf16[32,96], index: 2, kind: input, shape index: {}]   ;;  %s1385_s3 = inlined_call_operand.vmem [shape: f32[1,96], index: 3, kind: input, shape index: {}]   ;;  %s1386_s4 = inlined_call_operand.vmem [shape: bf16[32,32], index: 4, kind: input, shape index: {}]   ;;  %s1387_s5 = inlined_call_operand.vmem [shape: f32[1,32], index: 5, kind: input, shape index: {}]   ;;  %s1388_s6 = inlined_call_operand.vmem [shape: f32[1,32], index: 6, kind: input, shape index: {}]   ;;  %s1389_s7 = inlined_call_operand.vmem [shape: f32[1,32], index: 7, kind: input, shape index: {}]   ;;  %s1390_s8 = inlined_call_operand.vmem [shape: f32[2,8,32], index: 8, kind: output, shape index: {}]  }
   0x1 LB: > { %s1020_s28 = sadd.s32 4294967295, %s1186_s27   ;;  %p1024_p0 = scmp.ge.s32.totalorder %s1186_s27, 1  ;;  %s1186_s27 = sphi %s1249_s27, %s18_s27  }
   0x2   : > { %p269_p1 = scmp.lt.s32.totalorder %s1186_s27, 3 }
   0x4   : > { %p270_p2 = pnand %p1024_p0, %p269_p1 }
   0x5   : > { %v1158_v0 = vld [vmem:[%s1384_s2] sm:$0xff] (!%p270_p2)   ;;  %v1188_v1 = vmov (!%p270_p2), 0.0   ;;  %v1159_v2 = vld [vmem:[%s1384_s2 + $0x8] sm:$0xff] (!%p270_p2)   ;;  %vm1189_vm0 = vmmov (!%p270_p2), 0   ;;  %p304_p3 = scmp.lt.s32.totalorder (!%p270_p2), %s1020_s28, 1  ;;  %vm341_vm1 = vcmask (!%p270_p2), 261120  }
   0x6   : > { %273 = sbr.rel (%p270_p2) target bundleno = 1812 (0x714), region = 52  ;;  %1070 = vmatprep.subr.bf16.mxu0 (!%p270_p2), %v1188_v1  ;;  %1078 = vmatprep.subr.bf16.mxu1 (!%p270_p2), %v1188_v1  ;;  %v1027_v5 = vld [vmem:[%s1385_s3] ss:$0 sm:$0xff] (!%p270_p2)  ;;  %s1190_s17 = smov (!%p270_p2), 120   ;;  %vm390_vm2 = vcmask (!%p270_p2), 64512   ;;  %vm462_vm3 = vcmask (!%p270_p2), 1043456  }
   0x7   : > { %1071 = vmatpush3.bf16.msra.mxu0 (!%p270_p2), %v1158_v0  ;;  %1074 = vmatprep.mubr.msk.bf16.mxu0 (!%p270_p2), %vm1189_vm0, %v1188_v1  ;;  %s1191_s18 = smov (!%p270_p2), 96   ;;  %s1192_s19 = smov (!%p270_p2), 80   ;;  %vm855_vm4 = vcmask (!%p270_p2), 130048   ;;  %vm857_vm5 = vcmask (!%p270_p2), 195584  }
   0x8   : > { %1072 = vmatprep.subr.bf16.mxu0 (!%p270_p2), %v1188_v1  ;;  %1080 = vmatprep.mubr.msk.bf16.mxu1 (!%p270_p2), %vm1189_vm0, %v1188_v1  ;;  %s1193_s20 = smov (!%p270_p2), 88   ;;  %s1194_s21 = smov (!%p270_p2), 72  }
   0x9   : > { %s1195_s22 = smov (!%p270_p2), 112   ;;  %s1196_s23 = smov (!%p270_p2), 104  }
   0xa   : > { %s1197_s29 = smov (!%p270_p2), 56   ;;  %s1198_s30 = smov (!%p270_p2), 64  }
   0xb   : > { %1073 = vmatpush3.bf16.msra.mxu0 (!%p270_p2), %v1159_v2  ;;  %s1199_s9 = smov (!%p270_p2), 40   ;;  %s1200_s10 = smov (!%p270_p2), 48  }
   0xc   : > { %1084 = vmatprep.subr.bf16.mxu0 (!%p270_p2), %v1188_v1  ;;  %s1201_s12 = smov (!%p270_p2), 8  }
   0xd   : > { %s1392_s28 = smov (!%p304_p3, %s1020_s28), 1 }
   0xe   : > { %s1025_s11 = sshll.u32 %s1392_s28, 3  ;;  %s310_s26 = scalar_lea.vmem %s1383_s1, %s1392_s28 }
   0xf   : > { %s307_s14 = scalar_lea.vmem %s1382_s0, %s1025_s11  ;;  %v1032_v24 = vld [vmem:[%s310_s26] ss:$0 sm:$0xff] }
  0x10   : > { %v1279_v3 = vld [vmem:[%s307_s14] sm:$0xff] }
  0x11   : > { %v317_v4 = vpack.c.bf16 %v1279_v3, %v1279_v3 }
  0x13   : > { %1075 = vmatmul.mubr.msk.bf16.vlgmr.msra.gmra.mrb[0].mxu0 %vm341_vm1, %v317_v4 }
  0x14   : > { %1086 = vmatprep.mubr.msk.bf16.mxu0 %vm1189_vm0, %v1188_v1 }
  0xe6   : > { %v379_v6 = vpop.f32.mrb[0].mxu0 }
  0xe7   : > { %v380_v7 = vadd.f32 %v1027_v5, %v379_v6  ;;  %v1076_v8 = vpop.f32.mrb[1].mxu0 }
  0xe8   : > { %v382_v9 = vpop.f32.mrb[2].mxu0 }
  0xe9   : > { %v1289_v10 = vpack.c.bf16 %v380_v7, %v380_v7  ;;  %v1077_v11 = vpop.f32.mrb[3].mxu0 }
  0xeb   : > { %506 = vrot.lane.b32.xlu1 %v1289_v10, %s1190_s17  ;;  %388 = vrot.lane.b32.xlu0 %v1289_v10, %s1191_s18  ;;  %s1202_s17 = smov 16   ;;  %s1203_s18 = smov 24  }
  0xef   : > { %620 = vrot.lane.b32.xlu1 %v1289_v10, %s1192_s19  ;;  %508 = vrot.lane.b32.xlu0 %v1289_v10, %s1193_s20 }
  0xf3   : > { %732 = vrot.lane.b32.xlu1 %v1289_v10, %s1194_s21  ;;  %618 = vrot.lane.b32.xlu0 %v1289_v10, %s1195_s22 }
  0xf7   : > { %730 = vrot.lane.b32.xlu0 %v1289_v10, %s1196_s23 }
 0x15d   : > { %v389_v12 = vpop.permute.xlu0 %388  ;;  %v507_v15 = vpop.permute.xlu1 %506 }
 0x15e   : > { %v395_v13 = vsel %vm390_vm2, %v389_v12, 0 }
 0x15f   : > { %1079 = vmatpush3.bf16.xpose.msra.mxu1 %v395_v13 }
 0x160   : > { %1090 = vmatprep.subr.bf16.mxu1 %v1188_v1 }
 0x161   : > { %v509_v14 = vpop.permute.xlu0 %508  ;;  %v621_v17 = vpop.permute.xlu1 %620 }
 0x162   : > { %v514_v16 = vsel %vm390_vm2, %v509_v14, 0  ;;  %v626_v18 = vsel %vm390_vm2, %v621_v17, 0 }
 0x165   : > { %v733_v19 = vpop.permute.xlu1 %732  ;;  %v619_v20 = vpop.permute.xlu0 %618 }
 0x166   : > { %1081 = vmatmul.mubr.msk.bf16.vlgmr.msra.gmra.mrb[0].mxu1 %vm390_vm2, %v1289_v10  ;;  %v738_v21 = vsel %vm390_vm2, %v733_v19, 0 }
 0x167   : > { %1091 = vmatpush3.bf16.xpose.msra.mxu1 %v514_v16  ;;  %1092 = vmatprep.mubr.msk.bf16.mxu1 %vm1189_vm0, %v1188_v1 }
 0x168   : > { %1102 = vmatprep.subr.bf16.mxu1 %v1188_v1 }
 0x169   : > { %v731_v22 = vpop.permute.xlu0 %730 }
 0x16e   : > { %1093 = vmatmul.mubr.msk.bf16.vlgmr.msra.gmra.mrb[4].mxu1 %vm390_vm2, %v507_v15 }
 0x16f   : > { %1103 = vmatpush3.bf16.xpose.msra.mxu1 %v626_v18  ;;  %1104 = vmatprep.mubr.msk.bf16.mxu1 %vm1189_vm0, %v1188_v1 }
 0x170   : > { %1114 = vmatprep.subr.bf16.mxu1 %v1188_v1 }
 0x176   : > { %1105 = vmatmul.mubr.msk.bf16.vlgmr.msra.gmra.mrb[8].mxu1 %vm390_vm2, %v619_v20 }
 0x177   : > { %1115 = vmatpush3.bf16.xpose.msra.mxu1 %v738_v21  ;;  %1116 = vmatprep.mubr.msk.bf16.mxu1 %vm1189_vm0, %v1188_v1 }
 0x178   : > { %1126 = vmatprep.subr.bf16.mxu1 %v1188_v1 }
 0x17e   : > { %1117 = vmatmul.mubr.msk.bf16.vlgmr.msra.gmra.mrb[12].mxu1 %vm390_vm2, %v731_v22 }
 0x17f   : > { %1130 = vmatprep.mubr.msk.bf16.mxu1 %vm1189_vm0, %v1188_v1 }
 0x239   : > { %v431_v23 = vpop.f32.mrb[0].mxu1 }
 0x23a   : > { %v437_v25 = vmul.f32 0.35355338, %v431_v23  ;;  %v1082_v26 = vpop.f32.mrb[1].mxu1 }
 0x23b   : > { %v434_v27 = vpop.f32.mrb[2].mxu1 }
 0x23c   : > { %v1083_v28 = vpop.f32.mrb[3].mxu1  ;;  %v444_v29 = vadd.f32 %v1032_v24, %v437_v25 }
 0x23e   : > { %v445_v30 = vsel %vm390_vm2, %v444_v29, -inf }
 0x23f   : > { %446 = vmax.xlane.f32.xlu1 %v445_v30 }
 0x241   : > { %v550_v31 = vpop.f32.mrb[4].mxu1 }
 0x242   : > { %v556_v32 = vmul.f32 0.35355338, %v550_v31  ;;  %v1094_v33 = vpop.f32.mrb[5].mxu1 }
 0x243   : > { %v553_v34 = vpop.f32.mrb[6].mxu1 }
 0x244   : > { %v1095_v35 = vpop.f32.mrb[7].mxu1  ;;  %v557_v36 = vadd.f32 %v1032_v24, %v556_v32 }
 0x246   : > { %v558_v37 = vsel %vm390_vm2, %v557_v36, -inf }
 0x247   : > { %559 = vmax.xlane.f32.xlu0 %v558_v37 }
 0x249   : > { %v662_v38 = vpop.f32.mrb[8].mxu1 }
 0x24a   : > { %v668_v39 = vmul.f32 0.35355338, %v662_v38  ;;  %v1106_v40 = vpop.f32.mrb[9].mxu1 }
 0x24b   : > { %v665_v41 = vpop.f32.mrb[10].mxu1 }
 0x24c   : > { %v1107_v42 = vpop.f32.mrb[11].mxu1  ;;  %v669_v43 = vadd.f32 %v1032_v24, %v668_v39 }
 0x24d   : > { %v1160_v42 = vld [vmem:[%s1386_s4] sm:$0xff]  }
 0x24e   : > { %v670_v44 = vsel %vm390_vm2, %v669_v43, -inf  ;;  %1127 = vmatpush3.bf16.msra.mxu1 %v1160_v42 }
 0x24f   : > { %671 = vmax.xlane.f32.xlu0 %v670_v44  ;;  %1128 = vmatprep.subr.bf16.mxu1 %v1188_v1 }
 0x251   : > { %v774_v45 = vpop.f32.mrb[12].mxu1 }
 0x252   : > { %v780_v46 = vmul.f32 0.35355338, %v774_v45  ;;  %v1118_v47 = vpop.f32.mrb[13].mxu1 }
 0x253   : > { %v777_v48 = vpop.f32.mrb[14].mxu1 }
 0x254   : > { %v1119_v49 = vpop.f32.mrb[15].mxu1  ;;  %v781_v50 = vadd.f32 %v1032_v24, %v780_v46 }
 0x256   : > { %v782_v51 = vsel %vm390_vm2, %v781_v50, -inf }
 0x257   : > { %783 = vmax.xlane.f32.xlu1 %v782_v51 }
 0x2cc   : > { %v447_v52 = vpop.xlane.xlu1 %446 }
 0x2cd   : > { %v448_v53 = vsub.f32 %v444_v29, %v447_v52 }
 0x2cf   : > { %v449_v54 = vmul.f32 1.442695, %v448_v53 }
 0x2d1   : > { %1162 = vpow2.f32 %v449_v54 }
 0x2d4   : > { %v560_v55 = vpop.xlane.xlu0 %559 }
 0x2d5   : > { %v561_v56 = vsub.f32 %v557_v36, %v560_v55 }
 0x2d7   : > { %v562_v57 = vmul.f32 1.442695, %v561_v56 }
 0x2d9   : > { %1164 = vpow2.f32 %v562_v57 }
 0x2db   : > { %v1163_v58 = vpop.eup %1162 }
 0x2dc   : > { %v672_v59 = vpop.xlane.xlu0 %671  ;;  %v451_v60 = vsel %vm390_vm2, %v1163_v58, 0.0 }
 0x2dd   : > { %v673_v61 = vsub.f32 %v669_v43, %v672_v59  ;;  %452 = vadd.xlane.f32.xlu0 %v451_v60  ;;  %v1161_v43 = vld [vmem:[%s1386_s4 + $0x8] sm:$0xff]  }
 0x2de   : > { %1129 = vmatpush3.bf16.msra.mxu1 %v1161_v43 }
 0x2df   : > { %v674_v62 = vmul.f32 1.442695, %v673_v61 }
 0x2e1   : > { %1166 = vpow2.f32 %v674_v62 }
 0x2e3   : > { %v1165_v63 = vpop.eup %1164 }
 0x2e4   : > { %v564_v0 = vsel %vm390_vm2, %v1165_v63, 0.0  ;;  %v784_v5 = vpop.xlane.xlu1 %783 }
 0x2e5   : > { %565 = vadd.xlane.f32.xlu1 %v564_v0  ;;  %v785_v6 = vsub.f32 %v781_v50, %v784_v5 }
 0x2e7   : > { %v786_v7 = vmul.f32 1.442695, %v785_v6 }
 0x2e9   : > { %1168 = vpow2.f32 %v786_v7 }
 0x2eb   : > { %v1167_v2 = vpop.eup %1166 }
 0x2ec   : > { %v676_v4 = vsel %vm390_vm2, %v1167_v2, 0.0 }
 0x2ed   : > { %677 = vadd.xlane.f32.xlu0 %v676_v4 }
 0x2f3   : > { %v1169_v8 = vpop.eup %1168 }
 0x2f4   : > { %v788_v9 = vsel %vm390_vm2, %v1169_v8, 0.0 }
 0x2f6   : > { %570 = vrot.lane.b32.xlu1 %v1289_v10, %s1197_s29  ;;  %s314_s29 = scalar_lea.vmem %s1390_s8, %s1025_s11 }
 0x303   : > { %457 = vrot.lane.b32.xlu0 %v1289_v10, %s1198_s30 }
 0x307   : > { %794 = vrot.lane.b32.xlu0 %v1289_v10, %s1199_s9 }
 0x31a   : > { %789 = vadd.xlane.f32.xlu1 %v788_v9 }
 0x32b   : > { %682 = vrot.lane.b32.xlu1 %v1289_v10, %s1200_s10 }
 0x36a   : > { %v453_v11 = vpop.xlane.xlu0 %452 }
 0x36b   : > { %1170 = vrcp.f32 %v453_v11 }
 0x372   : > { %v566_v12 = vpop.xlane.xlu1 %565 }
 0x373   : > { %1172 = vrcp.f32 %v566_v12 }
 0x375   : > { %v1171_v13 = vpop.eup %1170 }
 0x376   : > { %v455_v15 = vmul.f32 %v1171_v13, %v1163_v58  ;;  %v571_v18 = vpop.permute.xlu1 %570  ;;  %v1040_v58 = vld [vmem:[%s1387_s5] ss:$0 sm:$0xff] }
 0x377   : > { %v576_v21 = vsel %vm462_vm3, %v571_v18, 0 }
 0x378   : > { %v456_v19 = vpack.c.bf16 %v455_v15, %v455_v15  ;;  %v1045_v15 = vld [vmem:[%s1389_s7] ss:$0 sm:$0xff] }
 0x37a   : > { %v678_v14 = vpop.xlane.xlu0 %677 }
 0x37b   : > { %1174 = vrcp.f32 %v678_v14 }
 0x37d   : > { %v1173_v20 = vpop.eup %1172 }
 0x37e   : > { %v458_v16 = vpop.permute.xlu0 %457  ;;  %v568_v10 = vmul.f32 %v1173_v20, %v1165_v63 }
 0x37f   : > { %v464_v17 = vsel %vm462_vm3, %v458_v16, 0 }
 0x380   : > { %1085 = vmatpush3.bf16.msra.mxu0 %v464_v17  ;;  %v569_v22 = vpack.c.bf16 %v568_v10, %v568_v10 }
 0x381   : > { %1096 = vmatprep.subr.bf16.mxu0 %v1188_v1 }
 0x382   : > { %v795_v28 = vpop.permute.xlu0 %794 }
 0x383   : > { %1087 = vmatmul.mubr.msk.bf16.vlgmr.msra.gmra.mrb[4].mxu0 %vm390_vm2, %v456_v19  ;;  %v800_v30 = vsel %vm462_vm3, %v795_v28, 0 }
 0x384   : > { %1097 = vmatpush3.bf16.msra.mxu0 %v576_v21  ;;  %1098 = vmatprep.mubr.msk.bf16.mxu0 %vm1189_vm0, %v1188_v1 }
 0x385   : > { %1108 = vmatprep.subr.bf16.mxu0 %v1188_v1  ;;  %v1175_v23 = vpop.eup %1174 }
 0x386   : > { %v680_v25 = vmul.f32 %v1175_v23, %v1167_v2 }
 0x388   : > { %v681_v29 = vpack.c.bf16 %v680_v25, %v680_v25 }
 0x38b   : > { %1099 = vmatmul.mubr.msk.bf16.vlgmr.msra.gmra.mrb[8].mxu0 %vm390_vm2, %v569_v22 }
 0x38c   : > { %1110 = vmatprep.mubr.msk.bf16.mxu0 %vm1189_vm0, %v1188_v1 }
 0x3a7   : > { %v790_v24 = vpop.xlane.xlu1 %789 }
 0x3a8   : > { %1176 = vrcp.f32 %v790_v24 }
 0x3ab   : > { %v683_v26 = vpop.permute.xlu1 %682 }
 0x3ac   : > { %v688_v27 = vsel %vm462_vm3, %v683_v26, 0 }
 0x3ad   : > { %1109 = vmatpush3.bf16.msra.mxu0 %v688_v27 }
 0x3ae   : > { %1120 = vmatprep.subr.bf16.mxu0 %v1188_v1 }
 0x3b0   : > { %1111 = vmatmul.mubr.msk.bf16.vlgmr.msra.gmra.mrb[12].mxu0 %vm390_vm2, %v681_v29 }
 0x3b1   : > { %1121 = vmatpush3.bf16.msra.mxu0 %v800_v30  ;;  %1122 = vmatprep.mubr.msk.bf16.mxu0 %vm1189_vm0, %v1188_v1 }
 0x3b2   : > { %v1177_v31 = vpop.eup %1176 }
 0x3b3   : > { %v792_v32 = vmul.f32 %v1177_v31, %v1169_v8 }
 0x3b5   : > { %v793_v33 = vpack.c.bf16 %v792_v32, %v792_v32 }
 0x3b8   : > { %1123 = vmatmul.mubr.msk.bf16.vlgmr.msra.gmra.mrb[16].mxu0 %vm390_vm2, %v793_v33 }
 0x456   : > { %v500_v34 = vpop.f32.mrb[4].mxu0 }
 0x457   : > { %v1088_v35 = vpop.f32.mrb[5].mxu0 }
 0x458   : > { %v503_v36 = vpop.f32.mrb[6].mxu0 }
 0x459   : > { %v1089_v37 = vpop.f32.mrb[7].mxu0 }
 0x45e   : > { %v612_v38 = vpop.f32.mrb[8].mxu0 }
 0x45f   : > { %843 = vrot.lane.b32.xlu1 %v612_v38, %s1201_s12  ;;  %v1100_v39 = vpop.f32.mrb[9].mxu0 }
 0x460   : > { %v615_v40 = vpop.f32.mrb[10].mxu0 }
 0x461   : > { %v1101_v41 = vpop.f32.mrb[11].mxu0 }
 0x483   : > { %v724_v44 = vpop.f32.mrb[12].mxu0 }
 0x484   : > { %847 = vrot.lane.b32.xlu0 %v724_v44, %s1202_s17  ;;  %v1112_v45 = vpop.f32.mrb[13].mxu0 }
 0x485   : > { %v727_v46 = vpop.f32.mrb[14].mxu0 }
 0x486   : > { %v1113_v47 = vpop.f32.mrb[15].mxu0 }
 0x48b   : > { %v836_v48 = vpop.f32.mrb[16].mxu0 }
 0x48c   : > { %851 = vrot.lane.b32.xlu1 %v836_v48, %s1203_s18  ;;  %v1124_v49 = vpop.f32.mrb[17].mxu0 }
 0x48d   : > { %v839_v50 = vpop.f32.mrb[18].mxu0 }
 0x48e   : > { %v1125_v51 = vpop.f32.mrb[19].mxu0 }
 0x4d1   : > { %v844_v52 = vpop.permute.xlu1 %843 }
 0x4d2   : > { %v854_v53 = vsel %vm390_vm2, %v500_v34, %v844_v52 }
 0x4f6   : > { %v848_v1 = vpop.permute.xlu0 %847 }
 0x4f7   : > { %v856_v54 = vsel %vm855_vm4, %v854_v53, %v848_v1 }
 0x4fe   : > { %v852_v55 = vpop.permute.xlu1 %851 }
 0x4ff   : > { %v858_v56 = vsel %vm857_vm5, %v856_v54, %v852_v55 }
 0x500   : > { %v859_v57 = vpack.c.bf16 %v858_v56, %v858_v56 }
 0x502   : > { %1131 = vmatmul.mubr.msk.bf16.vlgmr.msra.gmra.mrb[16].mxu1 %vm341_vm1, %v859_v57 }
 0x5d5   : > { %v920_v59 = vpop.f32.mrb[16].mxu1 }
 0x5d6   : > { %v921_v60 = vadd.f32 %v1040_v58, %v920_v59  ;;  %v1132_v61 = vpop.f32.mrb[17].mxu1 }
 0x5d7   : > { %v923_v62 = vpop.f32.mrb[18].mxu1 }
 0x5d8   : > { %v1133_v63 = vpop.f32.mrb[19].mxu1  ;;  %v928_v0 = vadd.f32 %v921_v60, %v1279_v3  ;;  %v1044_v3 = vld [vmem:[%s1388_s6] ss:$0 sm:$0xff] }
 0x5da   : > { %v929_v2 = vsel %vm341_vm1, %v928_v0, 0.0 }
 0x5db   : > { %930 = vadd.xlane.f32.xlu0 %v929_v2 }
 0x668   : > { %v931_v4 = vpop.xlane.xlu0 %930 }
 0x669   : > { %v933_v5 = vmul.f32 0.03125, %v931_v4 }
 0x66b   : > { %v934_v6 = vsub.f32 %v928_v0, %v933_v5 }
 0x66d   : > { %v935_v7 = vmul.f32 %v934_v6, %v934_v6 }
 0x66f   : > { %v936_v8 = vsel %vm341_vm1, %v935_v7, 0.0 }
 0x670   : > { %937 = vadd.xlane.f32.xlu1 %v936_v8 }
 0x6fd   : > { %v938_v9 = vpop.xlane.xlu1 %937 }
 0x6fe   : > { %v939_v11 = vmul.f32 0.03125, %v938_v9 }
 0x700   : > { %v940_v12 = vadd.f32 1e-05, %v939_v11 }
 0x702   : > { %1178 = vrsqrt.f32 %v940_v12 }
 0x70c   : > { %v1179_v13 = vpop.eup %1178 }
 0x70d   : > { %v942_v14 = vmul.f32 %v1179_v13, %v934_v6 }
 0x70f   : > { %v949_v16 = vmul.f32 %v1044_v3, %v942_v14 }
 0x711   : > { %v956_v17 = vadd.f32 %v1045_v15, %v949_v16 }
 0x713   : > { %957 = vst.msk [vmem:[%s314_s29] sm:$0xff] %vm341_vm1, %v956_v17 }
 0x714 PF: > { %s18_s27 = sadd.s32 1, %s1186_s27  }
 0x715   : > { %p15_p4 = scmp.ge.s32.totalorder %s18_s27, 4  }
 0x717   :  { %17 = sbr.rel (!%p15_p4) target bundleno = 1 (0x1), region = 85 }

// kernel: transformer_forward.15
= control target key start
LH: loop header
LB: loop body
LE: loop exit
PB: predicated region body
PF: predicated region fallthrough
CT: control target
= control target key end

     0   :  { %s1249_s27 = smov 0   ;;  %s1379_s0 = inlined_call_operand.vmem [shape: f32[2,8,32], index: 0, kind: input, shape index: {}]   ;;  %s1380_s1 = inlined_call_operand.vmem [shape: f32[2,8,8], index: 1, kind: input, shape index: {}]   ;;  %s1381_s2 = inlined_call_operand.vmem [shape: bf16[32,96], index: 2, kind: input, shape index: {}]   ;;  %s1382_s3 = inlined_call_operand.vmem [shape: f32[1,96], index: 3, kind: input, shape index: {}]   ;;  %s1383_s4 = inlined_call_operand.vmem [shape: bf16[32,32], index: 4, kind: input, shape index: {}]   ;;  %s1384_s5 = inlined_call_operand.vmem [shape: f32[1,32], index: 5, kind: input, shape index: {}]   ;;  %s1385_s6 = inlined_call_operand.vmem [shape: f32[1,32], index: 6, kind: input, shape index: {}]   ;;  %s1386_s7 = inlined_call_operand.vmem [shape: f32[1,32], index: 7, kind: input, shape index: {}]   ;;  %s1387_s8 = inlined_call_operand.vmem [shape: f32[2,8,32], index: 8, kind: output, shape index: {}]  }
   0x1 LB: > { %s1020_s28 = sadd.s32 4294967295, %s1186_s27   ;;  %p1024_p0 = scmp.ge.s32.totalorder %s1186_s27, 1  ;;  %s1186_s27 = sphi %s1249_s27, %s18_s27  }
   0x2   : > { %p270_p1 = scmp.lt.s32.totalorder %s1186_s27, 3 }
   0x4   : > { %p271_p2 = pnand %p1024_p0, %p270_p1 }
   0x5   : > { %v1158_v0 = vld [vmem:[%s1381_s2] sm:$0xff] (!%p271_p2)   ;;  %v1188_v1 = vmov (!%p271_p2), 0.0   ;;  %v1159_v2 = vld [vmem:[%s1381_s2 + $0x8] sm:$0xff] (!%p271_p2)   ;;  %vm1189_vm0 = vmmov (!%p271_p2), 0   ;;  %p306_p3 = scmp.lt.s32.totalorder (!%p271_p2), %s1020_s28, 1  ;;  %vm344_vm1 = vcmask (!%p271_p2), 261120  }
   0x6   : > { %274 = sbr.rel (%p271_p2) target bundleno = 1812 (0x714), region = 52  ;;  %1070 = vmatprep.subr.bf16.mxu0 (!%p271_p2), %v1188_v1  ;;  %1078 = vmatprep.subr.bf16.mxu1 (!%p271_p2), %v1188_v1  ;;  %v1028_v5 = vld [vmem:[%s1382_s3] ss:$0 sm:$0xff] (!%p271_p2)  ;;  %s1190_s17 = smov (!%p271_p2), 120   ;;  %vm393_vm2 = vcmask (!%p271_p2), 64512   ;;  %vm459_vm3 = vcmask (!%p271_p2), 1043456  }
   0x7   : > { %1071 = vmatpush3.bf16.msra.mxu0 (!%p271_p2), %v1158_v0  ;;  %1074 = vmatprep.mubr.msk.bf16.mxu0 (!%p271_p2), %vm1189_vm0, %v1188_v1  ;;  %s1191_s18 = smov (!%p271_p2), 96   ;;  %s1192_s19 = smov (!%p271_p2), 80   ;;  %vm852_vm4 = vcmask (!%p271_p2), 130048   ;;  %vm854_vm5 = vcmask (!%p271_p2), 195584  }
   0x8   : > { %1072 = vmatprep.subr.bf16.mxu0 (!%p271_p2), %v1188_v1  ;;  %1080 = vmatprep.mubr.msk.bf16.mxu1 (!%p271_p2), %vm1189_vm0, %v1188_v1  ;;  %s1193_s20 = smov (!%p271_p2), 88   ;;  %s1194_s21 = smov (!%p271_p2), 72  }
   0x9   : > { %s1195_s22 = smov (!%p271_p2), 112   ;;  %s1196_s23 = smov (!%p271_p2), 104  }
   0xa   : > { %s1198_s29 = smov (!%p271_p2), 64   ;;  %s1199_s30 = smov (!%p271_p2), 40  }
   0xb   : > { %1073 = vmatpush3.bf16.msra.mxu0 (!%p271_p2), %v1159_v2  ;;  %s1200_s9 = smov (!%p271_p2), 48   ;;  %s1201_s10 = smov (!%p271_p2), 8  }
   0xc   : > { %1084 = vmatprep.subr.bf16.mxu0 (!%p271_p2), %v1188_v1  ;;  %s1202_s16 = smov (!%p271_p2), 16  }
   0xd   : > { %s1389_s28 = smov (!%p306_p3, %s1020_s28), 1 }
   0xe   : > { %s1270_s11 = sshll.u32 %s1389_s28, 3  ;;  %s1197_s28 = smov 56  }
   0xf   : > { %s309_s14 = scalar_lea.vmem %s1379_s0, %s1270_s11  ;;  %s313_s26 = scalar_lea.vmem %s1380_s1, %s1270_s11 }
  0x10   : > { %v1277_v3 = vld [vmem:[%s309_s14] sm:$0xff] }
  0x11   : > { %v320_v4 = vpack.c.bf16 %v1277_v3, %v1277_v3  ;;  %v388_v24 = vld [vmem:[%s313_s26] sm:$0xff]  ;;  %s317_s26 = scalar_lea.vmem %s1387_s8, %s1270_s11 }
  0x13   : > { %1075 = vmatmul.mubr.msk.bf16.vlgmr.msra.gmra.mrb[0].mxu0 %vm344_vm1, %v320_v4 }
  0x14   : > { %1086 = vmatprep.mubr.msk.bf16.mxu0 %vm1189_vm0, %v1188_v1 }
  0xe6   : > { %v382_v6 = vpop.f32.mrb[0].mxu0 }
  0xe7   : > { %v383_v7 = vadd.f32 %v1028_v5, %v382_v6  ;;  %v1076_v8 = vpop.f32.mrb[1].mxu0 }
  0xe8   : > { %v385_v9 = vpop.f32.mrb[2].mxu0 }
  0xe9   : > { %v1287_v10 = vpack.c.bf16 %v383_v7, %v383_v7  ;;  %v1077_v11 = vpop.f32.mrb[3].mxu0 }
  0xeb   : > { %503 = vrot.lane.b32.xlu1 %v1287_v10, %s1190_s17  ;;  %391 = vrot.lane.b32.xlu0 %v1287_v10, %s1191_s18  ;;  %s1203_s17 = smov 24  }
  0xef   : > { %617 = vrot.lane.b32.xlu1 %v1287_v10, %s1192_s19  ;;  %505 = vrot.lane.b32.xlu0 %v1287_v10, %s1193_s20 }
  0xf3   : > { %729 = vrot.lane.b32.xlu1 %v1287_v10, %s1194_s21  ;;  %615 = vrot.lane.b32.xlu0 %v1287_v10, %s1195_s22 }
  0xf7   : > { %727 = vrot.lane.b32.xlu0 %v1287_v10, %s1196_s23 }
 0x15d   : > { %v392_v12 = vpop.permute.xlu0 %391  ;;  %v504_v15 = vpop.permute.xlu1 %503 }
 0x15e   : > { %v398_v13 = vsel %vm393_vm2, %v392_v12, 0 }
 0x15f   : > { %1079 = vmatpush3.bf16.xpose.msra.mxu1 %v398_v13 }
 0x160   : > { %1090 = vmatprep.subr.bf16.mxu1 %v1188_v1 }
 0x161   : > { %v506_v14 = vpop.permute.xlu0 %505  ;;  %v618_v17 = vpop.permute.xlu1 %617 }
 0x162   : > { %v511_v16 = vsel %vm393_vm2, %v506_v14, 0  ;;  %v623_v18 = vsel %vm393_vm2, %v618_v17, 0 }
 0x165   : > { %v730_v19 = vpop.permute.xlu1 %729  ;;  %v616_v20 = vpop.permute.xlu0 %615 }
 0x166   : > { %1081 = vmatmul.mubr.msk.bf16.vlgmr.msra.gmra.mrb[0].mxu1 %vm393_vm2, %v1287_v10  ;;  %v735_v21 = vsel %vm393_vm2, %v730_v19, 0 }
 0x167   : > { %1091 = vmatpush3.bf16.xpose.msra.mxu1 %v511_v16  ;;  %1092 = vmatprep.mubr.msk.bf16.mxu1 %vm1189_vm0, %v1188_v1 }
 0x168   : > { %1102 = vmatprep.subr.bf16.mxu1 %v1188_v1 }
 0x169   : > { %v728_v22 = vpop.permute.xlu0 %727 }
 0x16e   : > { %1093 = vmatmul.mubr.msk.bf16.vlgmr.msra.gmra.mrb[4].mxu1 %vm393_vm2, %v504_v15 }
 0x16f   : > { %1103 = vmatpush3.bf16.xpose.msra.mxu1 %v623_v18  ;;  %1104 = vmatprep.mubr.msk.bf16.mxu1 %vm1189_vm0, %v1188_v1 }
 0x170   : > { %1114 = vmatprep.subr.bf16.mxu1 %v1188_v1 }
 0x176   : > { %1105 = vmatmul.mubr.msk.bf16.vlgmr.msra.gmra.mrb[8].mxu1 %vm393_vm2, %v616_v20 }
 0x177   : > { %1115 = vmatpush3.bf16.xpose.msra.mxu1 %v735_v21  ;;  %1116 = vmatprep.mubr.msk.bf16.mxu1 %vm1189_vm0, %v1188_v1 }
 0x178   : > { %1126 = vmatprep.subr.bf16.mxu1 %v1188_v1 }
 0x17e   : > { %1117 = vmatmul.mubr.msk.bf16.vlgmr.msra.gmra.mrb[12].mxu1 %vm393_vm2, %v728_v22 }
 0x17f   : > { %1130 = vmatprep.mubr.msk.bf16.mxu1 %vm1189_vm0, %v1188_v1 }
 0x239   : > { %v434_v23 = vpop.f32.mrb[0].mxu1 }
 0x23a   : > { %v440_v25 = vmul.f32 0.35355338, %v434_v23  ;;  %v1082_v26 = vpop.f32.mrb[1].mxu1 }
 0x23b   : > { %v437_v27 = vpop.f32.mrb[2].mxu1 }
 0x23c   : > { %v1083_v28 = vpop.f32.mrb[3].mxu1  ;;  %v441_v29 = vadd.f32 %v440_v25, %v388_v24 }
 0x23e   : > { %v442_v30 = vsel %vm393_vm2, %v441_v29, -inf }
 0x23f   : > { %443 = vmax.xlane.f32.xlu1 %v442_v30 }
 0x241   : > { %v547_v31 = vpop.f32.mrb[4].mxu1 }
 0x242   : > { %v553_v32 = vmul.f32 0.35355338, %v547_v31  ;;  %v1094_v33 = vpop.f32.mrb[5].mxu1 }
 0x243   : > { %v550_v34 = vpop.f32.mrb[6].mxu1 }
 0x244   : > { %v1095_v35 = vpop.f32.mrb[7].mxu1  ;;  %v554_v36 = vadd.f32 %v553_v32, %v388_v24 }
 0x246   : > { %v555_v37 = vsel %vm393_vm2, %v554_v36, -inf }
 0x247   : > { %556 = vmax.xlane.f32.xlu0 %v555_v37 }
 0x249   : > { %v659_v38 = vpop.f32.mrb[8].mxu1 }
 0x24a   : > { %v665_v39 = vmul.f32 0.35355338, %v659_v38  ;;  %v1106_v40 = vpop.f32.mrb[9].mxu1 }
 0x24b   : > { %v662_v41 = vpop.f32.mrb[10].mxu1 }
 0x24c   : > { %v1107_v42 = vpop.f32.mrb[11].mxu1  ;;  %v666_v43 = vadd.f32 %v665_v39, %v388_v24 }
 0x24d   : > { %v1160_v42 = vld [vmem:[%s1383_s4] sm:$0xff]  }
 0x24e   : > { %v667_v44 = vsel %vm393_vm2, %v666_v43, -inf  ;;  %1127 = vmatpush3.bf16.msra.mxu1 %v1160_v42 }
 0x24f   : > { %668 = vmax.xlane.f32.xlu0 %v667_v44  ;;  %1128 = vmatprep.subr.bf16.mxu1 %v1188_v1 }
 0x251   : > { %v771_v45 = vpop.f32.mrb[12].mxu1 }
 0x252   : > { %v777_v46 = vmul.f32 0.35355338, %v771_v45  ;;  %v1118_v47 = vpop.f32.mrb[13].mxu1 }
 0x253   : > { %v774_v48 = vpop.f32.mrb[14].mxu1 }
 0x254   : > { %v1119_v49 = vpop.f32.mrb[15].mxu1  ;;  %v778_v50 = vadd.f32 %v777_v46, %v388_v24 }
 0x256   : > { %v779_v51 = vsel %vm393_vm2, %v778_v50, -inf }
 0x257   : > { %780 = vmax.xlane.f32.xlu1 %v779_v51 }
 0x2cc   : > { %v444_v52 = vpop.xlane.xlu1 %443 }
 0x2cd   : > { %v445_v53 = vsub.f32 %v441_v29, %v444_v52 }
 0x2cf   : > { %v446_v54 = vmul.f32 1.442695, %v445_v53 }
 0x2d1   : > { %1162 = vpow2.f32 %v446_v54 }
 0x2d4   : > { %v557_v55 = vpop.xlane.xlu0 %556 }
 0x2d5   : > { %v558_v56 = vsub.f32 %v554_v36, %v557_v55 }
 0x2d7   : > { %v559_v57 = vmul.f32 1.442695, %v558_v56 }
 0x2d9   : > { %1164 = vpow2.f32 %v559_v57 }
 0x2db   : > { %v1163_v58 = vpop.eup %1162 }
 0x2dc   : > { %v669_v59 = vpop.xlane.xlu0 %668  ;;  %v448_v60 = vsel %vm393_vm2, %v1163_v58, 0.0 }
 0x2dd   : > { %v670_v61 = vsub.f32 %v666_v43, %v669_v59  ;;  %449 = vadd.xlane.f32.xlu0 %v448_v60  ;;  %v1161_v43 = vld [vmem:[%s1383_s4 + $0x8] sm:$0xff]  }
 0x2de   : > { %1129 = vmatpush3.bf16.msra.mxu1 %v1161_v43 }
 0x2df   : > { %v671_v62 = vmul.f32 1.442695, %v670_v61 }
 0x2e1   : > { %1166 = vpow2.f32 %v671_v62 }
 0x2e3   : > { %v1165_v63 = vpop.eup %1164 }
 0x2e4   : > { %v561_v0 = vsel %vm393_vm2, %v1165_v63, 0.0  ;;  %v781_v5 = vpop.xlane.xlu1 %780 }
 0x2e5   : > { %562 = vadd.xlane.f32.xlu1 %v561_v0  ;;  %v782_v6 = vsub.f32 %v778_v50, %v781_v5 }
 0x2e7   : > { %v783_v7 = vmul.f32 1.442695, %v782_v6 }
 0x2e9   : > { %1168 = vpow2.f32 %v783_v7 }
 0x2eb   : > { %v1167_v2 = vpop.eup %1166 }
 0x2ec   : > { %v673_v4 = vsel %vm393_vm2, %v1167_v2, 0.0 }
 0x2ed   : > { %674 = vadd.xlane.f32.xlu0 %v673_v4 }
 0x2f3   : > { %v1169_v8 = vpop.eup %1168 }
 0x2f4   : > { %v785_v9 = vsel %vm393_vm2, %v1169_v8, 0.0 }
 0x2f6   : > { %567 = vrot.lane.b32.xlu1 %v1287_v10, %s1197_s28 }
 0x303   : > { %454 = vrot.lane.b32.xlu0 %v1287_v10, %s1198_s29 }
 0x307   : > { %791 = vrot.lane.b32.xlu0 %v1287_v10, %s1199_s30 }
 0x31a   : > { %786 = vadd.xlane.f32.xlu1 %v785_v9 }
 0x32b   : > { %679 = vrot.lane.b32.xlu1 %v1287_v10, %s1200_s9 }
 0x36a   : > { %v450_v11 = vpop.xlane.xlu0 %449 }
 0x36b   : > { %1170 = vrcp.f32 %v450_v11 }
 0x372   : > { %v563_v12 = vpop.xlane.xlu1 %562 }
 0x373   : > { %1172 = vrcp.f32 %v563_v12 }
 0x375   : > { %v1171_v13 = vpop.eup %1170 }
 0x376   : > { %v452_v15 = vmul.f32 %v1171_v13, %v1163_v58  ;;  %v568_v18 = vpop.permute.xlu1 %567  ;;  %v1040_v58 = vld [vmem:[%s1384_s5] ss:$0 sm:$0xff] }
 0x377   : > { %v573_v21 = vsel %vm459_vm3, %v568_v18, 0 }
 0x378   : > { %v453_v19 = vpack.c.bf16 %v452_v15, %v452_v15  ;;  %v1045_v15 = vld [vmem:[%s1386_s7] ss:$0 sm:$0xff] }
 0x37a   : > { %v675_v14 = vpop.xlane.xlu0 %674 }
 0x37b   : > { %1174 = vrcp.f32 %v675_v14 }
 0x37d   : > { %v1173_v20 = vpop.eup %1172 }
 0x37e   : > { %v455_v16 = vpop.permute.xlu0 %454  ;;  %v565_v10 = vmul.f32 %v1173_v20, %v1165_v63 }
 0x37f   : > { %v461_v17 = vsel %vm459_vm3, %v455_v16, 0 }
 0x380   : > { %1085 = vmatpush3.bf16.msra.mxu0 %v461_v17  ;;  %v566_v22 = vpack.c.bf16 %v565_v10, %v565_v10 }
 0x381   : > { %1096 = vmatprep.subr.bf16.mxu0 %v1188_v1 }
 0x382   : > { %v792_v28 = vpop.permute.xlu0 %791 }
 0x383   : > { %1087 = vmatmul.mubr.msk.bf16.vlgmr.msra.gmra.mrb[4].mxu0 %vm393_vm2, %v453_v19  ;;  %v797_v30 = vsel %vm459_vm3, %v792_v28, 0 }
 0x384   : > { %1097 = vmatpush3.bf16.msra.mxu0 %v573_v21  ;;  %1098 = vmatprep.mubr.msk.bf16.mxu0 %vm1189_vm0, %v1188_v1 }
 0x385   : > { %1108 = vmatprep.subr.bf16.mxu0 %v1188_v1  ;;  %v1175_v23 = vpop.eup %1174 }
 0x386   : > { %v677_v25 = vmul.f32 %v1175_v23, %v1167_v2 }
 0x388   : > { %v678_v29 = vpack.c.bf16 %v677_v25, %v677_v25 }
 0x38b   : > { %1099 = vmatmul.mubr.msk.bf16.vlgmr.msra.gmra.mrb[8].mxu0 %vm393_vm2, %v566_v22 }
 0x38c   : > { %1110 = vmatprep.mubr.msk.bf16.mxu0 %vm1189_vm0, %v1188_v1 }
 0x3a7   : > { %v787_v24 = vpop.xlane.xlu1 %786 }
 0x3a8   : > { %1176 = vrcp.f32 %v787_v24 }
 0x3ab   : > { %v680_v26 = vpop.permute.xlu1 %679 }
 0x3ac   : > { %v685_v27 = vsel %vm459_vm3, %v680_v26, 0 }
 0x3ad   : > { %1109 = vmatpush3.bf16.msra.mxu0 %v685_v27 }
 0x3ae   : > { %1120 = vmatprep.subr.bf16.mxu0 %v1188_v1 }
 0x3b0   : > { %1111 = vmatmul.mubr.msk.bf16.vlgmr.msra.gmra.mrb[12].mxu0 %vm393_vm2, %v678_v29 }
 0x3b1   : > { %1121 = vmatpush3.bf16.msra.mxu0 %v797_v30  ;;  %1122 = vmatprep.mubr.msk.bf16.mxu0 %vm1189_vm0, %v1188_v1 }
 0x3b2   : > { %v1177_v31 = vpop.eup %1176 }
 0x3b3   : > { %v789_v32 = vmul.f32 %v1177_v31, %v1169_v8 }
 0x3b5   : > { %v790_v33 = vpack.c.bf16 %v789_v32, %v789_v32 }
 0x3b8   : > { %1123 = vmatmul.mubr.msk.bf16.vlgmr.msra.gmra.mrb[16].mxu0 %vm393_vm2, %v790_v33 }
 0x456   : > { %v497_v34 = vpop.f32.mrb[4].mxu0 }
 0x457   : > { %v1088_v35 = vpop.f32.mrb[5].mxu0 }
 0x458   : > { %v500_v36 = vpop.f32.mrb[6].mxu0 }
 0x459   : > { %v1089_v37 = vpop.f32.mrb[7].mxu0 }
 0x45e   : > { %v609_v38 = vpop.f32.mrb[8].mxu0 }
 0x45f   : > { %840 = vrot.lane.b32.xlu1 %v609_v38, %s1201_s10  ;;  %v1100_v39 = vpop.f32.mrb[9].mxu0 }
 0x460   : > { %v612_v40 = vpop.f32.mrb[10].mxu0 }
 0x461   : > { %v1101_v41 = vpop.f32.mrb[11].mxu0 }
 0x483   : > { %v721_v44 = vpop.f32.mrb[12].mxu0 }
 0x484   : > { %844 = vrot.lane.b32.xlu0 %v721_v44, %s1202_s16  ;;  %v1112_v45 = vpop.f32.mrb[13].mxu0 }
 0x485   : > { %v724_v46 = vpop.f32.mrb[14].mxu0 }
 0x486   : > { %v1113_v47 = vpop.f32.mrb[15].mxu0 }
 0x48b   : > { %v833_v48 = vpop.f32.mrb[16].mxu0 }
 0x48c   : > { %848 = vrot.lane.b32.xlu1 %v833_v48, %s1203_s17  ;;  %v1124_v49 = vpop.f32.mrb[17].mxu0 }
 0x48d   : > { %v836_v50 = vpop.f32.mrb[18].mxu0 }
 0x48e   : > { %v1125_v51 = vpop.f32.mrb[19].mxu0 }
 0x4d1   : > { %v841_v52 = vpop.permute.xlu1 %840 }
 0x4d2   : > { %v851_v53 = vsel %vm393_vm2, %v497_v34, %v841_v52 }
 0x4f6   : > { %v845_v1 = vpop.permute.xlu0 %844 }
 0x4f7   : > { %v853_v54 = vsel %vm852_vm4, %v851_v53, %v845_v1 }
 0x4fe   : > { %v849_v55 = vpop.permute.xlu1 %848 }
 0x4ff   : > { %v855_v56 = vsel %vm854_vm5, %v853_v54, %v849_v55 }
 0x500   : > { %v856_v57 = vpack.c.bf16 %v855_v56, %v855_v56 }
 0x502   : > { %1131 = vmatmul.mubr.msk.bf16.vlgmr.msra.gmra.mrb[16].mxu1 %vm344_vm1, %v856_v57 }
 0x5d5   : > { %v917_v59 = vpop.f32.mrb[16].mxu1 }
 0x5d6   : > { %v918_v60 = vadd.f32 %v1040_v58, %v917_v59  ;;  %v1132_v61 = vpop.f32.mrb[17].mxu1 }
 0x5d7   : > { %v920_v62 = vpop.f32.mrb[18].mxu1 }
 0x5d8   : > { %v1133_v63 = vpop.f32.mrb[19].mxu1  ;;  %v925_v0 = vadd.f32 %v918_v60, %v1277_v3  ;;  %v1044_v3 = vld [vmem:[%s1385_s6] ss:$0 sm:$0xff] }
 0x5da   : > { %v926_v2 = vsel %vm344_vm1, %v925_v0, 0.0 }
 0x5db   : > { %927 = vadd.xlane.f32.xlu0 %v926_v2 }
 0x668   : > { %v928_v4 = vpop.xlane.xlu0 %927 }
 0x669   : > { %v930_v5 = vmul.f32 0.03125, %v928_v4 }
 0x66b   : > { %v931_v6 = vsub.f32 %v925_v0, %v930_v5 }
 0x66d   : > { %v932_v7 = vmul.f32 %v931_v6, %v931_v6 }
 0x66f   : > { %v933_v8 = vsel %vm344_vm1, %v932_v7, 0.0 }
 0x670   : > { %934 = vadd.xlane.f32.xlu1 %v933_v8 }
 0x6fd   : > { %v935_v9 = vpop.xlane.xlu1 %934 }
 0x6fe   : > { %v936_v11 = vmul.f32 0.03125, %v935_v9 }
 0x700   : > { %v937_v12 = vadd.f32 1e-05, %v936_v11 }
 0x702   : > { %1178 = vrsqrt.f32 %v937_v12 }
 0x70c   : > { %v1179_v13 = vpop.eup %1178 }
 0x70d   : > { %v939_v14 = vmul.f32 %v1179_v13, %v931_v6 }
 0x70f   : > { %v946_v16 = vmul.f32 %v1044_v3, %v939_v14 }
 0x711   : > { %v953_v17 = vadd.f32 %v1045_v15, %v946_v16 }
 0x713   : > { %954 = vst.msk [vmem:[%s317_s26] sm:$0xff] %vm344_vm1, %v953_v17 }
 0x714 PF: > { %s18_s27 = sadd.s32 1, %s1186_s27  }
 0x715   : > { %p15_p4 = scmp.ge.s32.totalorder %s18_s27, 4  }
 0x717   :  { %17 = sbr.rel (!%p15_p4) target bundleno = 1 (0x1), region = 85 }

// kernel: transformer_forward.16
= control target key start
LH: loop header
LB: loop body
LE: loop exit
PB: predicated region body
PF: predicated region fallthrough
CT: control target
= control target key end

     0   :  { %s1452_s17 = smov 0   ;;  %s1599_s0 = inlined_call_operand.vmem [shape: f32[2,8,32], index: 0, kind: input, shape index: {}]   ;;  %s1600_s1 = inlined_call_operand.vmem [shape: f32[2,8,32], index: 1, kind: input, shape index: {}]   ;;  %s1601_s2 = inlined_call_operand.vmem [shape: f32[2,1,8], index: 2, kind: input, shape index: {}]   ;;  %s1602_s3 = inlined_call_operand.vmem [shape: bf16[32,32], index: 3, kind: input, shape index: {}]   ;;  %s1603_s4 = inlined_call_operand.vmem [shape: f32[1,32], index: 4, kind: input, shape index: {}]   ;;  %s1604_s5 = inlined_call_operand.vmem [shape: bf16[32,64], index: 5, kind: input, shape index: {}]   ;;  %s1605_s6 = inlined_call_operand.vmem [shape: f32[1,64], index: 6, kind: input, shape index: {}]   ;;  %s1606_s7 = inlined_call_operand.vmem [shape: bf16[32,32], index: 7, kind: input, shape index: {}]   ;;  %s1607_s8 = inlined_call_operand.vmem [shape: f32[1,32], index: 8, kind: input, shape index: {}]   ;;  %s1608_s9 = inlined_call_operand.vmem [shape: f32[1,32], index: 9, kind: input, shape index: {}]   ;;  %s1609_s10 = inlined_call_operand.vmem [shape: f32[1,32], index: 10, kind: input, shape index: {}]   ;;  %s1610_s11 = inlined_call_operand.vmem [shape: f32[2,8,32], index: 11, kind: output, shape index: {}]  }
   0x1 LB: > { %s1198_s18 = sadd.s32 4294967295, %s1378_s17   ;;  %p1202_p0 = scmp.ge.s32.totalorder %s1378_s17, 1  ;;  %s1378_s17 = sphi %s1452_s17, %s21_s17  }
   0x2   : > { %p353_p1 = scmp.lt.s32.totalorder %s1378_s17, 3 }
   0x4   : > { %p354_p2 = pnand %p1202_p0, %p353_p1 }
   0x5   : > { %v1348_v0 = vld [vmem:[%s1604_s5] sm:$0xff] (!%p354_p2)   ;;  %v1380_v1 = vmov (!%p354_p2), 0.0   ;;  %v1350_v3 = vld [vmem:[%s1604_s5 + $0x8] sm:$0xff] (!%p354_p2)   ;;  %vm1381_vm0 = vmmov (!%p354_p2), 0   ;;  %p398_p3 = scmp.lt.s32.totalorder (!%p354_p2), %s1198_s18, 1  ;;  %vm440_vm1 = vcmask (!%p354_p2), 261120  }
   0x6   : > { %357 = sbr.rel (%p354_p2) target bundleno = 1775 (0x6ef), region = 64  ;;  %1264 = vmatprep.subr.bf16.mxu1 (!%p354_p2), %v1380_v1  ;;  %1256 = vmatprep.subr.bf16.mxu0 (!%p354_p2), %v1380_v1  ;;  %v1349_v2 = vld [vmem:[%s1602_s3] sm:$0xff] (!%p354_p2)   ;;  %v1351_v4 = vld [vmem:[%s1602_s3 + $0x8] sm:$0xff] (!%p354_p2)   ;;  %vm554_vm2 = vcmask (!%p354_p2), 64512   ;;  %s1382_s21 = smov (!%p354_p2), 112   ;;  %vm627_vm3 = vcmask (!%p354_p2), 1043456  }
   0x7   : > { %1265 = vmatpush3.bf16.msra.mxu1 (!%p354_p2), %v1348_v0  ;;  %1268 = vmatprep.mubr.msk.bf16.mxu1 (!%p354_p2), %vm1381_vm0, %v1380_v1  ;;  %v1210_v9 = vld [vmem:[%s1605_s6] ss:$0 sm:$0xff] (!%p354_p2)  ;;  %s1383_s22 = smov (!%p354_p2), 120   ;;  %s1384_s23 = smov (!%p354_p2), 104   ;;  %vm1021_vm4 = vcmask (!%p354_p2), 130048   ;;  %vm1023_vm5 = vcmask (!%p354_p2), 195584  }
   0x8   : > { %1266 = vmatprep.subr.bf16.mxu1 (!%p354_p2), %v1380_v1  ;;  %1257 = vmatpush3.bf16.msra.mxu0 (!%p354_p2), %v1349_v2  ;;  %v1206_v10 = vld [vmem:[%s1603_s4] ss:$0 sm:$0xff] (!%p354_p2)  ;;  %s1386_s28 = smov (!%p354_p2), 80   ;;  %s1387_s29 = smov (!%p354_p2), 72  }
   0x9   : > { %1258 = vmatprep.subr.bf16.mxu0 (!%p354_p2), %v1380_v1  ;;  %1260 = vmatprep.mubr.msk.bf16.mxu0 (!%p354_p2), %vm1381_vm0, %v1380_v1  ;;  %s1390_s19 = smov (!%p354_p2), 16   ;;  %s1391_s20 = smov (!%p354_p2), 24  }
   0xb   : > { %1267 = vmatpush3.bf16.msra.mxu1 (!%p354_p2), %v1350_v3 }
   0xc   : > { %1259 = vmatpush3.bf16.msra.mxu0 (!%p354_p2), %v1351_v4  ;;  %1278 = vmatprep.subr.bf16.mxu1 (!%p354_p2), %v1380_v1 }
   0xd   : > { %s1612_s18 = smov (!%p398_p3, %s1198_s18), 1  ;;  %1272 = vmatprep.subr.bf16.mxu0 %v1380_v1 }
   0xe   : > { %s1483_s27 = sshll.u32 %s1612_s18, 3  ;;  %s408_s26 = scalar_lea.vmem %s1601_s2, %s1612_s18 }
   0xf   : > { %s405_s30 = scalar_lea.vmem %s1600_s1, %s1483_s27  ;;  %s401_s14 = scalar_lea.vmem %s1599_s0, %s1483_s27  ;;  %v1215_v34 = vld [vmem:[%s408_s26] ss:$0 sm:$0xff] }
  0x10   : > { %v415_v5 = vld [vmem:[%s405_s30] sm:$0xff]  ;;  %s1385_s18 = smov 96   ;;  %s1388_s30 = smov 88  }
  0x11   : > { %v484_v6 = vpack.c.bf16 %v415_v5, %v415_v5  ;;  %v1495_v7 = vld [vmem:[%s401_s14] sm:$0xff]  ;;  %s1389_s14 = smov 8  }
  0x12   : > { %v416_v8 = vpack.c.bf16 %v1495_v7, %v1495_v7 }
  0x13   : > { %1269 = vmatmul.mubr.msk.bf16.vlgmr.msra.gmra.mrb[0].mxu1 %vm440_vm1, %v484_v6 }
  0x14   : > { %1261 = vmatmul.mubr.msk.bf16.vlgmr.msra.gmra.mrb[0].mxu0 %vm440_vm1, %v416_v8  ;;  %1280 = vmatprep.mubr.msk.bf16.mxu1 %vm1381_vm0, %v1380_v1 }
  0x15   : > { %1274 = vmatprep.mubr.msk.bf16.mxu0 %vm1381_vm0, %v1380_v1 }
  0xe6   : > { %v545_v11 = vpop.f32.mrb[0].mxu1 }
  0xe7   : > { %v546_v12 = vadd.f32 %v1210_v9, %v545_v11  ;;  %v1270_v13 = vpop.f32.mrb[1].mxu1  ;;  %v478_v14 = vpop.f32.mrb[0].mxu0 }
  0xe8   : > { %v548_v15 = vpop.f32.mrb[2].mxu1  ;;  %v479_v16 = vadd.f32 %v1206_v10, %v478_v14  ;;  %v1262_v17 = vpop.f32.mrb[1].mxu0 }
  0xe9   : > { %v1511_v18 = vpack.c.bf16 %v546_v12, %v546_v12  ;;  %v1271_v19 = vpop.f32.mrb[3].mxu1  ;;  %v481_v20 = vpop.f32.mrb[2].mxu0 }
  0xea   : > { %v1263_v21 = vpop.f32.mrb[3].mxu0  ;;  %v552_v22 = vpack.c.bf16 %v479_v16, %v479_v16 }
  0xeb   : > { %786 = vrot.lane.b32.xlu1 %v1511_v18, %s1382_s21  ;;  %674 = vrot.lane.b32.xlu0 %v1511_v18, %s1383_s22  ;;  %v559_v23 = vsel %vm554_vm2, %v1511_v18, 0 }
  0xec   : > { %1273 = vmatpush3.bf16.xpose.msra.mxu0 %v559_v23 }
  0xed   : > { %1284 = vmatprep.subr.bf16.mxu0 %v1380_v1 }
  0xef   : > { %784 = vrot.lane.b32.xlu1 %v552_v22, %s1382_s21  ;;  %672 = vrot.lane.b32.xlu0 %v552_v22, %s1383_s22 }
  0xf3   : > { %896 = vrot.lane.b32.xlu1 %v552_v22, %s1384_s23  ;;  %898 = vrot.lane.b32.xlu0 %v1511_v18, %s1384_s23 }
  0xf4   : > { %1275 = vmatmul.mubr.msk.bf16.vlgmr.msra.gmra.mrb[4].mxu0 %vm554_vm2, %v552_v22 }
  0xf5   : > { %1286 = vmatprep.mubr.msk.bf16.mxu0 %vm1381_vm0, %v1380_v1 }
 0x15d   : > { %v675_v24 = vpop.permute.xlu0 %674  ;;  %v787_v26 = vpop.permute.xlu1 %786 }
 0x15e   : > { %v680_v25 = vsel %vm554_vm2, %v675_v24, 0  ;;  %v792_v28 = vsel %vm554_vm2, %v787_v26, 0 }
 0x15f   : > { %1285 = vmatpush3.bf16.xpose.msra.mxu0 %v680_v25 }
 0x160   : > { %1296 = vmatprep.subr.bf16.mxu0 %v1380_v1 }
 0x161   : > { %v673_v27 = vpop.permute.xlu0 %672  ;;  %v785_v30 = vpop.permute.xlu1 %784 }
 0x165   : > { %v899_v29 = vpop.permute.xlu0 %898  ;;  %v897_v32 = vpop.permute.xlu1 %896 }
 0x166   : > { %1287 = vmatmul.mubr.msk.bf16.vlgmr.msra.gmra.mrb[8].mxu0 %vm554_vm2, %v673_v27  ;;  %v904_v31 = vsel %vm554_vm2, %v899_v29, 0 }
 0x167   : > { %1297 = vmatpush3.bf16.xpose.msra.mxu0 %v792_v28  ;;  %1298 = vmatprep.mubr.msk.bf16.mxu0 %vm1381_vm0, %v1380_v1 }
 0x168   : > { %1308 = vmatprep.subr.bf16.mxu0 %v1380_v1 }
 0x16e   : > { %1299 = vmatmul.mubr.msk.bf16.vlgmr.msra.gmra.mrb[12].mxu0 %vm554_vm2, %v785_v30 }
 0x16f   : > { %1309 = vmatpush3.bf16.xpose.msra.mxu0 %v904_v31  ;;  %1310 = vmatprep.mubr.msk.bf16.mxu0 %vm1381_vm0, %v1380_v1 }
 0x170   : > { %1320 = vmatprep.subr.bf16.mxu0 %v1380_v1 }
 0x176   : > { %1311 = vmatmul.mubr.msk.bf16.vlgmr.msra.gmra.mrb[16].mxu0 %vm554_vm2, %v897_v32 }
 0x177   : > { %1324 = vmatprep.mubr.msk.bf16.mxu0 %vm1381_vm0, %v1380_v1 }
 0x1c7   : > { %v595_v33 = vpop.f32.mrb[4].mxu0 }
 0x1c8   : > { %v601_v35 = vmul.f32 0.35355338, %v595_v33  ;;  %v1276_v36 = vpop.f32.mrb[5].mxu0 }
 0x1c9   : > { %v598_v37 = vpop.f32.mrb[6].mxu0 }
 0x1ca   : > { %v1277_v38 = vpop.f32.mrb[7].mxu0  ;;  %v608_v39 = vadd.f32 %v1215_v34, %v601_v35 }
 0x1cc   : > { %v609_v40 = vsel %vm554_vm2, %v608_v39, -inf }
 0x1cd   : > { %610 = vmax.xlane.f32.xlu0 %v609_v40 }
 0x239   : > { %v716_v41 = vpop.f32.mrb[8].mxu0 }
 0x23a   : > { %v722_v42 = vmul.f32 0.35355338, %v716_v41  ;;  %v1288_v43 = vpop.f32.mrb[9].mxu0 }
 0x23b   : > { %v719_v44 = vpop.f32.mrb[10].mxu0 }
 0x23c   : > { %v1289_v45 = vpop.f32.mrb[11].mxu0  ;;  %v723_v46 = vadd.f32 %v1215_v34, %v722_v42 }
 0x23e   : > { %v724_v47 = vsel %vm554_vm2, %v723_v46, -inf }
 0x23f   : > { %725 = vmax.xlane.f32.xlu1 %v724_v47 }
 0x241   : > { %v828_v48 = vpop.f32.mrb[12].mxu0 }
 0x242   : > { %v834_v49 = vmul.f32 0.35355338, %v828_v48  ;;  %v1300_v50 = vpop.f32.mrb[13].mxu0  ;;  %v1352_v48 = vld [vmem:[%s1606_s7] sm:$0xff]  }
 0x243   : > { %v831_v51 = vpop.f32.mrb[14].mxu0  ;;  %1321 = vmatpush3.bf16.msra.mxu0 %v1352_v48 }
 0x244   : > { %v1301_v52 = vpop.f32.mrb[15].mxu0  ;;  %v835_v53 = vadd.f32 %v1215_v34, %v834_v49  ;;  %1322 = vmatprep.subr.bf16.mxu0 %v1380_v1 }
 0x246   : > { %v836_v54 = vsel %vm554_vm2, %v835_v53, -inf }
 0x247   : > { %837 = vmax.xlane.f32.xlu0 %v836_v54 }
 0x249   : > { %v940_v55 = vpop.f32.mrb[16].mxu0 }
 0x24a   : > { %v946_v56 = vmul.f32 0.35355338, %v940_v55  ;;  %v1312_v57 = vpop.f32.mrb[17].mxu0 }
 0x24b   : > { %v943_v58 = vpop.f32.mrb[18].mxu0 }
 0x24c   : > { %v1313_v59 = vpop.f32.mrb[19].mxu0  ;;  %v947_v60 = vadd.f32 %v1215_v34, %v946_v56 }
 0x24e   : > { %v948_v61 = vsel %vm554_vm2, %v947_v60, -inf }
 0x24f   : > { %949 = vmax.xlane.f32.xlu0 %v948_v61 }
 0x25a   : > { %v611_v62 = vpop.xlane.xlu0 %610 }
 0x25b   : > { %v612_v63 = vsub.f32 %v608_v39, %v611_v62 }
 0x25d   : > { %v613_v0 = vmul.f32 1.442695, %v612_v63 }
 0x25f   : > { %1354 = vpow2.f32 %v613_v0 }
 0x269   : > { %v1355_v2 = vpop.eup %1354 }
 0x26a   : > { %v615_v3 = vsel %vm554_vm2, %v1355_v2, 0.0 }
 0x26b   : > { %616 = vadd.xlane.f32.xlu1 %v615_v3 }
 0x27c   : > { %622 = vrot.lane.b32.xlu1 %v1511_v18, %s1385_s18 }
 0x2cc   : > { %v726_v4 = vpop.xlane.xlu1 %725 }
 0x2cd   : > { %v727_v5 = vsub.f32 %v723_v46, %v726_v4 }
 0x2cf   : > { %v728_v6 = vmul.f32 1.442695, %v727_v5  ;;  %v1223_v5 = vld [vmem:[%s1607_s8] ss:$0 sm:$0xff] }
 0x2d1   : > { %1356 = vpow2.f32 %v728_v6 }
 0x2d4   : > { %v838_v8 = vpop.xlane.xlu0 %837 }
 0x2d5   : > { %v839_v9 = vsub.f32 %v835_v53, %v838_v8  ;;  %v1353_v53 = vld [vmem:[%s1606_s7 + $0x8] sm:$0xff]  }
 0x2d6   : > { %1323 = vmatpush3.bf16.msra.mxu0 %v1353_v53 }
 0x2d7   : > { %v840_v10 = vmul.f32 1.442695, %v839_v9 }
 0x2d9   : > { %1358 = vpow2.f32 %v840_v10 }
 0x2db   : > { %v1357_v11 = vpop.eup %1356 }
 0x2dc   : > { %v950_v12 = vpop.xlane.xlu0 %949  ;;  %v730_v13 = vsel %vm554_vm2, %v1357_v11, 0.0 }
 0x2dd   : > { %v951_v14 = vsub.f32 %v947_v60, %v950_v12  ;;  %731 = vadd.xlane.f32.xlu0 %v730_v13 }
 0x2df   : > { %v952_v15 = vmul.f32 1.442695, %v951_v14 }
 0x2e1   : > { %1360 = vpow2.f32 %v952_v15 }
 0x2e3   : > { %v1359_v16 = vpop.eup %1358 }
 0x2e4   : > { %v842_v17 = vsel %vm554_vm2, %v1359_v16, 0.0 }
 0x2e5   : > { %843 = vadd.xlane.f32.xlu1 %v842_v17 }
 0x2eb   : > { %v1361_v19 = vpop.eup %1360 }
 0x2ec   : > { %v954_v20 = vsel %vm554_vm2, %v1361_v19, 0.0 }
 0x2ed   : > { %955 = vadd.xlane.f32.xlu0 %v954_v20 }
 0x2f6   : > { %848 = vrot.lane.b32.xlu1 %v1511_v18, %s1386_s28 }
 0x2f8   : > { %v617_v21 = vpop.xlane.xlu1 %616 }
 0x2f9   : > { %1362 = vrcp.f32 %v617_v21 }
 0x2fa   : > { %960 = vrot.lane.b32.xlu1 %v1511_v18, %s1387_s29  ;;  %s412_s29 = scalar_lea.vmem %s1610_s11, %s1483_s27 }
 0x2fc   : > { %v623_v22 = vpop.permute.xlu1 %622 }
 0x2fd   : > { %v629_v23 = vsel %vm627_vm3, %v623_v22, 0 }
 0x2fe   : > { %1279 = vmatpush3.bf16.msra.mxu1 %v629_v23 }
 0x2ff   : > { %1290 = vmatprep.subr.bf16.mxu1 %v1380_v1 }
 0x303   : > { %v1363_v24 = vpop.eup %1362  ;;  %736 = vrot.lane.b32.xlu0 %v1511_v18, %s1388_s30 }
 0x304   : > { %v619_v25 = vmul.f32 %v1363_v24, %v1355_v2 }
 0x306   : > { %v620_v26 = vpack.c.bf16 %v619_v25, %v619_v25  ;;  %v1228_v25 = vld [vmem:[%s1609_s10] ss:$0 sm:$0xff] }
 0x308   : > { %1281 = vmatmul.mubr.msk.bf16.vlgmr.msra.gmra.mrb[4].mxu1 %vm554_vm2, %v620_v26 }
 0x309   : > { %1292 = vmatprep.mubr.msk.bf16.mxu1 %vm1381_vm0, %v1380_v1 }
 0x36a   : > { %v732_v27 = vpop.xlane.xlu0 %731 }
 0x36b   : > { %1364 = vrcp.f32 %v732_v27 }
 0x372   : > { %v844_v28 = vpop.xlane.xlu1 %843 }
 0x373   : > { %1366 = vrcp.f32 %v844_v28 }
 0x375   : > { %v1365_v29 = vpop.eup %1364 }
 0x376   : > { %v734_v31 = vmul.f32 %v1365_v29, %v1357_v11  ;;  %v849_v34 = vpop.permute.xlu1 %848 }
 0x377   : > { %v854_v36 = vsel %vm627_vm3, %v849_v34, 0 }
 0x378   : > { %v735_v18 = vpack.c.bf16 %v734_v31, %v734_v31 }
 0x37a   : > { %v956_v30 = vpop.xlane.xlu0 %955  ;;  %v961_v38 = vpop.permute.xlu1 %960 }
 0x37b   : > { %1368 = vrcp.f32 %v956_v30  ;;  %v966_v41 = vsel %vm627_vm3, %v961_v38, 0 }
 0x37d   : > { %v1367_v35 = vpop.eup %1366 }
 0x37e   : > { %v737_v32 = vpop.permute.xlu0 %736  ;;  %v846_v37 = vmul.f32 %v1367_v35, %v1359_v16 }
 0x37f   : > { %v742_v33 = vsel %vm627_vm3, %v737_v32, 0 }
 0x380   : > { %1291 = vmatpush3.bf16.msra.mxu1 %v742_v33  ;;  %v847_v39 = vpack.c.bf16 %v846_v37, %v846_v37 }
 0x381   : > { %1302 = vmatprep.subr.bf16.mxu1 %v1380_v1 }
 0x383   : > { %1293 = vmatmul.mubr.msk.bf16.vlgmr.msra.gmra.mrb[8].mxu1 %vm554_vm2, %v735_v18 }
 0x384   : > { %1303 = vmatpush3.bf16.msra.mxu1 %v854_v36  ;;  %1304 = vmatprep.mubr.msk.bf16.mxu1 %vm1381_vm0, %v1380_v1 }
 0x385   : > { %1314 = vmatprep.subr.bf16.mxu1 %v1380_v1  ;;  %v1369_v40 = vpop.eup %1368 }
 0x386   : > { %v958_v42 = vmul.f32 %v1369_v40, %v1361_v19 }
 0x388   : > { %v959_v43 = vpack.c.bf16 %v958_v42, %v958_v42 }
 0x38b   : > { %1305 = vmatmul.mubr.msk.bf16.vlgmr.msra.gmra.mrb[12].mxu1 %vm554_vm2, %v847_v39 }
 0x38c   : > { %1315 = vmatpush3.bf16.msra.mxu1 %v966_v41  ;;  %1316 = vmatprep.mubr.msk.bf16.mxu1 %vm1381_vm0, %v1380_v1 }
 0x393   : > { %1317 = vmatmul.mubr.msk.bf16.vlgmr.msra.gmra.mrb[16].mxu1 %vm554_vm2, %v959_v43 }
 0x3db   : > { %v665_v44 = vpop.f32.mrb[4].mxu1 }
 0x3dc   : > { %v1282_v45 = vpop.f32.mrb[5].mxu1 }
 0x3dd   : > { %v668_v46 = vpop.f32.mrb[6].mxu1 }
 0x3de   : > { %v1283_v47 = vpop.f32.mrb[7].mxu1 }
 0x456   : > { %v778_v49 = vpop.f32.mrb[8].mxu1 }
 0x457   : > { %1009 = vrot.lane.b32.xlu0 %v778_v49, %s1389_s14  ;;  %v1294_v50 = vpop.f32.mrb[9].mxu1 }
 0x458   : > { %v781_v51 = vpop.f32.mrb[10].mxu1 }
 0x459   : > { %v1295_v52 = vpop.f32.mrb[11].mxu1 }
 0x45e   : > { %v890_v54 = vpop.f32.mrb[12].mxu1 }
 0x45f   : > { %1013 = vrot.lane.b32.xlu1 %v890_v54, %s1390_s19  ;;  %v1306_v55 = vpop.f32.mrb[13].mxu1 }
 0x460   : > { %v893_v56 = vpop.f32.mrb[14].mxu1 }
 0x461   : > { %v1307_v57 = vpop.f32.mrb[15].mxu1 }
 0x466   : > { %v1002_v58 = vpop.f32.mrb[16].mxu1 }
 0x467   : > { %1017 = vrot.lane.b32.xlu0 %v1002_v58, %s1391_s20  ;;  %v1318_v1 = vpop.f32.mrb[17].mxu1 }
 0x468   : > { %v1005_v59 = vpop.f32.mrb[18].mxu1 }
 0x469   : > { %v1319_v60 = vpop.f32.mrb[19].mxu1 }
 0x4c9   : > { %v1010_v61 = vpop.permute.xlu0 %1009 }
 0x4ca   : > { %v1020_v63 = vsel %vm554_vm2, %v665_v44, %v1010_v61 }
 0x4d1   : > { %v1014_v62 = vpop.permute.xlu1 %1013 }
 0x4d2   : > { %v1022_v0 = vsel %vm1021_vm4, %v1020_v63, %v1014_v62 }
 0x4d9   : > { %v1018_v2 = vpop.permute.xlu0 %1017 }
 0x4da   : > { %v1024_v3 = vsel %vm1023_vm5, %v1022_v0, %v1018_v2 }
 0x4db   : > { %v1025_v4 = vpack.c.bf16 %v1024_v3, %v1024_v3 }
 0x4dd   : > { %1325 = vmatmul.mubr.msk.bf16.vlgmr.msra.gmra.mrb[20].mxu0 %vm440_vm1, %v1025_v4 }
 0x5b0   : > { %v1086_v6 = vpop.f32.mrb[20].mxu0 }
 0x5b1   : > { %v1087_v8 = vadd.f32 %v1223_v5, %v1086_v6  ;;  %v1326_v9 = vpop.f32.mrb[21].mxu0 }
 0x5b2   : > { %v1089_v10 = vpop.f32.mrb[22].mxu0 }
 0x5b3   : > { %v1327_v11 = vpop.f32.mrb[23].mxu0  ;;  %v1094_v12 = vadd.f32 %v1087_v8, %v1495_v7  ;;  %v1227_v7 = vld [vmem:[%s1608_s9] ss:$0 sm:$0xff] }
 0x5b5   : > { %v1095_v13 = vsel %vm440_vm1, %v1094_v12, 0.0 }
 0x5b6   : > { %1096 = vadd.xlane.f32.xlu1 %v1095_v13 }
 0x643   : > { %v1097_v14 = vpop.xlane.xlu1 %1096 }
 0x644   : > { %v1099_v15 = vmul.f32 0.03125, %v1097_v14 }
 0x646   : > { %v1100_v16 = vsub.f32 %v1094_v12, %v1099_v15 }
 0x648   : > { %v1101_v17 = vmul.f32 %v1100_v16, %v1100_v16 }
 0x64a   : > { %v1102_v19 = vsel %vm440_vm1, %v1101_v17, 0.0 }
 0x64b   : > { %1103 = vadd.xlane.f32.xlu0 %v1102_v19 }
 0x6d8   : > { %v1104_v20 = vpop.xlane.xlu0 %1103 }
 0x6d9   : > { %v1105_v21 = vmul.f32 0.03125, %v1104_v20 }
 0x6db   : > { %v1106_v22 = vadd.f32 1e-05, %v1105_v21 }
 0x6dd   : > { %1370 = vrsqrt.f32 %v1106_v22 }
 0x6e7   : > { %v1371_v23 = vpop.eup %1370 }
 0x6e8   : > { %v1108_v24 = vmul.f32 %v1371_v23, %v1100_v16 }
 0x6ea   : > { %v1115_v26 = vmul.f32 %v1227_v7, %v1108_v24 }
 0x6ec   : > { %v1122_v27 = vadd.f32 %v1228_v25, %v1115_v26 }
 0x6ee   : > { %1123 = vst.msk [vmem:[%s412_s29] sm:$0xff] %vm440_vm1, %v1122_v27 }
 0x6ef PF: > { %s21_s17 = sadd.s32 1, %s1378_s17  }
 0x6f0   : > { %p18_p4 = scmp.ge.s32.totalorder %s21_s17, 4  }
 0x6f2   :  { %20 = sbr.rel (!%p18_p4) target bundleno = 1 (0x1), region = 100 }

// kernel: transformer_forward.21
= control target key start
LH: loop header
LB: loop body
LE: loop exit
PB: predicated region body
PF: predicated region fallthrough
CT: control target
= control target key end

     0   :  { %8 = vsyncpa [#allocation3], 0  ;;  %s575_s0 = inlined_call_operand.vmem [shape: f32[16,32], index: 0, kind: input, shape index: {}]   ;;  %s576_s1 = inlined_call_operand.vmem [shape: bf16[32,16], index: 1, kind: input, shape index: {}]   ;;  %s577_s2 = inlined_call_operand.vmem [shape: f32[1,16], index: 2, kind: input, shape index: {}]   ;;  %s578_s3 = inlined_call_operand.hbm [shape: f32[16,16], index: 3, kind: output, shape index: {}]  }
   0x1   :  { %10 = vsyncpa [#allocation3 + $0x1], 0  ;;  %s466_s12 = smov 0   ;;  %s468_s13 = smov 0  }
   0x2   :  { %s470_s14 = smov 0   ;;  %s472_s15 = smov 0  }
   0x3 LB: > { %s487_s16 = sadd.s32 4294967295, %s441_s15   ;;  %s311_s17 = sadd.s32 4294967294, %s441_s15   ;;  %s441_s15 = sphi %s472_s15, %s584_s15   ;;  %s437_s14 = sphi %s470_s14, %s583_s14   ;;  %s433_s13 = sphi %s468_s13, %s582_s13   ;;  %s429_s12 = sphi %s466_s12, %s581_s12  }
   0x4   : > { %s491_s18 = sadd.s32 1, %s441_s15   ;;  %s91_s19 = sadd.s32 1, %s437_s14 }
   0x5   : > { %s88_s20 = ssub.s32 %s441_s15, %s491_s18  ;;  %p101_p0 = scmp.ne.s32.totalorder %s437_s14, %s433_s13 }
   0x6   : > { %p89_p1 = scmp.eq.s32.totalorder %s88_s20, 0  ;;  %p102_p2 = scmp.eq.s32.totalorder %s487_s16, 1 }
   0x7   : > { %p107_p3 = scmp.ne.s32.totalorder %s433_s13, %s429_s12  ;;  %p108_p4 = scmp.eq.s32.totalorder %s311_s17, 1 }
   0x8   : > { %s502_s21 = scalar_select %p89_p1, %s437_s14, %s91_s19  }
   0x9   : > { %p504_p5 = por %p102_p2, %p101_p0  ;;  %p508_p6 = por %p108_p4, %p107_p3 }
   0xa   : > { %p314_p7 = scmp.ge.s32.totalorder %s441_s15, 1  ;;  %p139_p8 = scmp.lt.s32.totalorder %s441_s15, 3 }
   0xc   : > { %p140_p9 = pnand %p314_p7, %p139_p8 }
   0xd   : > { %v377_v0 = vld [vmem:[%s576_s1] sm:$0xff] (!%p140_p9)   ;;  %v443_v1 = vmov (!%p140_p9), 0.0   ;;  %v378_v2 = vld [vmem:[%s576_s1 + $0x8] sm:$0xff] (!%p140_p9)   ;;  %vm444_vm0 = vmmov (!%p140_p9), 0   ;;  %p162_p10 = scmp.lt.s32.totalorder (!%p140_p9), %s487_s16, 1  ;;  %vm192_vm1 = vcmask (!%p140_p9), 261120  }
   0xe   : > { %143 = sbr.rel (%p140_p9) target bundleno = 256 (0x100), region = 32  ;;  %328 = vmatprep.subr.bf16.mxu0 (!%p140_p9), %v443_v1  ;;  %332 = vmatprep.mubr.msk.bf16.mxu0 (!%p140_p9), %vm444_vm0, %v443_v1  ;;  %s159_s6 = sand.u32 (!%p140_p9), 1, %s433_s13   ;;  %v317_v5 = vld [vmem:[%s577_s2] ss:$0 sm:$0xff] (!%p140_p9)  ;;  %vm236_vm2 = vcmask (!%p140_p9), 130048  }
   0xf   : > { %329 = vmatpush3.bf16.msra.mxu0 (!%p140_p9), %v377_v0  ;;  %s315_s7 = sshll.u32 (!%p140_p9), %s159_s6, 3  ;;  %s322_s10 = sshll.u32 (!%p140_p9), %s487_s16, 7 }
  0x10   : > { %330 = vmatprep.subr.bf16.mxu0 (!%p140_p9), %v443_v1  ;;  %s161_s11 = scalar_lea.vmem (!%p140_p9), [#allocation2], %s315_s7  ;;  %s533_s24 = scalar_lea.hbm (!%p140_p9), %s578_s3, %s322_s10 }
  0x11   : > { %s252_s17 = sshll.u32 (!%p140_p9), %s161_s11, 4  ;;  %s445_s26 = smov (!%p140_p9), [#allocation2]   ;;  %s535_s17 = int_to_ptr.vmem [resolvable:$true] %s252_s17 }
  0x12   : > { %s379_s25 = scalar_lea.vmem (!%p140_p9), %s535_s17, 128  ;;  %s383_s27 = sshll.u32 (!%p140_p9), %s445_s26, 4  ;;  %s384_s27 = int_to_ptr.vmem [resolvable:$false] %s383_s27 }
  0x13   : > { %331 = vmatpush3.bf16.msra.mxu0 (!%p140_p9), %v378_v2  ;;  %p380_p11 = scmp.ne.s32.totalorder (!%p140_p9), %s535_s17, %s379_s25  ;;  %p386_p0 = scmp.lt.s32.totalorder (!%p140_p9), %s535_s17, %s384_s27 }
  0x15   : > { %s163_s28 = scalar_select %p162_p10, %s487_s16, 1 }
  0x16   : > { %s239_s16 = scalar_lea.sflag [#allocation3], %s159_s6  ;;  %p381_p12 = pnand %p380_p11, %p504_p5 }
  0x17   : > { %s316_s29 = sshll.u32 %s163_s28, 3  ;;  %s385_s28 = scalar_lea.vmem %s384_s27, 256 }
  0x18   : > { %s165_s5 = scalar_lea.vmem %s575_s0, %s316_s29  ;;  %p382_p13 = pneg %p381_p12 }
  0x19   : > { %v167_v3 = vld [vmem:[%s165_s5] sm:$0xff]  ;;  %p387_p1 = scmp.lt.s32.totalorder %s385_s28, %s379_s25 }
  0x1a   : > { %v168_v4 = vpack.c.bf16 %v167_v3, %v167_v3 }
  0x1b   : > { %p388_p2 = por %p387_p1, %p386_p0 }
  0x1c   : > { %333 = vmatmul.mubr.msk.bf16.vlgmr.msra.gmra.mrb[0].mxu0 %vm192_vm1, %v168_v4 }
  0x1d   : > { %p389_p3 = pnand %p388_p2, %p382_p13 }
  0xef   : > { %v230_v6 = vpop.f32.mrb[0].mxu0 }
  0xf0   : > { %v231_v7 = vadd.f32 %v317_v5, %v230_v6  ;;  %v334_v8 = vpop.f32.mrb[1].mxu0 }
  0xf1   : > { %v233_v9 = vpop.f32.mrb[2].mxu0 }
  0xf2   : > { %v335_v10 = vpop.f32.mrb[3].mxu0  ;;  %237 = vst.msk [vmem:[%s161_s11] sm:$0xff] %vm236_vm2, %v231_v7 }
  0xf3   : > { %392 = shalt.err (!%p389_p3)
}
  0xf4   : > { %s393_s29 = scalar_lea.hbm %s533_s24, 128  ;;  %s397_s5 = scalar_lea.hbm %s578_s3, 256 }
  0xf5   : > { %p394_p4 = scmp.ne.s32.totalorder %s533_s24, %s393_s29  ;;  %p398_p9 = scmp.lt.u32.totalorder %s533_s24, %s578_s3 }
  0xf6   : > { %p399_p10 = scmp.lt.u32.totalorder %s397_s5, %s393_s29  ;;  %p401_p12 = scmp.lt.u32.totalorder %s393_s29, %s533_s24 }
  0xf7   : > { %p395_p7 = pnand %p394_p4, %p504_p5 }
  0xf8   : > { %p400_p11 = por %p399_p10, %p398_p9 }
  0xf9   : > { %p396_p8 = pneg %p395_p7 }
  0xfa   : > { %p402_p13 = por %p401_p12, %p400_p11 }
  0xfc   : > { %p403_p0 = pnand %p402_p13, %p396_p8 }
  0xfe   : > { %406 = shalt.err (!%p403_p0)
}
  0xff   : > { %336 = dma.vmem_to_hbm [thread:$0]  (%p504_p5), %s535_s17, 128, %s533_s24, %s239_s16  }
 0x100 PF: > { %p342_p1 = scmp.ge.s32.totalorder %s441_s15, 2  ;;  %s264_s8 = sand.u32 1, %s429_s12  }
 0x101   : > { %s265_s9 = scalar_lea.sflag [#allocation3], %s264_s8 }
 0x102   : > { %p339_p2 = pnand %p342_p1, %p508_p6 }
 0x104   : > { %424 = dma.done.wait (!%p339_p2), %s265_s9, 128  }
 0x105   : > { %426 = vsyncadd (!%p339_p2), %s265_s9, 4294967168  ;;  %p13_p3 = scmp.ge.s32.totalorder %s491_s18, 4   ;;  %s581_s12 = smov %s433_s13 }
 0x106   : > { %s582_s13 = smov %s437_s14  ;;  %s583_s14 = smov %s502_s21 }
 0x107   : > { %s584_s15 = smov %s491_s18  ;;  %15 = sbr.rel (!%p13_p3) target bundleno = 3 (0x3), region = 67 }
 0x10e   :  { %270 = vsyncpa [#allocation3], 1 }
 0x10f   :  { %272 = vsyncpa [#allocation3 + $0x1], 1 }

</bundles_post_ra>
